<compile_context>
chip_gen: v7x
topology: tpu7x:2x2x1
jax: 0.10.0
libtpu: 0.0.40
codegen_flags: <defaults>
</compile_context>

<pallas_src>
import functools

import jax
import jax.numpy as jnp
from jax.experimental import pallas as pl
from jax.experimental.pallas import tpu as pltpu

EPS = 1e-5
NEG_SLOPE = 0.1
LANE = 128
MIB = 1024 * 1024


def _round_up(v, m):
    return ((v + m - 1) // m) * m


def _vmem_capacity_bytes():
    try:
        return int(pltpu.get_tpu_info().vmem_capacity_bytes)
    except Exception:
        return 128 * MIB


def _pick_row_tile(H, W, Cp):
    """Largest divisor of H whose (th, W, Cp) f32 tile fits the per-stream
    budget: ~4 MiB on 128-MiB-VMEM chips (v5e/v6e), ~2 MiB on 64-MiB v7x.
    Larger tiles also give the MXU a larger M dimension (>=256 preferred)."""
    target = 4 * MIB if _vmem_capacity_bytes() >= 96 * MIB else 2 * MIB
    best = 1
    for th in range(1, H + 1):
        if H % th == 0 and th * W * Cp * 4 <= target:
            best = th
    return best


# ---------------------------------------------------------------------------
# Kernels
# ---------------------------------------------------------------------------
def _conv1_stats_kernel(x_ref, w1_ref, st_ref, *, th, W):
    """z1 = x @ w1 (bf16 MXU, f32 acc); emit per-tile [sum; sumsq] rows."""
    Cp = x_ref.shape[-1]
    xb = x_ref[0].reshape(th * W, Cp).astype(jnp.bfloat16)
    z = jnp.dot(xb, w1_ref[...], preferred_element_type=jnp.float32)
    st_ref[0] = jnp.concatenate(
        [jnp.sum(z, axis=0, keepdims=True),
         jnp.sum(z * z, axis=0, keepdims=True)], axis=0)


def _conv1_bn_kernel(x_ref, w1_ref, s1_ref, t1_ref, h_ref, *, th, W):
    """h = LeakyReLU(z1 * scale1 + shift1); written to HBM as bf16."""
    Cp = x_ref.shape[-1]
    Chp = w1_ref.shape[-1]
    xb = x_ref[0].reshape(th * W, Cp).astype(jnp.bfloat16)
    z1 = jnp.dot(xb, w1_ref[...], preferred_element_type=jnp.float32)
    h = z1 * s1_ref[...] + t1_ref[...]          # folded BN: one FMA per element
    h = jnp.where(h > 0, h, NEG_SLOPE * h)
    h_ref[0] = h.reshape(th, W, Chp).astype(h_ref.dtype)


def _conv3x3_kernel(h_ref, w2_ref, z2_ref, st_ref, bl_ref, bc_ref, br_ref,
                    *, H, W, Wp, th):
    """3x3 conv (pad=1) of the bf16 h image, output row-tiled.

    h_ref : (1, H, W, Chp) bf16  -- whole image, VMEM-resident per image
    w2_ref: (9, Chp, Cp)   bf16  -- resident weights (ky*3+kx major)
    z2_ref: (1, th, W, Cp) bf16  -- output row tile
    st_ref: (1, 2, Cp)     f32   -- [sum; sumsq] partials for BN2
    b*_ref: ((th+2)*Wp, Chp) bf16 -- dx-shifted, zero-padded flat row windows
    """
    i = pl.program_id(1)
    Chp = h_ref.shape[-1]
    Cp = w2_ref.shape[-1]
    r0 = i * th

    # This tile's rows plus one halo row above/below (zeroed at image edges).
    mid = h_ref[0, pl.ds(r0, th), :, :]                            # (th, W, Chp)
    top = h_ref[0, pl.ds(jnp.maximum(r0 - 1, 0), 1), :, :]         # (1,  W, Chp)
    bot = h_ref[0, pl.ds(jnp.minimum(r0 + th, H - 1), 1), :, :]
    top = top * (i > 0).astype(top.dtype)
    bot = bot * (i + 1 < pl.num_programs(1)).astype(bot.dtype)
    full = jnp.concatenate([top, mid, bot], axis=0)                # (th+2, W, Chp)

    # Three dx-shifted, zero-padded copies so every one of the 9 taps below is
    # an aligned, *static* leading-dim slice of a flat (rows, Chp) buffer
    # (no strided slice + stride-changing reshape copies; single aligned
    # whole-buffer stores, no masked RMW edge writes).
    zcol = jnp.zeros((th + 2, 1, Chp), full.dtype)
    shifted = (jnp.concatenate([zcol, full[:, :W - 1, :]], axis=1),   # reads x-1
               full,                                                   # reads x
               jnp.concatenate([full[:, 1:, :], zcol], axis=1))        # reads x+1
    for buf, val in zip((bl_ref, bc_ref, br_ref), shifted):
        if Wp > W:
            val = jnp.pad(val, ((0, 0), (0, Wp - W), (0, 0)))
        buf[...] = val.reshape((th + 2) * Wp, Chp)

    # 3x3 conv = 9 shifted MXU matmuls, accumulated in ~256-row chunks so the
    # f32 accumulator stays (mostly) register-resident instead of spilling a
    # full-tile value 9 times.
    rows_per_chunk = max(1, 256 // Wp)                 # image rows per chunk
    rows_per_chunk = max(rows_per_chunk, -(-th // 32))  # bound unrolled chunks
    rows_per_chunk = min(rows_per_chunk, th)
    ssum = jnp.zeros((1, Cp), jnp.float32)
    ssq = jnp.zeros((1, Cp), jnp.float32)
    for k0 in range(0, th, rows_per_chunk):
        kr = min(rows_per_chunk, th - k0)
        nrow = kr * Wp
        acc = jnp.zeros((nrow, Cp), jnp.float32)
        for dy in range(3):
            base = (k0 + dy) * Wp
            for dx, buf in enumerate((bl_ref, bc_ref, br_ref)):
                acc = acc + jnp.dot(buf[base:base + nrow, :],
                                    w2_ref[dy * 3 + dx],
                                    preferred_element_type=jnp.float32)
        masked = acc
        if Wp != W:  # exclude zero-padded columns from the BN statistics
            col = jax.lax.broadcasted_iota(jnp.int32, (nrow, 1), 0) % Wp
            masked = jnp.where(col < W, acc, 0.0)
        ssum = ssum + jnp.sum(masked, axis=0, keepdims=True)
        ssq = ssq + jnp.sum(masked * masked, axis=0, keepdims=True)
        z2_ref[0, k0:k0 + kr, :, :] = (
            acc.reshape(kr, Wp, Cp)[:, :W, :].astype(z2_ref.dtype))
    st_ref[0] = jnp.concatenate([ssum, ssq], axis=0)


def _bn2_res_kernel(z2_ref, s2_ref, t2_ref, *rest, use_residual, fuse_next,
                    th, W):
    """Folded BN2 FMA + LeakyReLU (+ residual). When fuse_next, also runs the
    NEXT repeat's 1x1 matmul on the fresh tile and emits its BN1 stat partials
    (saves a full activation re-read + matmul for every repeat after the 1st).
    """
    rest = list(rest)
    x_ref = rest.pop(0) if use_residual else None
    w1n_ref = rest.pop(0) if fuse_next else None
    o_ref = rest.pop(0)
    st_ref = rest.pop(0) if fuse_next else None

    Cp = z2_ref.shape[-1]
    zn = z2_ref[0].astype(jnp.float32) * s2_ref[...] + t2_ref[...]
    act = jnp.where(zn > 0, zn, NEG_SLOPE * zn)
    if use_residual:
        act = act + x_ref[0]
    o_ref[0] = act
    if fuse_next:
        xb = act.reshape(th * W, Cp).astype(jnp.bfloat16)
        z1 = jnp.dot(xb, w1n_ref[...], preferred_element_type=jnp.float32)
        st_ref[0] = jnp.concatenate(
            [jnp.sum(z1, axis=0, keepdims=True),
             jnp.sum(z1 * z1, axis=0, keepdims=True)], axis=0)


# ---------------------------------------------------------------------------
# pallas_call wrappers
# ---------------------------------------------------------------------------
def _conv1_stats(x, w1p, th):
    N, H, W, Cp = x.shape
    Chp = w1p.shape[1]
    GH = H // th
    M = N * H * W
    kern = functools.partial(_conv1_stats_kernel, th=th, W=W)
    return pl.pallas_call(
        kern,
        out_shape=jax.ShapeDtypeStruct((N * GH, 2, Chp), jnp.float32),
        grid_spec=pltpu.PrefetchScalarGridSpec(
            num_scalar_prefetch=0,
            grid=(N, GH),
            in_specs=[
                pl.BlockSpec((1, th, W, Cp), lambda n, i: (n, i, 0, 0)),
                pl.BlockSpec((Cp, Chp), lambda n, i: (0, 0)),   # resident weight
            ],
            out_specs=pl.BlockSpec((1, 2, Chp), lambda n, i: (n * GH + i, 0, 0)),
        ),
        compiler_params=pltpu.CompilerParams(
            dimension_semantics=("parallel", "parallel"),
            vmem_limit_bytes=32 * MIB),
        cost_estimate=pl.CostEstimate(
            flops=2 * M * Cp * Chp, transcendentals=0,
            bytes_accessed=M * Cp * 4 + Cp * Chp * 2 + N * GH * 2 * Chp * 4),
    )(x, w1p)


def _conv1_bn(x, w1p, scale1, shift1, th):
    N, H, W, Cp = x.shape
    Chp = w1p.shape[1]
    GH = H // th
    M = N * H * W
    kern = functools.partial(_conv1_bn_kernel, th=th, W=W)
    return pl.pallas_call(
        kern,
        out_shape=jax.ShapeDtypeStruct((N, H, W, Chp), jnp.bfloat16),
        grid_spec=pltpu.PrefetchScalarGridSpec(
            num_scalar_prefetch=0,
            grid=(N, GH),
            in_specs=[
                pl.BlockSpec((1, th, W, Cp), lambda n, i: (n, i, 0, 0)),
                pl.BlockSpec((Cp, Chp), lambda n, i: (0, 0)),    # resident
                pl.BlockSpec((1, Chp), lambda n, i: (0, 0)),     # resident
                pl.BlockSpec((1, Chp), lambda n, i: (0, 0)),     # resident
            ],
            out_specs=pl.BlockSpec((1, th, W, Chp), lambda n, i: (n, i, 0, 0)),
        ),
        compiler_params=pltpu.CompilerParams(
            dimension_semantics=("parallel", "parallel"),
            vmem_limit_bytes=32 * MIB),
        cost_estimate=pl.CostEstimate(
            flops=2 * M * Cp * Chp + 4 * M * Chp, transcendentals=0,
            bytes_accessed=M * Cp * 4 + M * Chp * 2 + Cp * Chp * 2),
    )(x, w1p, scale1, shift1)


def _conv3x3(h, w2r, th):
    N, H, W, Chp = h.shape
    Cp = w2r.shape[-1]
    GH = H // th
    Wp = _round_up(W, 8)
    M = N * H * W
    kern = functools.partial(_conv3x3_kernel, H=H, W=W, Wp=Wp, th=th)
    scratch = [pltpu.VMEM(((th + 2) * Wp, Chp), jnp.bfloat16) for _ in range(3)]
    # Actual footprint + headroom (review: size vmem_limit to the real need).
    need = (2 * H * W * Chp * 2            # resident bf16 h image (dbuf)
            + 2 * th * W * Cp * 2          # z2 output tiles (dbuf)
            + 3 * (th + 2) * Wp * Chp * 2  # shifted halo scratch
            + 9 * Chp * Cp * 2             # weights
            + 4 * 2 * Cp * 4               # stats tiles
            + 8 * MIB)                     # Mosaic internal scratch headroom
    vmem_limit = int(min(max(32 * MIB, need),
                         int(0.9 * _vmem_capacity_bytes())))
    return pl.pallas_call(
        kern,
        out_shape=(jax.ShapeDtypeStruct((N, H, W, Cp), jnp.bfloat16),
                   jax.ShapeDtypeStruct((N * GH, 2, Cp), jnp.float32)),
        grid_spec=pltpu.PrefetchScalarGridSpec(
            num_scalar_prefetch=0,
            grid=(N, GH),
            in_specs=[
                pl.BlockSpec((1, H, W, Chp), lambda n, i: (n, 0, 0, 0)),  # resident per image
                pl.BlockSpec((9, Chp, Cp), lambda n, i: (0, 0, 0)),       # resident
            ],
            out_specs=(pl.BlockSpec((1, th, W, Cp), lambda n, i: (n, i, 0, 0)),
                       pl.BlockSpec((1, 2, Cp), lambda n, i: (n * GH + i, 0, 0))),
            scratch_shapes=scratch,
        ),
        compiler_params=pltpu.CompilerParams(
            dimension_semantics=("parallel", "parallel"),
            vmem_limit_bytes=vmem_limit),
        cost_estimate=pl.CostEstimate(
            flops=2 * M * 9 * Chp * Cp, transcendentals=0,
            bytes_accessed=(M * Chp * 2 + M * Cp * 2 + 9 * Chp * Cp * 2
                            + N * GH * 2 * Cp * 4)),
    )(h, w2r)


def _bn2_res(z2, scale2, shift2, x, w1p_next, use_residual, th):
    N, H, W, Cp = z2.shape
    GH = H // th
    M = N * H * W
    fuse_next = w1p_next is not None
    kern = functools.partial(_bn2_res_kernel, use_residual=bool(use_residual),
                             fuse_next=fuse_next, th=th, W=W)
    in_specs = [
        pl.BlockSpec((1, th, W, Cp), lambda n, i: (n, i, 0, 0)),
        pl.BlockSpec((1, Cp), lambda n, i: (0, 0)),
        pl.BlockSpec((1, Cp), lambda n, i: (0, 0)),
    ]
    args = [z2, scale2, shift2]
    if use_residual:
        in_specs.append(pl.BlockSpec((1, th, W, Cp), lambda n, i: (n, i, 0, 0)))
        args.append(x)
    flops = 4 * M * Cp
    if fuse_next:
        Chp = w1p_next.shape[1]
        in_specs.append(pl.BlockSpec((Cp, Chp), lambda n, i: (0, 0)))  # resident
        args.append(w1p_next)
        out_shape = (jax.ShapeDtypeStruct((N, H, W, Cp), jnp.float32),
                     jax.ShapeDtypeStruct((N * GH, 2, Chp), jnp.float32))
        out_specs = (pl.BlockSpec((1, th, W, Cp), lambda n, i: (n, i, 0, 0)),
                     pl.BlockSpec((1, 2, Chp), lambda n, i: (n * GH + i, 0, 0)))
        flops += 2 * M * Cp * Chp
    else:
        out_shape = jax.ShapeDtypeStruct((N, H, W, Cp), jnp.float32)
        out_specs = pl.BlockSpec((1, th, W, Cp), lambda n, i: (n, i, 0, 0))
    n_bytes = M * Cp * 2 + M * Cp * 4 + (M * Cp * 4 if use_residual else 0)
    return pl.pallas_call(
        kern,
        out_shape=out_shape,
        grid_spec=pltpu.PrefetchScalarGridSpec(
            num_scalar_prefetch=0,
            grid=(N, GH),
            in_specs=in_specs,
            out_specs=out_specs,
        ),
        compiler_params=pltpu.CompilerParams(
            dimension_semantics=("parallel", "parallel"),
            vmem_limit_bytes=32 * MIB),
        cost_estimate=pl.CostEstimate(
            flops=flops, transcendentals=0, bytes_accessed=n_bytes),
    )(*args)


# ---------------------------------------------------------------------------
# Forward pass (wrapper = layout / per-channel glue; hot path is in kernels)
# ---------------------------------------------------------------------------
def residual_block_forward(x_nchw, params, use_residual=True):
    x = jnp.transpose(x_nchw, (0, 2, 3, 1)).astype(jnp.float32)   # NCHW -> NHWC
    N, H, W, C = x.shape
    Ch = C // 2
    Cp = _round_up(C, LANE)
    Chp = _round_up(Ch, LANE)
    M = N * H * W
    x = jnp.pad(x, ((0, 0), (0, 0), (0, 0), (0, Cp - C)))   # lane-dense channels
    th = _pick_row_tile(H, W, Cp)
    nrep = len(params)

    # Pad channels / pre-cast conv weights to bf16 (MXU-native) once.
    prepped = []
    for (w1, g1, b1, w2, g2, b2) in params:
        w1p = jnp.pad(w1, ((0, Cp - C), (0, Chp - Ch))).astype(jnp.bfloat16)
        w2r = jnp.pad(w2, ((0, 0), (0, 0), (0, Chp - Ch), (0, Cp - C))
                      ).reshape(9, Chp, Cp).astype(jnp.bfloat16)
        g1p = jnp.pad(g1, ((0, 0), (0, Chp - Ch)))[0]
        b1p = jnp.pad(b1, ((0, 0), (0, Chp - Ch)))[0]
        g2p = jnp.pad(g2, ((0, 0), (0, Cp - C)))[0]
        b2p = jnp.pad(b2, ((0, 0), (0, Cp - C)))[0]
        prepped.append((w1p, w2r, g1p, b1p, g2p, b2p))

    # Standalone conv1-stats pass only for the first repeat; later repeats get
    # their BN1 stats fused into the previous repeat's pass C.
    st1 = _conv1_stats(x, prepped[0][0], th)

    for r in range(nrep):
        w1p, w2r, g1p, b1p, g2p, b2p = prepped[r]

        mean1 = st1[:, 0, :].sum(axis=0) / M
        var1 = jnp.maximum(st1[:, 1, :].sum(axis=0) / M - mean1 * mean1, 0.0)
        inv1 = jax.lax.rsqrt(var1 + EPS)
        scale1 = (g1p * inv1).reshape(1, Chp)
        shift1 = (b1p - mean1 * g1p * inv1).reshape(1, Chp)

        # Pass B1: 1x1 conv + folded BN1 + LeakyReLU -> h (bf16, HBM).
        h = _conv1_bn(x, w1p, scale1, shift1, th)
        # Pass B2: 3x3 conv of h (output row-tiled) -> z2 (bf16) + BN2 partials.
        z2, st2 = _conv3x3(h, w2r, th)

        mean2 = st2[:, 0, :].sum(axis=0) / M
        var2 = jnp.maximum(st2[:, 1, :].sum(axis=0) / M - mean2 * mean2, 0.0)
        inv2 = jax.lax.rsqrt(var2 + EPS)
        scale2 = (g2p * inv2).reshape(1, Cp)
        shift2 = (b2p - mean2 * g2p * inv2).reshape(1, Cp)

        # Pass C: BN2 apply + LeakyReLU + residual (+ next repeat's BN1 stats).
        w1p_next = prepped[r + 1][0] if r + 1 < nrep else None
        if w1p_next is not None:
            x, st1 = _bn2_res(z2, scale2, shift2, x, w1p_next, use_residual, th)
        else:
            x = _bn2_res(z2, scale2, shift2, x, None, use_residual, th)

    return jnp.transpose(x[..., :C], (0, 3, 1, 2))          # NHWC -> NCHW


# ---------------------------------------------------------------------------
# Pure-JAX reference.  Matches the kernel's intentional approximations:
# conv operands in bf16 with f32 accumulation (what the MXU does), and z2
# stored as bf16 before the BN2 apply (stats still taken from f32 z2).
# ---------------------------------------------------------------------------
def reference_forward(x_nchw, params, use_residual=True):
    x = jnp.transpose(x_nchw, (0, 2, 3, 1)).astype(jnp.float32)
    dn = ("NHWC", "HWIO", "NHWC")

    def conv(lhs, w, padding):
        return jax.lax.conv_general_dilated(
            lhs.astype(jnp.bfloat16), w.astype(jnp.bfloat16), (1, 1), padding,
            dimension_numbers=dn, preferred_element_type=jnp.float32)

    def bn_leaky(z, g, b, quantize=False):
        mean = jnp.mean(z, axis=(0, 1, 2), keepdims=True)
        var = jnp.mean((z - mean) ** 2, axis=(0, 1, 2), keepdims=True)
        zq = z.astype(jnp.bfloat16).astype(jnp.float32) if quantize else z
        zn = (zq - mean) * jax.lax.rsqrt(var + EPS)
        zn = zn * g.reshape(1, 1, 1, -1) + b.reshape(1, 1, 1, -1)
        return jnp.where(zn > 0, zn, NEG_SLOPE * zn)

    for (w1, g1, b1, w2, g2, b2) in params:
        h = bn_leaky(conv(x, w1.reshape(1, 1, *w1.shape), "VALID"), g1, b1)
        y = bn_leaky(conv(h, w2, "SAME"), g2, b2, quantize=True)
        x = y + float(use_residual) * x
    return jnp.transpose(x, (0, 3, 1, 2))


# ---------------------------------------------------------------------------
# Deterministic parameter construction (matches nn module shapes)
# ---------------------------------------------------------------------------
def make_params(key, channels, num_repeats):
    C, Ch = channels, channels // 2
    params = []
    for _ in range(num_repeats):
        key, k1, k2 = jax.random.split(key, 3)
        w1 = 0.1 * jax.random.normal(k1, (C, Ch), jnp.float32)        # 1x1 conv
        g1 = jnp.ones((1, Ch), jnp.float32)                            # BN gamma
        b1 = jnp.zeros((1, Ch), jnp.float32)                           # BN beta
        w2 = 0.1 * jax.random.normal(k2, (3, 3, Ch, C), jnp.float32)   # 3x3 HWIO
        g2 = jnp.ones((1, C), jnp.float32)
        b2 = jnp.zeros((1, C), jnp.float32)
        params.append((w1, g1, b1, w2, g2, b2))
    return params


if __name__ == "__main__":
    key = jax.random.PRNGKey(0)
    kx, kp = jax.random.split(key)

    N, C, H, W = 2, 4, 16, 16
    num_repeats = 2
    use_residual = True

    x = jax.random.normal(kx, (N, C, H, W), jnp.float32)   # NCHW like PyTorch
    params = make_params(kp, C, num_repeats)

    fwd = jax.jit(functools.partial(residual_block_forward,
                                    use_residual=use_residual))
    out = jax.block_until_ready(fwd(x, params))

    ref = jax.block_until_ready(reference_forward(x, params, use_residual))
    assert out.shape == (N, C, H, W)
    err = float(jnp.max(jnp.abs(out - ref)))
    # atol covers a single bf16 ulp of z2 relative to its own std (~4e-3) in
    # case an MXU-vs-XLA accumulation-order difference flips one rounding.
    assert jnp.allclose(out, ref, rtol=2e-3, atol=1e-2), f"max abs err {err}"

    print("KERNEL_OK")
</pallas_src>

<mosaic_0001>
module attributes {stable_mosaic.version = 11 : i64} {
  func.func @_conv1_stats_kernel(%arg0: i32, %arg1: i32, %arg2: memref<1x16x16x128xf32, #tpu.memory_space<vmem>>, %arg3: memref<128x128xbf16, #tpu.memory_space<vmem>>, %arg4: memref<1x2x128xf32, #tpu.memory_space<vmem>>) attributes {dimension_semantics = [#tpu.dimension_semantics<parallel>, #tpu.dimension_semantics<parallel>], iteration_bounds = array<i64: 2, 1>, scalar_prefetch = 0 : i64, scratch_operands = 0 : i64, tpu.core_type = #tpu.core_type<tc>, window_params = [{transform_indices = @transform_0, window_bounds = array<i64: 1, 16, 16, 128>}, {pipeline_mode = #tpu.pipeline_mode<synchronous>, transform_indices = @transform_1, window_bounds = array<i64: 128, 128>}, {transform_indices = @transform_2, window_bounds = array<i64: 1, 2, 128>}]} {
    %c0 = arith.constant 0 : index
    %c0_0 = arith.constant 0 : index
    %c0_1 = arith.constant 0 : index
    %c0_2 = arith.constant 0 : index
    %0 = vector.load %arg2[%c0, %c0_0, %c0_1, %c0_2] : memref<1x16x16x128xf32, #tpu.memory_space<vmem>>, vector<1x16x16x128xf32>
    %1 = vector.shape_cast %0 : vector<1x16x16x128xf32> to vector<16x16x128xf32>
    %2 = vector.shape_cast %1 : vector<16x16x128xf32> to vector<256x128xf32>
    %3 = arith.truncf %2 : vector<256x128xf32> to vector<256x128xbf16>
    %c0_3 = arith.constant 0 : index
    %c0_4 = arith.constant 0 : index
    %4 = vector.load %arg3[%c0_3, %c0_4] : memref<128x128xbf16, #tpu.memory_space<vmem>>, vector<128x128xbf16>
    %cst = arith.constant dense<0.000000e+00> : vector<256x128xf32>
    %5 = tpu.matmul %3, %4, %cst {dimension_numbers = #tpu.dot_dimension_numbers<[1], [0], [0], [1], [0, 0, 1, 1], [], []>} : vector<256x128xbf16>, vector<128x128xbf16>, vector<256x128xf32> -> vector<256x128xf32>
    %cst_5 = arith.constant dense<0.000000e+00> : vector<128xf32>
    %6 = vector.multi_reduction <add>, %5, %cst_5 [0] : vector<256x128xf32> to vector<128xf32>
    %7 = vector.shape_cast %6 : vector<128xf32> to vector<1x128xf32>
    %8 = arith.mulf %5, %5 : vector<256x128xf32>
    %cst_6 = arith.constant dense<0.000000e+00> : vector<128xf32>
    %9 = vector.multi_reduction <add>, %8, %cst_6 [0] : vector<256x128xf32> to vector<128xf32>
    %10 = vector.shape_cast %9 : vector<128xf32> to vector<1x128xf32>
    %11 = tpu.concatenate %7, %10 in 0 : vector<1x128xf32>, vector<1x128xf32> -> vector<2x128xf32>
    %c0_7 = arith.constant 0 : index
    %c0_8 = arith.constant 0 : index
    %c0_9 = arith.constant 0 : index
    %12 = vector.load %arg4[%c0_7, %c0_8, %c0_9] : memref<1x2x128xf32, #tpu.memory_space<vmem>>, vector<1x2x128xf32>
    %13 = vector.shape_cast %12 : vector<1x2x128xf32> to vector<2x128xf32>
    %14 = vector.shape_cast %11 : vector<2x128xf32> to vector<1x2x128xf32>
    tpu.vector_store %arg4[%c0_7, %c0_8, %c0_9], %14 {strides = array<i32>} : memref<1x2x128xf32, #tpu.memory_space<vmem>>, vector<1x2x128xf32>,
    return
  }
  func.func @transform_0(%arg0: i32, %arg1: i32) -> (i32, i32, i32, i32) {
    %c0_i32 = arith.constant 0 : i32
    %c0_i32_0 = arith.constant 0 : i32
    %c0_i32_1 = arith.constant 0 : i32
    return %arg0, %arg1, %c0_i32, %c0_i32_0 : i32, i32, i32, i32
  }
  func.func @transform_1(%arg0: i32, %arg1: i32) -> (i32, i32) {
    %c0_i32 = arith.constant 0 : i32
    %c0_i32_0 = arith.constant 0 : i32
    %c0_i32_1 = arith.constant 0 : i32
    return %c0_i32, %c0_i32_0 : i32, i32
  }
  func.func @transform_2(%arg0: i32, %arg1: i32) -> (i32, i32, i32) {
    %c1_i32 = arith.constant 1 : i32
    %0 = arith.muli %arg0, %c1_i32 : i32
    %1 = arith.addi %0, %arg1 : i32
    %c0_i32 = arith.constant 0 : i32
    %c0_i32_0 = arith.constant 0 : i32
    %c0_i32_1 = arith.constant 0 : i32
    return %1, %c0_i32, %c0_i32_0 : i32, i32, i32
  }
}

module attributes {stable_mosaic.version = 11 : i64} {
  func.func @_conv3x3_kernel(%arg0: i32, %arg1: i32, %arg2: memref<1x16x16x128xbf16, #tpu.memory_space<vmem>>, %arg3: memref<9x128x128xbf16, #tpu.memory_space<vmem>>, %arg4: memref<1x16x16x128xbf16, #tpu.memory_space<vmem>>, %arg5: memref<1x2x128xf32, #tpu.memory_space<vmem>>, %arg6: memref<288x128xbf16, #tpu.memory_space<vmem>>, %arg7: memref<288x128xbf16, #tpu.memory_space<vmem>>, %arg8: memref<288x128xbf16, #tpu.memory_space<vmem>>) attributes {dimension_semantics = [#tpu.dimension_semantics<parallel>, #tpu.dimension_semantics<parallel>], iteration_bounds = array<i64: 2, 1>, scalar_prefetch = 0 : i64, scratch_operands = 3 : i64, tpu.core_type = #tpu.core_type<tc>, window_params = [{transform_indices = @transform_0, window_bounds = array<i64: 1, 16, 16, 128>}, {pipeline_mode = #tpu.pipeline_mode<synchronous>, transform_indices = @transform_1, window_bounds = array<i64: 9, 128, 128>}, {transform_indices = @transform_2, window_bounds = array<i64: 1, 16, 16, 128>}, {transform_indices = @transform_3, window_bounds = array<i64: 1, 2, 128>}]} {
    %c16_i32 = arith.constant 16 : i32
    %0 = arith.muli %arg1, %c16_i32 : i32
    %c0 = arith.constant 0 : index
    %1 = arith.index_cast %0 : i32 to index
    %c0_0 = arith.constant 0 : index
    %c0_1 = arith.constant 0 : index
    %2 = vector.load %arg2[%c0, %1, %c0_0, %c0_1] : memref<1x16x16x128xbf16, #tpu.memory_space<vmem>>, vector<1x16x16x128xbf16>
    %3 = vector.shape_cast %2 : vector<1x16x16x128xbf16> to vector<16x16x128xbf16>
    %c1_i32 = arith.constant 1 : i32
    %4 = arith.subi %0, %c1_i32 : i32
    %c0_i32 = arith.constant 0 : i32
    %5 = arith.maxsi %4, %c0_i32 : i32
    %c0_2 = arith.constant 0 : index
    %6 = arith.index_cast %5 : i32 to index
    %c0_3 = arith.constant 0 : index
    %c0_4 = arith.constant 0 : index
    %7 = vector.load %arg2[%c0_2, %6, %c0_3, %c0_4] : memref<1x16x16x128xbf16, #tpu.memory_space<vmem>>, vector<1x1x16x128xbf16>
    %8 = vector.shape_cast %7 : vector<1x1x16x128xbf16> to vector<1x16x128xbf16>
    %c16_i32_5 = arith.constant 16 : i32
    %9 = arith.addi %0, %c16_i32_5 : i32
    %c15_i32 = arith.constant 15 : i32
    %10 = arith.minsi %9, %c15_i32 : i32
    %c0_6 = arith.constant 0 : index
    %11 = arith.index_cast %10 : i32 to index
    %c0_7 = arith.constant 0 : index
    %c0_8 = arith.constant 0 : index
    %12 = vector.load %arg2[%c0_6, %11, %c0_7, %c0_8] : memref<1x16x16x128xbf16, #tpu.memory_space<vmem>>, vector<1x1x16x128xbf16>
    %13 = vector.shape_cast %12 : vector<1x1x16x128xbf16> to vector<1x16x128xbf16>
    %c0_i32_9 = arith.constant 0 : i32
    %14 = arith.cmpi sgt, %arg1, %c0_i32_9 : i32
    %15 = arith.extui %14 : i1 to i32
    %16 = arith.sitofp %15 : i32 to f32
    %17 = arith.truncf %16 : f32 to bf16
    %18 = vector.broadcast %17 : bf16 to vector<1x16x128xbf16>
    %19 = arith.mulf %8, %18 : vector<1x16x128xbf16>
    %c1_i32_10 = arith.constant 1 : i32
    %20 = arith.addi %arg1, %c1_i32_10 : i32
    %c1_i32_11 = arith.constant 1 : i32
    %21 = arith.cmpi slt, %20, %c1_i32_11 : i32
    %22 = arith.extui %21 : i1 to i32
    %23 = arith.sitofp %22 : i32 to f32
    %24 = arith.truncf %23 : f32 to bf16
    %25 = vector.broadcast %24 : bf16 to vector<1x16x128xbf16>
    %26 = arith.mulf %13, %25 : vector<1x16x128xbf16>
    %27 = tpu.concatenate %19, %3, %26 in 0 : vector<1x16x128xbf16>, vector<16x16x128xbf16>, vector<1x16x128xbf16> -> vector<18x16x128xbf16>
    %cst = arith.constant 0.000000e+00 : bf16
    %28 = vector.broadcast %cst : bf16 to vector<18x1x128xbf16>
    %29 = vector.extract_strided_slice %27 {offsets = [0, 0, 0], sizes = [18, 15, 128], strides = [1, 1, 1]} : vector<18x16x128xbf16> to vector<18x15x128xbf16>
    %30 = tpu.concatenate %28, %29 in 1 : vector<18x1x128xbf16>, vector<18x15x128xbf16> -> vector<18x16x128xbf16>
    %31 = vector.extract_strided_slice %27 {offsets = [0, 1, 0], sizes = [18, 15, 128], strides = [1, 1, 1]} : vector<18x16x128xbf16> to vector<18x15x128xbf16>
    %32 = tpu.concatenate %31, %28 in 1 : vector<18x15x128xbf16>, vector<18x1x128xbf16> -> vector<18x16x128xbf16>
    %33 = vector.shape_cast %30 : vector<18x16x128xbf16> to vector<288x128xbf16>
    %c0_12 = arith.constant 0 : index
    %c0_13 = arith.constant 0 : index
    %34 = vector.load %arg6[%c0_12, %c0_13] : memref<288x128xbf16, #tpu.memory_space<vmem>>, vector<288x128xbf16>
    tpu.vector_store %arg6[%c0_12, %c0_13], %33 {strides = array<i32>} : memref<288x128xbf16, #tpu.memory_space<vmem>>, vector<288x128xbf16>,
    %35 = vector.shape_cast %27 : vector<18x16x128xbf16> to vector<288x128xbf16>
    %c0_14 = arith.constant 0 : index
    %c0_15 = arith.constant 0 : index
    %36 = vector.load %arg7[%c0_14, %c0_15] : memref<288x128xbf16, #tpu.memory_space<vmem>>, vector<288x128xbf16>
    tpu.vector_store %arg7[%c0_14, %c0_15], %35 {strides = array<i32>} : memref<288x128xbf16, #tpu.memory_space<vmem>>, vector<288x128xbf16>,
    %37 = vector.shape_cast %32 : vector<18x16x128xbf16> to vector<288x128xbf16>
    %c0_16 = arith.constant 0 : index
    %c0_17 = arith.constant 0 : index
    %38 = vector.load %arg8[%c0_16, %c0_17] : memref<288x128xbf16, #tpu.memory_space<vmem>>, vector<288x128xbf16>
    tpu.vector_store %arg8[%c0_16, %c0_17], %37 {strides = array<i32>} : memref<288x128xbf16, #tpu.memory_space<vmem>>, vector<288x128xbf16>,
    %cst_18 = arith.constant 0.000000e+00 : f32
    %39 = vector.broadcast %cst_18 : f32 to vector<1x128xf32>
    %cst_19 = arith.constant 0.000000e+00 : f32
    %40 = vector.broadcast %cst_19 : f32 to vector<1x128xf32>
    %cst_20 = arith.constant 0.000000e+00 : f32
    %41 = vector.broadcast %cst_20 : f32 to vector<256x128xf32>
    %c0_21 = arith.constant 0 : index
    %c0_22 = arith.constant 0 : index
    %42 = vector.load %arg6[%c0_21, %c0_22] : memref<288x128xbf16, #tpu.memory_space<vmem>>, vector<256x128xbf16>
    %c0_23 = arith.constant 0 : index
    %c0_24 = arith.constant 0 : index
    %c0_25 = arith.constant 0 : index
    %43 = vector.load %arg3[%c0_23, %c0_24, %c0_25] : memref<9x128x128xbf16, #tpu.memory_space<vmem>>, vector<1x128x128xbf16>
    %44 = vector.shape_cast %43 : vector<1x128x128xbf16> to vector<128x128xbf16>
    %cst_26 = arith.constant dense<0.000000e+00> : vector<256x128xf32>
    %45 = tpu.matmul %42, %44, %cst_26 {dimension_numbers = #tpu.dot_dimension_numbers<[1], [0], [0], [1], [0, 0, 1, 1], [], []>} : vector<256x128xbf16>, vector<128x128xbf16>, vector<256x128xf32> -> vector<256x128xf32>
    %46 = arith.addf %41, %45 : vector<256x128xf32>
    %c0_27 = arith.constant 0 : index
    %c0_28 = arith.constant 0 : index
    %47 = vector.load %arg7[%c0_27, %c0_28] : memref<288x128xbf16, #tpu.memory_space<vmem>>, vector<256x128xbf16>
    %c1 = arith.constant 1 : index
    %c0_29 = arith.constant 0 : index
    %c0_30 = arith.constant 0 : index
    %48 = vector.load %arg3[%c1, %c0_29, %c0_30] : memref<9x128x128xbf16, #tpu.memory_space<vmem>>, vector<1x128x128xbf16>
    %49 = vector.shape_cast %48 : vector<1x128x128xbf16> to vector<128x128xbf16>
    %cst_31 = arith.constant dense<0.000000e+00> : vector<256x128xf32>
    %50 = tpu.matmul %47, %49, %cst_31 {dimension_numbers = #tpu.dot_dimension_numbers<[1], [0], [0], [1], [0, 0, 1, 1], [], []>} : vector<256x128xbf16>, vector<128x128xbf16>, vector<256x128xf32> -> vector<256x128xf32>
    %51 = arith.addf %46, %50 : vector<256x128xf32>
    %c0_32 = arith.constant 0 : index
    %c0_33 = arith.constant 0 : index
    %52 = vector.load %arg8[%c0_32, %c0_33] : memref<288x128xbf16, #tpu.memory_space<vmem>>, vector<256x128xbf16>
    %c2 = arith.constant 2 : index
    %c0_34 = arith.constant 0 : index
    %c0_35 = arith.constant 0 : index
    %53 = vector.load %arg3[%c2, %c0_34, %c0_35] : memref<9x128x128xbf16, #tpu.memory_space<vmem>>, vector<1x128x128xbf16>
    %54 = vector.shape_cast %53 : vector<1x128x128xbf16> to vector<128x128xbf16>
    %cst_36 = arith.constant dense<0.000000e+00> : vector<256x128xf32>
    %55 = tpu.matmul %52, %54, %cst_36 {dimension_numbers = #tpu.dot_dimension_numbers<[1], [0], [0], [1], [0, 0, 1, 1], [], []>} : vector<256x128xbf16>, vector<128x128xbf16>, vector<256x128xf32> -> vector<256x128xf32>
    %56 = arith.addf %51, %55 : vector<256x128xf32>
    %c16 = arith.constant 16 : index
    %c0_37 = arith.constant 0 : index
    %57 = vector.load %arg6[%c16, %c0_37] : memref<288x128xbf16, #tpu.memory_space<vmem>>, vector<256x128xbf16>
    %c3 = arith.constant 3 : index
    %c0_38 = arith.constant 0 : index
    %c0_39 = arith.constant 0 : index
    %58 = vector.load %arg3[%c3, %c0_38, %c0_39] : memref<9x128x128xbf16, #tpu.memory_space<vmem>>, vector<1x128x128xbf16>
    %59 = vector.shape_cast %58 : vector<1x128x128xbf16> to vector<128x128xbf16>
    %cst_40 = arith.constant dense<0.000000e+00> : vector<256x128xf32>
    %60 = tpu.matmul %57, %59, %cst_40 {dimension_numbers = #tpu.dot_dimension_numbers<[1], [0], [0], [1], [0, 0, 1, 1], [], []>} : vector<256x128xbf16>, vector<128x128xbf16>, vector<256x128xf32> -> vector<256x128xf32>
    %61 = arith.addf %56, %60 : vector<256x128xf32>
    %c16_41 = arith.constant 16 : index
    %c0_42 = arith.constant 0 : index
    %62 = vector.load %arg7[%c16_41, %c0_42] : memref<288x128xbf16, #tpu.memory_space<vmem>>, vector<256x128xbf16>
    %c4 = arith.constant 4 : index
    %c0_43 = arith.constant 0 : index
    %c0_44 = arith.constant 0 : index
    %63 = vector.load %arg3[%c4, %c0_43, %c0_44] : memref<9x128x128xbf16, #tpu.memory_space<vmem>>, vector<1x128x128xbf16>
    %64 = vector.shape_cast %63 : vector<1x128x128xbf16> to vector<128x128xbf16>
    %cst_45 = arith.constant dense<0.000000e+00> : vector<256x128xf32>
    %65 = tpu.matmul %62, %64, %cst_45 {dimension_numbers = #tpu.dot_dimension_numbers<[1], [0], [0], [1], [0, 0, 1, 1], [], []>} : vector<256x128xbf16>, vector<128x128xbf16>, vector<256x128xf32> -> vector<256x128xf32>
    %66 = arith.addf %61, %65 : vector<256x128xf32>
    %c16_46 = arith.constant 16 : index
    %c0_47 = arith.constant 0 : index
    %67 = vector.load %arg8[%c16_46, %c0_47] : memref<288x128xbf16, #tpu.memory_space<vmem>>, vector<256x128xbf16>
    %c5 = arith.constant 5 : index
    %c0_48 = arith.constant 0 : index
    %c0_49 = arith.constant 0 : index
    %68 = vector.load %arg3[%c5, %c0_48, %c0_49] : memref<9x128x128xbf16, #tpu.memory_space<vmem>>, vector<1x128x128xbf16>
    %69 = vector.shape_cast %68 : vector<1x128x128xbf16> to vector<128x128xbf16>
    %cst_50 = arith.constant dense<0.000000e+00> : vector<256x128xf32>
    %70 = tpu.matmul %67, %69, %cst_50 {dimension_numbers = #tpu.dot_dimension_numbers<[1], [0], [0], [1], [0, 0, 1, 1], [], []>} : vector<256x128xbf16>, vector<128x128xbf16>, vector<256x128xf32> -> vector<256x128xf32>
    %71 = arith.addf %66, %70 : vector<256x128xf32>
    %c32 = arith.constant 32 : index
    %c0_51 = arith.constant 0 : index
    %72 = vector.load %arg6[%c32, %c0_51] : memref<288x128xbf16, #tpu.memory_space<vmem>>, vector<256x128xbf16>
    %c6 = arith.constant 6 : index
    %c0_52 = arith.constant 0 : index
    %c0_53 = arith.constant 0 : index
    %73 = vector.load %arg3[%c6, %c0_52, %c0_53] : memref<9x128x128xbf16, #tpu.memory_space<vmem>>, vector<1x128x128xbf16>
    %74 = vector.shape_cast %73 : vector<1x128x128xbf16> to vector<128x128xbf16>
    %cst_54 = arith.constant dense<0.000000e+00> : vector<256x128xf32>
    %75 = tpu.matmul %72, %74, %cst_54 {dimension_numbers = #tpu.dot_dimension_numbers<[1], [0], [0], [1], [0, 0, 1, 1], [], []>} : vector<256x128xbf16>, vector<128x128xbf16>, vector<256x128xf32> -> vector<256x128xf32>
    %76 = arith.addf %71, %75 : vector<256x128xf32>
    %c32_55 = arith.constant 32 : index
    %c0_56 = arith.constant 0 : index
    %77 = vector.load %arg7[%c32_55, %c0_56] : memref<288x128xbf16, #tpu.memory_space<vmem>>, vector<256x128xbf16>
    %c7 = arith.constant 7 : index
    %c0_57 = arith.constant 0 : index
    %c0_58 = arith.constant 0 : index
    %78 = vector.load %arg3[%c7, %c0_57, %c0_58] : memref<9x128x128xbf16, #tpu.memory_space<vmem>>, vector<1x128x128xbf16>
    %79 = vector.shape_cast %78 : vector<1x128x128xbf16> to vector<128x128xbf16>
    %cst_59 = arith.constant dense<0.000000e+00> : vector<256x128xf32>
    %80 = tpu.matmul %77, %79, %cst_59 {dimension_numbers = #tpu.dot_dimension_numbers<[1], [0], [0], [1], [0, 0, 1, 1], [], []>} : vector<256x128xbf16>, vector<128x128xbf16>, vector<256x128xf32> -> vector<256x128xf32>
    %81 = arith.addf %76, %80 : vector<256x128xf32>
    %c32_60 = arith.constant 32 : index
    %c0_61 = arith.constant 0 : index
    %82 = vector.load %arg8[%c32_60, %c0_61] : memref<288x128xbf16, #tpu.memory_space<vmem>>, vector<256x128xbf16>
    %c8 = arith.constant 8 : index
    %c0_62 = arith.constant 0 : index
    %c0_63 = arith.constant 0 : index
    %83 = vector.load %arg3[%c8, %c0_62, %c0_63] : memref<9x128x128xbf16, #tpu.memory_space<vmem>>, vector<1x128x128xbf16>
    %84 = vector.shape_cast %83 : vector<1x128x128xbf16> to vector<128x128xbf16>
    %cst_64 = arith.constant dense<0.000000e+00> : vector<256x128xf32>
    %85 = tpu.matmul %82, %84, %cst_64 {dimension_numbers = #tpu.dot_dimension_numbers<[1], [0], [0], [1], [0, 0, 1, 1], [], []>} : vector<256x128xbf16>, vector<128x128xbf16>, vector<256x128xf32> -> vector<256x128xf32>
    %86 = arith.addf %81, %85 : vector<256x128xf32>
    %cst_65 = arith.constant dense<0.000000e+00> : vector<128xf32>
    %87 = vector.multi_reduction <add>, %86, %cst_65 [0] : vector<256x128xf32> to vector<128xf32>
    %88 = vector.shape_cast %87 : vector<128xf32> to vector<1x128xf32>
    %89 = arith.addf %39, %88 : vector<1x128xf32>
    %90 = arith.mulf %86, %86 : vector<256x128xf32>
    %cst_66 = arith.constant dense<0.000000e+00> : vector<128xf32>
    %91 = vector.multi_reduction <add>, %90, %cst_66 [0] : vector<256x128xf32> to vector<128xf32>
    %92 = vector.shape_cast %91 : vector<128xf32> to vector<1x128xf32>
    %93 = arith.addf %40, %92 : vector<1x128xf32>
    %94 = vector.shape_cast %86 : vector<256x128xf32> to vector<16x16x128xf32>
    %95 = arith.truncf %94 : vector<16x16x128xf32> to vector<16x16x128xbf16>
    %c0_67 = arith.constant 0 : index
    %c0_68 = arith.constant 0 : index
    %c0_69 = arith.constant 0 : index
    %c0_70 = arith.constant 0 : index
    %96 = vector.load %arg4[%c0_67, %c0_68, %c0_69, %c0_70] : memref<1x16x16x128xbf16, #tpu.memory_space<vmem>>, vector<1x16x16x128xbf16>
    %97 = vector.shape_cast %96 : vector<1x16x16x128xbf16> to vector<16x16x128xbf16>
    %98 = vector.shape_cast %95 : vector<16x16x128xbf16> to vector<1x16x16x128xbf16>
    tpu.vector_store %arg4[%c0_67, %c0_68, %c0_69, %c0_70], %98 {strides = array<i32>} : memref<1x16x16x128xbf16, #tpu.memory_space<vmem>>, vector<1x16x16x128xbf16>,
    %99 = tpu.concatenate %89, %93 in 0 : vector<1x128xf32>, vector<1x128xf32> -> vector<2x128xf32>
    %c0_71 = arith.constant 0 : index
    %c0_72 = arith.constant 0 : index
    %c0_73 = arith.constant 0 : index
    %100 = vector.load %arg5[%c0_71, %c0_72, %c0_73] : memref<1x2x128xf32, #tpu.memory_space<vmem>>, vector<1x2x128xf32>
    %101 = vector.shape_cast %100 : vector<1x2x128xf32> to vector<2x128xf32>
    %102 = vector.shape_cast %99 : vector<2x128xf32> to vector<1x2x128xf32>
    tpu.vector_store %arg5[%c0_71, %c0_72, %c0_73], %102 {strides = array<i32>} : memref<1x2x128xf32, #tpu.memory_space<vmem>>, vector<1x2x128xf32>,
    return
  }
  func.func @transform_0(%arg0: i32, %arg1: i32) -> (i32, i32, i32, i32) {
    %c0_i32 = arith.constant 0 : i32
    %c0_i32_0 = arith.constant 0 : i32
    %c0_i32_1 = arith.constant 0 : i32
    %c0_i32_2 = arith.constant 0 : i32
    return %arg0, %c0_i32, %c0_i32_0, %c0_i32_1 : i32, i32, i32, i32
  }
  func.func @transform_1(%arg0: i32, %arg1: i32) -> (i32, i32, i32) {
    %c0_i32 = arith.constant 0 : i32
    %c0_i32_0 = arith.constant 0 : i32
    %c0_i32_1 = arith.constant 0 : i32
    %c0_i32_2 = arith.constant 0 : i32
    return %c0_i32, %c0_i32_0, %c0_i32_1 : i32, i32, i32
  }
  func.func @transform_2(%arg0: i32, %arg1: i32) -> (i32, i32, i32, i32) {
    %c0_i32 = arith.constant 0 : i32
    %c0_i32_0 = arith.constant 0 : i32
    %c0_i32_1 = arith.constant 0 : i32
    return %arg0, %arg1, %c0_i32, %c0_i32_0 : i32, i32, i32, i32
  }
  func.func @transform_3(%arg0: i32, %arg1: i32) -> (i32, i32, i32) {
    %c1_i32 = arith.constant 1 : i32
    %0 = arith.muli %arg0, %c1_i32 : i32
    %1 = arith.addi %0, %arg1 : i32
    %c0_i32 = arith.constant 0 : i32
    %c0_i32_0 = arith.constant 0 : i32
    %c0_i32_1 = arith.constant 0 : i32
    return %1, %c0_i32, %c0_i32_0 : i32, i32, i32
  }
}

module attributes {stable_mosaic.version = 11 : i64} {
  func.func @_conv1_bn_kernel(%arg0: i32, %arg1: i32, %arg2: memref<1x16x16x128xf32, #tpu.memory_space<vmem>>, %arg3: memref<128x128xbf16, #tpu.memory_space<vmem>>, %arg4: memref<1x128xf32, #tpu.memory_space<vmem>>, %arg5: memref<1x128xf32, #tpu.memory_space<vmem>>, %arg6: memref<1x16x16x128xbf16, #tpu.memory_space<vmem>>) attributes {dimension_semantics = [#tpu.dimension_semantics<parallel>, #tpu.dimension_semantics<parallel>], iteration_bounds = array<i64: 2, 1>, scalar_prefetch = 0 : i64, scratch_operands = 0 : i64, tpu.core_type = #tpu.core_type<tc>, window_params = [{transform_indices = @transform_0, window_bounds = array<i64: 1, 16, 16, 128>}, {pipeline_mode = #tpu.pipeline_mode<synchronous>, transform_indices = @transform_1, window_bounds = array<i64: 128, 128>}, {pipeline_mode = #tpu.pipeline_mode<synchronous>, transform_indices = @transform_2, window_bounds = array<i64: 1, 128>}, {pipeline_mode = #tpu.pipeline_mode<synchronous>, transform_indices = @transform_3, window_bounds = array<i64: 1, 128>}, {transform_indices = @transform_4, window_bounds = array<i64: 1, 16, 16, 128>}]} {
    %c0 = arith.constant 0 : index
    %c0_0 = arith.constant 0 : index
    %c0_1 = arith.constant 0 : index
    %c0_2 = arith.constant 0 : index
    %0 = vector.load %arg2[%c0, %c0_0, %c0_1, %c0_2] : memref<1x16x16x128xf32, #tpu.memory_space<vmem>>, vector<1x16x16x128xf32>
    %1 = vector.shape_cast %0 : vector<1x16x16x128xf32> to vector<16x16x128xf32>
    %2 = vector.shape_cast %1 : vector<16x16x128xf32> to vector<256x128xf32>
    %3 = arith.truncf %2 : vector<256x128xf32> to vector<256x128xbf16>
    %c0_3 = arith.constant 0 : index
    %c0_4 = arith.constant 0 : index
    %4 = vector.load %arg3[%c0_3, %c0_4] : memref<128x128xbf16, #tpu.memory_space<vmem>>, vector<128x128xbf16>
    %cst = arith.constant dense<0.000000e+00> : vector<256x128xf32>
    %5 = tpu.matmul %3, %4, %cst {dimension_numbers = #tpu.dot_dimension_numbers<[1], [0], [0], [1], [0, 0, 1, 1], [], []>} : vector<256x128xbf16>, vector<128x128xbf16>, vector<256x128xf32> -> vector<256x128xf32>
    %c0_5 = arith.constant 0 : index
    %c0_6 = arith.constant 0 : index
    %6 = vector.load %arg4[%c0_5, %c0_6] : memref<1x128xf32, #tpu.memory_space<vmem>>, vector<1x128xf32>
    %7 = vector.broadcast %6 : vector<1x128xf32> to vector<256x128xf32>
    %8 = arith.mulf %5, %7 : vector<256x128xf32>
    %c0_7 = arith.constant 0 : index
    %c0_8 = arith.constant 0 : index
    %9 = vector.load %arg5[%c0_7, %c0_8] : memref<1x128xf32, #tpu.memory_space<vmem>>, vector<1x128xf32>
    %10 = vector.broadcast %9 : vector<1x128xf32> to vector<256x128xf32>
    %11 = arith.addf %8, %10 : vector<256x128xf32>
    %cst_9 = arith.constant 0.000000e+00 : f32
    %12 = vector.broadcast %cst_9 : f32 to vector<256x128xf32>
    %13 = arith.cmpf ogt, %11, %12 : vector<256x128xf32>
    %cst_10 = arith.constant 1.000000e-01 : f32
    %14 = vector.broadcast %cst_10 : f32 to vector<256x128xf32>
    %15 = arith.mulf %14, %11 : vector<256x128xf32>
    %16 = arith.select %13, %11, %15 : vector<256x128xi1>, vector<256x128xf32>
    %17 = vector.shape_cast %16 : vector<256x128xf32> to vector<16x16x128xf32>
    %18 = arith.truncf %17 : vector<16x16x128xf32> to vector<16x16x128xbf16>
    %c0_11 = arith.constant 0 : index
    %c0_12 = arith.constant 0 : index
    %c0_13 = arith.constant 0 : index
    %c0_14 = arith.constant 0 : index
    %19 = vector.load %arg6[%c0_11, %c0_12, %c0_13, %c0_14] : memref<1x16x16x128xbf16, #tpu.memory_space<vmem>>, vector<1x16x16x128xbf16>
    %20 = vector.shape_cast %19 : vector<1x16x16x128xbf16> to vector<16x16x128xbf16>
    %21 = vector.shape_cast %18 : vector<16x16x128xbf16> to vector<1x16x16x128xbf16>
    tpu.vector_store %arg6[%c0_11, %c0_12, %c0_13, %c0_14], %21 {strides = array<i32>} : memref<1x16x16x128xbf16, #tpu.memory_space<vmem>>, vector<1x16x16x128xbf16>,
    return
  }
  func.func @transform_0(%arg0: i32, %arg1: i32) -> (i32, i32, i32, i32) {
    %c0_i32 = arith.constant 0 : i32
    %c0_i32_0 = arith.constant 0 : i32
    %c0_i32_1 = arith.constant 0 : i32
    return %arg0, %arg1, %c0_i32, %c0_i32_0 : i32, i32, i32, i32
  }
  func.func @transform_1(%arg0: i32, %arg1: i32) -> (i32, i32) {
    %c0_i32 = arith.constant 0 : i32
    %c0_i32_0 = arith.constant 0 : i32
    %c0_i32_1 = arith.constant 0 : i32
    return %c0_i32, %c0_i32_0 : i32, i32
  }
  func.func @transform_2(%arg0: i32, %arg1: i32) -> (i32, i32) {
    %c0_i32 = arith.constant 0 : i32
    %c0_i32_0 = arith.constant 0 : i32
    %c0_i32_1 = arith.constant 0 : i32
    return %c0_i32, %c0_i32_0 : i32, i32
  }
  func.func @transform_3(%arg0: i32, %arg1: i32) -> (i32, i32) {
    %c0_i32 = arith.constant 0 : i32
    %c0_i32_0 = arith.constant 0 : i32
    %c0_i32_1 = arith.constant 0 : i32
    return %c0_i32, %c0_i32_0 : i32, i32
  }
  func.func @transform_4(%arg0: i32, %arg1: i32) -> (i32, i32, i32, i32) {
    %c0_i32 = arith.constant 0 : i32
    %c0_i32_0 = arith.constant 0 : i32
    %c0_i32_1 = arith.constant 0 : i32
    return %arg0, %arg1, %c0_i32, %c0_i32_0 : i32, i32, i32, i32
  }
}

module attributes {stable_mosaic.version = 11 : i64} {
  func.func @_bn2_res_kernel(%arg0: i32, %arg1: i32, %arg2: memref<1x16x16x128xbf16, #tpu.memory_space<vmem>>, %arg3: memref<1x128xf32, #tpu.memory_space<vmem>>, %arg4: memref<1x128xf32, #tpu.memory_space<vmem>>, %arg5: memref<1x16x16x128xf32, #tpu.memory_space<vmem>>, %arg6: memref<128x128xbf16, #tpu.memory_space<vmem>>, %arg7: memref<1x16x16x128xf32, #tpu.memory_space<vmem>>, %arg8: memref<1x2x128xf32, #tpu.memory_space<vmem>>) attributes {dimension_semantics = [#tpu.dimension_semantics<parallel>, #tpu.dimension_semantics<parallel>], iteration_bounds = array<i64: 2, 1>, scalar_prefetch = 0 : i64, scratch_operands = 0 : i64, tpu.core_type = #tpu.core_type<tc>, window_params = [{transform_indices = @transform_0, window_bounds = array<i64: 1, 16, 16, 128>}, {pipeline_mode = #tpu.pipeline_mode<synchronous>, transform_indices = @transform_1, window_bounds = array<i64: 1, 128>}, {pipeline_mode = #tpu.pipeline_mode<synchronous>, transform_indices = @transform_2, window_bounds = array<i64: 1, 128>}, {transform_indices = @transform_3, window_bounds = array<i64: 1, 16, 16, 128>}, {pipeline_mode = #tpu.pipeline_mode<synchronous>, transform_indices = @transform_4, window_bounds = array<i64: 128, 128>}, {transform_indices = @transform_5, window_bounds = array<i64: 1, 16, 16, 128>}, {transform_indices = @transform_6, window_bounds = array<i64: 1, 2, 128>}]} {
    %c0 = arith.constant 0 : index
    %c0_0 = arith.constant 0 : index
    %c0_1 = arith.constant 0 : index
    %c0_2 = arith.constant 0 : index
    %0 = vector.load %arg2[%c0, %c0_0, %c0_1, %c0_2] : memref<1x16x16x128xbf16, #tpu.memory_space<vmem>>, vector<1x16x16x128xbf16>
    %1 = vector.shape_cast %0 : vector<1x16x16x128xbf16> to vector<16x16x128xbf16>
    %2 = arith.extf %1 : vector<16x16x128xbf16> to vector<16x16x128xf32>
    %c0_3 = arith.constant 0 : index
    %c0_4 = arith.constant 0 : index
    %3 = vector.load %arg3[%c0_3, %c0_4] : memref<1x128xf32, #tpu.memory_space<vmem>>, vector<1x128xf32>
    %4 = vector.shape_cast %3 : vector<1x128xf32> to vector<1x1x128xf32>
    %5 = vector.broadcast %4 : vector<1x1x128xf32> to vector<16x16x128xf32>
    %6 = arith.mulf %2, %5 : vector<16x16x128xf32>
    %c0_5 = arith.constant 0 : index
    %c0_6 = arith.constant 0 : index
    %7 = vector.load %arg4[%c0_5, %c0_6] : memref<1x128xf32, #tpu.memory_space<vmem>>, vector<1x128xf32>
    %8 = vector.shape_cast %7 : vector<1x128xf32> to vector<1x1x128xf32>
    %9 = vector.broadcast %8 : vector<1x1x128xf32> to vector<16x16x128xf32>
    %10 = arith.addf %6, %9 : vector<16x16x128xf32>
    %cst = arith.constant 0.000000e+00 : f32
    %11 = vector.broadcast %cst : f32 to vector<16x16x128xf32>
    %12 = arith.cmpf ogt, %10, %11 : vector<16x16x128xf32>
    %cst_7 = arith.constant 1.000000e-01 : f32
    %13 = vector.broadcast %cst_7 : f32 to vector<16x16x128xf32>
    %14 = arith.mulf %13, %10 : vector<16x16x128xf32>
    %15 = arith.select %12, %10, %14 : vector<16x16x128xi1>, vector<16x16x128xf32>
    %c0_8 = arith.constant 0 : index
    %c0_9 = arith.constant 0 : index
    %c0_10 = arith.constant 0 : index
    %c0_11 = arith.constant 0 : index
    %16 = vector.load %arg5[%c0_8, %c0_9, %c0_10, %c0_11] : memref<1x16x16x128xf32, #tpu.memory_space<vmem>>, vector<1x16x16x128xf32>
    %17 = vector.shape_cast %16 : vector<1x16x16x128xf32> to vector<16x16x128xf32>
    %18 = arith.addf %15, %17 : vector<16x16x128xf32>
    %c0_12 = arith.constant 0 : index
    %c0_13 = arith.constant 0 : index
    %c0_14 = arith.constant 0 : index
    %c0_15 = arith.constant 0 : index
    %19 = vector.load %arg7[%c0_12, %c0_13, %c0_14, %c0_15] : memref<1x16x16x128xf32, #tpu.memory_space<vmem>>, vector<1x16x16x128xf32>
    %20 = vector.shape_cast %19 : vector<1x16x16x128xf32> to vector<16x16x128xf32>
    %21 = vector.shape_cast %18 : vector<16x16x128xf32> to vector<1x16x16x128xf32>
    tpu.vector_store %arg7[%c0_12, %c0_13, %c0_14, %c0_15], %21 {strides = array<i32>} : memref<1x16x16x128xf32, #tpu.memory_space<vmem>>, vector<1x16x16x128xf32>,
    %22 = vector.shape_cast %18 : vector<16x16x128xf32> to vector<256x128xf32>
    %23 = arith.truncf %22 : vector<256x128xf32> to vector<256x128xbf16>
    %c0_16 = arith.constant 0 : index
    %c0_17 = arith.constant 0 : index
    %24 = vector.load %arg6[%c0_16, %c0_17] : memref<128x128xbf16, #tpu.memory_space<vmem>>, vector<128x128xbf16>
    %cst_18 = arith.constant dense<0.000000e+00> : vector<256x128xf32>
    %25 = tpu.matmul %23, %24, %cst_18 {dimension_numbers = #tpu.dot_dimension_numbers<[1], [0], [0], [1], [0, 0, 1, 1], [], []>} : vector<256x128xbf16>, vector<128x128xbf16>, vector<256x128xf32> -> vector<256x128xf32>
    %cst_19 = arith.constant dense<0.000000e+00> : vector<128xf32>
    %26 = vector.multi_reduction <add>, %25, %cst_19 [0] : vector<256x128xf32> to vector<128xf32>
    %27 = vector.shape_cast %26 : vector<128xf32> to vector<1x128xf32>
    %28 = arith.mulf %25, %25 : vector<256x128xf32>
    %cst_20 = arith.constant dense<0.000000e+00> : vector<128xf32>
    %29 = vector.multi_reduction <add>, %28, %cst_20 [0] : vector<256x128xf32> to vector<128xf32>
    %30 = vector.shape_cast %29 : vector<128xf32> to vector<1x128xf32>
    %31 = tpu.concatenate %27, %30 in 0 : vector<1x128xf32>, vector<1x128xf32> -> vector<2x128xf32>
    %c0_21 = arith.constant 0 : index
    %c0_22 = arith.constant 0 : index
    %c0_23 = arith.constant 0 : index
    %32 = vector.load %arg8[%c0_21, %c0_22, %c0_23] : memref<1x2x128xf32, #tpu.memory_space<vmem>>, vector<1x2x128xf32>
    %33 = vector.shape_cast %32 : vector<1x2x128xf32> to vector<2x128xf32>
    %34 = vector.shape_cast %31 : vector<2x128xf32> to vector<1x2x128xf32>
    tpu.vector_store %arg8[%c0_21, %c0_22, %c0_23], %34 {strides = array<i32>} : memref<1x2x128xf32, #tpu.memory_space<vmem>>, vector<1x2x128xf32>,
    return
  }
  func.func @transform_0(%arg0: i32, %arg1: i32) -> (i32, i32, i32, i32) {
    %c0_i32 = arith.constant 0 : i32
    %c0_i32_0 = arith.constant 0 : i32
    %c0_i32_1 = arith.constant 0 : i32
    return %arg0, %arg1, %c0_i32, %c0_i32_0 : i32, i32, i32, i32
  }
  func.func @transform_1(%arg0: i32, %arg1: i32) -> (i32, i32) {
    %c0_i32 = arith.constant 0 : i32
    %c0_i32_0 = arith.constant 0 : i32
    %c0_i32_1 = arith.constant 0 : i32
    return %c0_i32, %c0_i32_0 : i32, i32
  }
  func.func @transform_2(%arg0: i32, %arg1: i32) -> (i32, i32) {
    %c0_i32 = arith.constant 0 : i32
    %c0_i32_0 = arith.constant 0 : i32
    %c0_i32_1 = arith.constant 0 : i32
    return %c0_i32, %c0_i32_0 : i32, i32
  }
  func.func @transform_3(%arg0: i32, %arg1: i32) -> (i32, i32, i32, i32) {
    %c0_i32 = arith.constant 0 : i32
    %c0_i32_0 = arith.constant 0 : i32
    %c0_i32_1 = arith.constant 0 : i32
    return %arg0, %arg1, %c0_i32, %c0_i32_0 : i32, i32, i32, i32
  }
  func.func @transform_4(%arg0: i32, %arg1: i32) -> (i32, i32) {
    %c0_i32 = arith.constant 0 : i32
    %c0_i32_0 = arith.constant 0 : i32
    %c0_i32_1 = arith.constant 0 : i32
    return %c0_i32, %c0_i32_0 : i32, i32
  }
  func.func @transform_5(%arg0: i32, %arg1: i32) -> (i32, i32, i32, i32) {
    %c0_i32 = arith.constant 0 : i32
    %c0_i32_0 = arith.constant 0 : i32
    %c0_i32_1 = arith.constant 0 : i32
    return %arg0, %arg1, %c0_i32, %c0_i32_0 : i32, i32, i32, i32
  }
  func.func @transform_6(%arg0: i32, %arg1: i32) -> (i32, i32, i32) {
    %c1_i32 = arith.constant 1 : i32
    %0 = arith.muli %arg0, %c1_i32 : i32
    %1 = arith.addi %0, %arg1 : i32
    %c0_i32 = arith.constant 0 : i32
    %c0_i32_0 = arith.constant 0 : i32
    %c0_i32_1 = arith.constant 0 : i32
    return %1, %c0_i32, %c0_i32_0 : i32, i32, i32
  }
}

module attributes {stable_mosaic.version = 11 : i64} {
  func.func @_bn2_res_kernel(%arg0: i32, %arg1: i32, %arg2: memref<1x16x16x128xbf16, #tpu.memory_space<vmem>>, %arg3: memref<1x128xf32, #tpu.memory_space<vmem>>, %arg4: memref<1x128xf32, #tpu.memory_space<vmem>>, %arg5: memref<1x16x16x128xf32, #tpu.memory_space<vmem>>, %arg6: memref<1x16x16x128xf32, #tpu.memory_space<vmem>>) attributes {dimension_semantics = [#tpu.dimension_semantics<parallel>, #tpu.dimension_semantics<parallel>], iteration_bounds = array<i64: 2, 1>, scalar_prefetch = 0 : i64, scratch_operands = 0 : i64, tpu.core_type = #tpu.core_type<tc>, window_params = [{transform_indices = @transform_0, window_bounds = array<i64: 1, 16, 16, 128>}, {pipeline_mode = #tpu.pipeline_mode<synchronous>, transform_indices = @transform_1, window_bounds = array<i64: 1, 128>}, {pipeline_mode = #tpu.pipeline_mode<synchronous>, transform_indices = @transform_2, window_bounds = array<i64: 1, 128>}, {transform_indices = @transform_3, window_bounds = array<i64: 1, 16, 16, 128>}, {transform_indices = @transform_4, window_bounds = array<i64: 1, 16, 16, 128>}]} {
    %c0 = arith.constant 0 : index
    %c0_0 = arith.constant 0 : index
    %c0_1 = arith.constant 0 : index
    %c0_2 = arith.constant 0 : index
    %0 = vector.load %arg2[%c0, %c0_0, %c0_1, %c0_2] : memref<1x16x16x128xbf16, #tpu.memory_space<vmem>>, vector<1x16x16x128xbf16>
    %1 = vector.shape_cast %0 : vector<1x16x16x128xbf16> to vector<16x16x128xbf16>
    %2 = arith.extf %1 : vector<16x16x128xbf16> to vector<16x16x128xf32>
    %c0_3 = arith.constant 0 : index
    %c0_4 = arith.constant 0 : index
    %3 = vector.load %arg3[%c0_3, %c0_4] : memref<1x128xf32, #tpu.memory_space<vmem>>, vector<1x128xf32>
    %4 = vector.shape_cast %3 : vector<1x128xf32> to vector<1x1x128xf32>
    %5 = vector.broadcast %4 : vector<1x1x128xf32> to vector<16x16x128xf32>
    %6 = arith.mulf %2, %5 : vector<16x16x128xf32>
    %c0_5 = arith.constant 0 : index
    %c0_6 = arith.constant 0 : index
    %7 = vector.load %arg4[%c0_5, %c0_6] : memref<1x128xf32, #tpu.memory_space<vmem>>, vector<1x128xf32>
    %8 = vector.shape_cast %7 : vector<1x128xf32> to vector<1x1x128xf32>
    %9 = vector.broadcast %8 : vector<1x1x128xf32> to vector<16x16x128xf32>
    %10 = arith.addf %6, %9 : vector<16x16x128xf32>
    %cst = arith.constant 0.000000e+00 : f32
    %11 = vector.broadcast %cst : f32 to vector<16x16x128xf32>
    %12 = arith.cmpf ogt, %10, %11 : vector<16x16x128xf32>
    %cst_7 = arith.constant 1.000000e-01 : f32
    %13 = vector.broadcast %cst_7 : f32 to vector<16x16x128xf32>
    %14 = arith.mulf %13, %10 : vector<16x16x128xf32>
    %15 = arith.select %12, %10, %14 : vector<16x16x128xi1>, vector<16x16x128xf32>
    %c0_8 = arith.constant 0 : index
    %c0_9 = arith.constant 0 : index
    %c0_10 = arith.constant 0 : index
    %c0_11 = arith.constant 0 : index
    %16 = vector.load %arg5[%c0_8, %c0_9, %c0_10, %c0_11] : memref<1x16x16x128xf32, #tpu.memory_space<vmem>>, vector<1x16x16x128xf32>
    %17 = vector.shape_cast %16 : vector<1x16x16x128xf32> to vector<16x16x128xf32>
    %18 = arith.addf %15, %17 : vector<16x16x128xf32>
    %c0_12 = arith.constant 0 : index
    %c0_13 = arith.constant 0 : index
    %c0_14 = arith.constant 0 : index
    %c0_15 = arith.constant 0 : index
    %19 = vector.load %arg6[%c0_12, %c0_13, %c0_14, %c0_15] : memref<1x16x16x128xf32, #tpu.memory_space<vmem>>, vector<1x16x16x128xf32>
    %20 = vector.shape_cast %19 : vector<1x16x16x128xf32> to vector<16x16x128xf32>
    %21 = vector.shape_cast %18 : vector<16x16x128xf32> to vector<1x16x16x128xf32>
    tpu.vector_store %arg6[%c0_12, %c0_13, %c0_14, %c0_15], %21 {strides = array<i32>} : memref<1x16x16x128xf32, #tpu.memory_space<vmem>>, vector<1x16x16x128xf32>,
    return
  }
  func.func @transform_0(%arg0: i32, %arg1: i32) -> (i32, i32, i32, i32) {
    %c0_i32 = arith.constant 0 : i32
    %c0_i32_0 = arith.constant 0 : i32
    %c0_i32_1 = arith.constant 0 : i32
    return %arg0, %arg1, %c0_i32, %c0_i32_0 : i32, i32, i32, i32
  }
  func.func @transform_1(%arg0: i32, %arg1: i32) -> (i32, i32) {
    %c0_i32 = arith.constant 0 : i32
    %c0_i32_0 = arith.constant 0 : i32
    %c0_i32_1 = arith.constant 0 : i32
    return %c0_i32, %c0_i32_0 : i32, i32
  }
  func.func @transform_2(%arg0: i32, %arg1: i32) -> (i32, i32) {
    %c0_i32 = arith.constant 0 : i32
    %c0_i32_0 = arith.constant 0 : i32
    %c0_i32_1 = arith.constant 0 : i32
    return %c0_i32, %c0_i32_0 : i32, i32
  }
  func.func @transform_3(%arg0: i32, %arg1: i32) -> (i32, i32, i32, i32) {
    %c0_i32 = arith.constant 0 : i32
    %c0_i32_0 = arith.constant 0 : i32
    %c0_i32_1 = arith.constant 0 : i32
    return %arg0, %arg1, %c0_i32, %c0_i32_0 : i32, i32, i32, i32
  }
  func.func @transform_4(%arg0: i32, %arg1: i32) -> (i32, i32, i32, i32) {
    %c0_i32 = arith.constant 0 : i32
    %c0_i32_0 = arith.constant 0 : i32
    %c0_i32_1 = arith.constant 0 : i32
    return %arg0, %arg1, %c0_i32, %c0_i32_0 : i32, i32, i32, i32
  }
}

</mosaic_0001>

<bundles_post_ra>
// kernel: residual_block_forward.7
= control target key start
LH: loop header
LB: loop body
LE: loop exit
PB: predicated region body
PF: predicated region fallthrough
CT: control target
= control target key end

     0   :  { %s813_s9 = smov 0   ;;  %s815_s10 = smov 0   ;;  %s958_s0 = inlined_call_operand.vmem [shape: f32[2,16,16,128], index: 0, kind: input, shape index: {}]   ;;  %s959_s1 = inlined_call_operand.vmem [shape: bf16[128,128], index: 1, kind: input, shape index: {}]   ;;  %s960_s2 = inlined_call_operand.vmem [shape: f32[2,2,128], index: 2, kind: output, shape index: {}]  }
   0x1   :  { %s817_s11 = smov 0  }
   0x2 LB: > { %s24_s12 = sadd.s32 1, %s792_s10  ;;  %p639_p0 = scmp.ge.s32.totalorder %s796_s11, 1  ;;  %s796_s11 = sphi %s817_s11, %s12_s11   ;;  %s792_s10 = sphi %s815_s10, %s962_s10   ;;  %s788_s9 = sphi %s813_s9, %s961_s9  }
   0x3   : > { %p26_p1 = scmp.ge.s32.totalorder %s24_s12, 2  ;;  %p134_p2 = scmp.lt.s32.totalorder %s796_s11, 3 }
   0x5   : > { %s964_s12 = smov (%p26_p1, %s24_s12), 0  ;;  %p135_p3 = pnand %p639_p0, %p134_p2 }
   0x6   : > { %v766_v0 = vld [vmem:[%s959_s1] sm:$0xff] (!%p135_p3)   ;;  %p162_p4 = scmp.lt.s32.totalorder (!%p135_p3), %s788_s9, 1  ;;  %v767_v1 = vld [vmem:[%s959_s1 + $0x8] sm:$0xff] (!%p135_p3)   ;;  %v768_v2 = vld [vmem:[%s959_s1 + $0x10] sm:$0xff] (!%p135_p3)   ;;  %vm558_vm0 = vcmask (!%p135_p3), 1040384  }
   0x7   : > { %138 = sbr.rel (%p135_p3) target bundleno = 332 (0x14c), region = 28  ;;  %678 = vmatprep.subr.bf16.mxu0 (!%p135_p3), %v766_v0  ;;  %726 = vmatprep.subr.bf16.mxu1 (!%p135_p3), %v766_v0  ;;  %v769_v3 = vld [vmem:[%s959_s1 + $0x18] sm:$0xff] (!%p135_p3)   ;;  %v770_v7 = vld [vmem:[%s959_s1 + $0x20] sm:$0xff] (!%p135_p3)   ;;  %v771_v11 = vld [vmem:[%s959_s1 + $0x28] sm:$0xff] (!%p135_p3)  }
   0x8   : > { %679 = vmatpush3.bf16.msra.mxu0 (!%p135_p3), %v766_v0  ;;  %734 = vmatpush3.bf16.msra.mxu1 (!%p135_p3), %v766_v0  ;;  %v772_v12 = vld [vmem:[%s959_s1 + $0x30] sm:$0xff] (!%p135_p3)   ;;  %v773_v13 = vld [vmem:[%s959_s1 + $0x38] sm:$0xff] (!%p135_p3)  }
   0x9   : > { %680 = vmatprep.subr.bf16.mxu0 (!%p135_p3), %v767_v1  ;;  %727 = vmatprep.subr.bf16.mxu1 (!%p135_p3), %v767_v1 }
   0xc   : > { %681 = vmatpush3.bf16.msra.mxu0 (!%p135_p3), %v767_v1  ;;  %735 = vmatpush3.bf16.msra.mxu1 (!%p135_p3), %v767_v1 }
   0xd   : > { %682 = vmatprep.subr.bf16.mxu0 (!%p135_p3), %v768_v2  ;;  %728 = vmatprep.subr.bf16.mxu1 (!%p135_p3), %v768_v2 }
   0xe   : > { %s966_s9 = smov (!%p162_p4, %s788_s9), 1 }
   0xf   : > { %s653_s19 = sshll.u32 %s966_s9, 8  ;;  %s642_s5 = sshll.u32 %s966_s9, 1 }
  0x10   : > { %s846_s22 = scalar_lea.vmem %s958_s0, %s653_s19  ;;  %683 = vmatpush3.bf16.msra.mxu0 %v768_v2  ;;  %736 = vmatpush3.bf16.msra.mxu1 %v768_v2  ;;  %s176_s8 = scalar_lea.vmem %s960_s2, %s642_s5 }
  0x11   : > { %v179_v4 = vld [vmem:[%s846_s22] sm:$0xff]  ;;  %v180_v5 = vld [vmem:[%s846_s22 + $0x8] sm:$0xff]  ;;  %684 = vmatprep.subr.bf16.mxu0 %v769_v3  ;;  %729 = vmatprep.subr.bf16.mxu1 %v769_v3  ;;  %v181_v14 = vld [vmem:[%s846_s22 + $0x10] sm:$0xff] }
  0x12   : > { %v211_v6 = vpack.c.bf16 %v180_v5, %v179_v4  ;;  %v195_v8 = vld [vmem:[%s846_s22 + $0x80] sm:$0xff]  ;;  %v196_v9 = vld [vmem:[%s846_s22 + $0x88] sm:$0xff]  ;;  %v182_v15 = vld [vmem:[%s846_s22 + $0x18] sm:$0xff] }
  0x13   : > { %v219_v10 = vpack.c.bf16 %v196_v9, %v195_v8  ;;  %v183_v16 = vld [vmem:[%s846_s22 + $0x20] sm:$0xff]  ;;  %v184_v17 = vld [vmem:[%s846_s22 + $0x28] sm:$0xff]  ;;  %v197_v18 = vld [vmem:[%s846_s22 + $0x90] sm:$0xff]  ;;  %v212_v22 = vpack.c.bf16 %v182_v15, %v181_v14 }
  0x14   : > { %694 = vmatprep.mubr.bf16.mxu0 %v211_v6  ;;  %685 = vmatpush3.bf16.msra.mxu0 %v769_v3  ;;  %v198_v19 = vld [vmem:[%s846_s22 + $0x98] sm:$0xff]  ;;  %v199_v20 = vld [vmem:[%s846_s22 + $0xa0] sm:$0xff]  ;;  %v200_v21 = vld [vmem:[%s846_s22 + $0xa8] sm:$0xff]  ;;  %v213_v23 = vpack.c.bf16 %v184_v17, %v183_v16 }
  0x15   : > { %686 = vmatprep.subr.bf16.mxu0 %v770_v7  ;;  %737 = vmatpush3.bf16.msra.mxu1 %v769_v3  ;;  %v220_v24 = vpack.c.bf16 %v198_v19, %v197_v18  ;;  %v221_v25 = vpack.c.bf16 %v200_v21, %v199_v20  ;;  %v185_v26 = vld [vmem:[%s846_s22 + $0x30] sm:$0xff]  ;;  %v186_v27 = vld [vmem:[%s846_s22 + $0x38] sm:$0xff]  ;;  %v187_v28 = vld [vmem:[%s846_s22 + $0x40] sm:$0xff] }
  0x16   : > { %730 = vmatprep.subr.bf16.mxu1 %v770_v7  ;;  %710 = vmatprep.mubr.bf16.mxu1 %v219_v10  ;;  %v188_v29 = vld [vmem:[%s846_s22 + $0x48] sm:$0xff]  ;;  %v201_v30 = vld [vmem:[%s846_s22 + $0xb0] sm:$0xff]  ;;  %v202_v31 = vld [vmem:[%s846_s22 + $0xb8] sm:$0xff]  ;;  %v214_v34 = vpack.c.bf16 %v186_v27, %v185_v26 }
  0x17   : > { %v203_v32 = vld [vmem:[%s846_s22 + $0xc0] sm:$0xff]  ;;  %v204_v33 = vld [vmem:[%s846_s22 + $0xc8] sm:$0xff]  ;;  %v215_v35 = vpack.c.bf16 %v188_v29, %v187_v28  ;;  %v222_v36 = vpack.c.bf16 %v202_v31, %v201_v30  ;;  %v189_v38 = vld [vmem:[%s846_s22 + $0x50] sm:$0xff] }
  0x18   : > { %687 = vmatpush3.bf16.msra.mxu0 %v770_v7  ;;  %v223_v37 = vpack.c.bf16 %v204_v33, %v203_v32  ;;  %v190_v39 = vld [vmem:[%s846_s22 + $0x58] sm:$0xff]  ;;  %v191_v40 = vld [vmem:[%s846_s22 + $0x60] sm:$0xff]  ;;  %v192_v41 = vld [vmem:[%s846_s22 + $0x68] sm:$0xff] }
  0x19   : > { %688 = vmatprep.subr.bf16.mxu0 %v771_v11  ;;  %738 = vmatpush3.bf16.msra.mxu1 %v770_v7  ;;  %v205_v42 = vld [vmem:[%s846_s22 + $0xd0] sm:$0xff]  ;;  %v206_v43 = vld [vmem:[%s846_s22 + $0xd8] sm:$0xff]  ;;  %v207_v44 = vld [vmem:[%s846_s22 + $0xe0] sm:$0xff]  ;;  %v216_v46 = vpack.c.bf16 %v190_v39, %v189_v38  ;;  %v217_v47 = vpack.c.bf16 %v192_v41, %v191_v40 }
  0x1a   : > { %731 = vmatprep.subr.bf16.mxu1 %v771_v11  ;;  %v208_v45 = vld [vmem:[%s846_s22 + $0xe8] sm:$0xff]  ;;  %v224_v48 = vpack.c.bf16 %v206_v43, %v205_v42  ;;  %v193_v50 = vld [vmem:[%s846_s22 + $0x70] sm:$0xff]  ;;  %v194_v51 = vld [vmem:[%s846_s22 + $0x78] sm:$0xff] }
  0x1b   : > { %v225_v49 = vpack.c.bf16 %v208_v45, %v207_v44  ;;  %v209_v52 = vld [vmem:[%s846_s22 + $0xf0] sm:$0xff]  ;;  %v210_v53 = vld [vmem:[%s846_s22 + $0xf8] sm:$0xff]  ;;  %v218_v54 = vpack.c.bf16 %v194_v51, %v193_v50 }
  0x1c   : > { %689 = vmatpush3.bf16.msra.mxu0 %v771_v11  ;;  %v226_v55 = vpack.c.bf16 %v210_v53, %v209_v52 }
  0x1d   : > { %690 = vmatprep.subr.bf16.mxu0 %v772_v12  ;;  %739 = vmatpush3.bf16.msra.mxu1 %v771_v11 }
  0x1e   : > { %732 = vmatprep.subr.bf16.mxu1 %v772_v12 }
  0x20   : > { %691 = vmatpush3.bf16.msra.mxu0 %v772_v12 }
  0x21   : > { %692 = vmatprep.subr.bf16.mxu0 %v773_v13  ;;  %740 = vmatpush3.bf16.msra.mxu1 %v772_v12 }
  0x22   : > { %733 = vmatprep.subr.bf16.mxu1 %v773_v13 }
  0x24   : > { %693 = vmatpush3.bf16.msra.mxu0 %v773_v13 }
  0x25   : > { %741 = vmatpush3.bf16.msra.mxu1 %v773_v13 }
  0x27   : > { %695 = vmatmul.mubr.bf16.vlgmr.msra.gmra.mrb[0].mxu0 %v212_v22 }
  0x28   : > { %698 = vmatprep.mubr.bf16.mxu0 %v213_v23  ;;  %711 = vmatmul.mubr.bf16.vlgmr.msra.gmra.mrb[0].mxu1 %v220_v24 }
  0x29   : > { %714 = vmatprep.mubr.bf16.mxu1 %v221_v25 }
  0x2f   : > { %699 = vmatmul.mubr.bf16.gmra.mrb[4].mxu0 %v214_v34 }
  0x30   : > { %702 = vmatprep.mubr.bf16.mxu0 %v215_v35  ;;  %715 = vmatmul.mubr.bf16.gmra.mrb[4].mxu1 %v222_v36 }
  0x31   : > { %718 = vmatprep.mubr.bf16.mxu1 %v223_v37 }
  0x37   : > { %703 = vmatmul.mubr.bf16.gmra.mrb[8].mxu0 %v216_v46 }
  0x38   : > { %706 = vmatprep.mubr.bf16.mxu0 %v217_v47  ;;  %719 = vmatmul.mubr.bf16.gmra.mrb[8].mxu1 %v224_v48 }
  0x39   : > { %722 = vmatprep.mubr.bf16.mxu1 %v225_v49 }
  0x3f   : > { %707 = vmatmul.mubr.bf16.gmra.mrb[12].mxu0 %v218_v54 }
  0x40   : > { %723 = vmatmul.mubr.bf16.gmra.mrb[12].mxu1 %v226_v55 }
  0xfa   : > { %v696_v56 = vpop.f32.mrb[0].mxu0 }
  0xfb   : > { %v325_v57 = vpop.f32.mrb[1].mxu0  ;;  %v895_v58 = vpop.f32.mrb[0].mxu1  ;;  %v491_v3 = vmul.f32 %v696_v56, %v696_v56 }
  0xfc   : > { %v697_v59 = vpop.f32.mrb[2].mxu0  ;;  %v897_v60 = vpop.f32.mrb[1].mxu1  ;;  %v489_v63 = vmul.f32 %v325_v57, %v325_v57 }
  0xfd   : > { %v328_v61 = vpop.f32.mrb[3].mxu0  ;;  %v899_v62 = vpop.f32.mrb[2].mxu1  ;;  %v492_v6 = vmul.f32 %v697_v59, %v697_v59 }
  0xfe   : > { %v452_v0 = vadd.f32 %v328_v61, %v325_v57  ;;  %v490_v1 = vmul.f32 %v328_v61, %v328_v61  ;;  %v901_v2 = vpop.f32.mrb[3].mxu1 }
 0x100   : > { %v453_v4 = vadd.f32 %v696_v56, %v452_v0  ;;  %v521_v5 = vadd.f32 %v490_v1, %v489_v63 }
 0x102   : > { %v522_v7 = vadd.f32 %v521_v5, %v491_v3  ;;  %v700_v8 = vpop.f32.mrb[4].mxu0  ;;  %v454_v9 = vadd.f32 %v697_v59, %v453_v4 }
 0x103   : > { %v341_v10 = vpop.f32.mrb[5].mxu0  ;;  %v903_v11 = vpop.f32.mrb[4].mxu1  ;;  %v495_v23 = vmul.f32 %v700_v8, %v700_v8 }
 0x104   : > { %v455_v12 = vadd.f32 %v454_v9, %v341_v10  ;;  %v493_v13 = vmul.f32 %v341_v10, %v341_v10  ;;  %v523_v14 = vadd.f32 %v522_v7, %v492_v6  ;;  %v701_v15 = vpop.f32.mrb[6].mxu0  ;;  %v905_v16 = vpop.f32.mrb[5].mxu1  ;;  %v505_v9 = vmul.f32 %v897_v60, %v897_v60 }
 0x105   : > { %v344_v17 = vpop.f32.mrb[7].mxu0  ;;  %v907_v18 = vpop.f32.mrb[6].mxu1  ;;  %v496_v26 = vmul.f32 %v701_v15, %v701_v15 }
 0x106   : > { %v524_v19 = vadd.f32 %v523_v14, %v493_v13  ;;  %v456_v20 = vadd.f32 %v455_v12, %v344_v17  ;;  %v494_v21 = vmul.f32 %v344_v17, %v344_v17  ;;  %v909_v22 = vpop.f32.mrb[7].mxu1  ;;  %v507_v17 = vmul.f32 %v895_v58, %v895_v58 }
 0x108   : > { %v457_v24 = vadd.f32 %v700_v8, %v456_v20  ;;  %v525_v25 = vadd.f32 %v524_v19, %v494_v21  ;;  %v508_v21 = vmul.f32 %v899_v62, %v899_v62 }
 0x10a   : > { %v526_v27 = vadd.f32 %v525_v25, %v495_v23  ;;  %v704_v28 = vpop.f32.mrb[8].mxu0  ;;  %v458_v29 = vadd.f32 %v701_v15, %v457_v24  ;;  %v506_v15 = vmul.f32 %v901_v2, %v901_v2 }
 0x10b   : > { %v357_v30 = vpop.f32.mrb[9].mxu0  ;;  %v911_v31 = vpop.f32.mrb[8].mxu1  ;;  %v499_v43 = vmul.f32 %v704_v28, %v704_v28 }
 0x10c   : > { %v459_v32 = vadd.f32 %v458_v29, %v357_v30  ;;  %v497_v33 = vmul.f32 %v357_v30, %v357_v30  ;;  %v527_v34 = vadd.f32 %v526_v27, %v496_v26  ;;  %v705_v35 = vpop.f32.mrb[10].mxu0  ;;  %v421_v36 = vpop.f32.mrb[9].mxu1 }
 0x10d   : > { %v360_v37 = vpop.f32.mrb[11].mxu0  ;;  %v913_v38 = vpop.f32.mrb[10].mxu1  ;;  %v500_v46 = vmul.f32 %v705_v35, %v705_v35 }
 0x10e   : > { %v528_v39 = vadd.f32 %v527_v34, %v497_v33  ;;  %v460_v40 = vadd.f32 %v459_v32, %v360_v37  ;;  %v498_v41 = vmul.f32 %v360_v37, %v360_v37  ;;  %v424_v42 = vpop.f32.mrb[11].mxu1 }
 0x110   : > { %v461_v44 = vadd.f32 %v704_v28, %v460_v40  ;;  %v529_v45 = vadd.f32 %v528_v39, %v498_v41  ;;  %v510_v28 = vmul.f32 %v909_v22, %v909_v22  ;;  %v514_v40 = vmul.f32 %v424_v42, %v424_v42 }
 0x112   : > { %v530_v47 = vadd.f32 %v529_v45, %v499_v43  ;;  %v708_v48 = vpop.f32.mrb[12].mxu0  ;;  %v462_v49 = vadd.f32 %v705_v35, %v461_v44 }
 0x113   : > { %v373_v50 = vpop.f32.mrb[13].mxu0  ;;  %v724_v51 = vpop.f32.mrb[12].mxu1  ;;  %v503_v3 = vmul.f32 %v708_v48, %v708_v48 }
 0x114   : > { %v463_v52 = vadd.f32 %v462_v49, %v373_v50  ;;  %v501_v53 = vmul.f32 %v373_v50, %v373_v50  ;;  %v531_v54 = vadd.f32 %v530_v47, %v500_v46  ;;  %v709_v55 = vpop.f32.mrb[14].mxu0  ;;  %v437_v56 = vpop.f32.mrb[13].mxu1  ;;  %v519_v50 = vmul.f32 %v724_v51, %v724_v51 }
 0x115   : > { %v376_v57 = vpop.f32.mrb[15].mxu0  ;;  %v725_v59 = vpop.f32.mrb[14].mxu1  ;;  %v504_v6 = vmul.f32 %v709_v55, %v709_v55  ;;  %v517_v46 = vmul.f32 %v437_v56, %v437_v56 }
 0x116   : > { %v532_v61 = vadd.f32 %v531_v54, %v501_v53  ;;  %v464_v63 = vadd.f32 %v463_v52, %v376_v57  ;;  %v502_v0 = vmul.f32 %v376_v57, %v376_v57  ;;  %v440_v1 = vpop.f32.mrb[15].mxu1  ;;  %v520_v53 = vmul.f32 %v725_v59, %v725_v59 }
 0x117   : > { %v518_v49 = vmul.f32 %v440_v1, %v440_v1 }
 0x118   : > { %v465_v4 = vadd.f32 %v708_v48, %v464_v63  ;;  %v533_v5 = vadd.f32 %v532_v61, %v502_v0 }
 0x11a   : > { %v534_v7 = vadd.f32 %v533_v5, %v503_v3  ;;  %v466_v8 = vadd.f32 %v709_v55, %v465_v4 }
 0x11c   : > { %v467_v10 = vadd.f32 %v466_v8, %v897_v60  ;;  %v535_v12 = vadd.f32 %v534_v7, %v504_v6  ;;  %v509_v60 = vmul.f32 %v905_v16, %v905_v16 }
 0x11e   : > { %v536_v13 = vadd.f32 %v535_v12, %v505_v9  ;;  %v468_v14 = vadd.f32 %v467_v10, %v901_v2 }
 0x120   : > { %v469_v19 = vadd.f32 %v895_v58, %v468_v14  ;;  %v537_v20 = vadd.f32 %v536_v13, %v506_v15  ;;  %v511_v58 = vmul.f32 %v903_v11, %v903_v11 }
 0x122   : > { %v538_v23 = vadd.f32 %v537_v20, %v507_v17  ;;  %v470_v24 = vadd.f32 %v899_v62, %v469_v19  ;;  %v512_v62 = vmul.f32 %v907_v18, %v907_v18 }
 0x124   : > { %v471_v25 = vadd.f32 %v470_v24, %v905_v16  ;;  %v539_v26 = vadd.f32 %v538_v23, %v508_v21  ;;  %v513_v16 = vmul.f32 %v421_v36, %v421_v36 }
 0x126   : > { %v540_v27 = vadd.f32 %v539_v26, %v509_v60  ;;  %v472_v2 = vadd.f32 %v471_v25, %v909_v22  ;;  %v515_v22 = vmul.f32 %v911_v31, %v911_v31 }
 0x128   : > { %v473_v29 = vadd.f32 %v903_v11, %v472_v2  ;;  %v541_v30 = vadd.f32 %v540_v27, %v510_v28  ;;  %v516_v11 = vmul.f32 %v913_v38, %v913_v38 }
 0x12a   : > { %v542_v32 = vadd.f32 %v541_v30, %v511_v58  ;;  %v474_v33 = vadd.f32 %v907_v18, %v473_v29 }
 0x12c   : > { %v475_v34 = vadd.f32 %v474_v33, %v421_v36  ;;  %v543_v35 = vadd.f32 %v542_v32, %v512_v62 }
 0x12e   : > { %v544_v37 = vadd.f32 %v543_v35, %v513_v16  ;;  %v476_v39 = vadd.f32 %v475_v34, %v424_v42 }
 0x130   : > { %v477_v41 = vadd.f32 %v911_v31, %v476_v39  ;;  %v545_v43 = vadd.f32 %v544_v37, %v514_v40 }
 0x132   : > { %v546_v44 = vadd.f32 %v545_v43, %v515_v22  ;;  %v478_v45 = vadd.f32 %v913_v38, %v477_v41 }
 0x134   : > { %v479_v18 = vadd.f32 %v478_v45, %v437_v56  ;;  %v547_v47 = vadd.f32 %v546_v44, %v516_v11 }
 0x136   : > { %v548_v36 = vadd.f32 %v547_v47, %v517_v46  ;;  %v480_v48 = vadd.f32 %v479_v18, %v440_v1 }
 0x138   : > { %v481_v42 = vadd.f32 %v724_v51, %v480_v48  ;;  %v549_v52 = vadd.f32 %v548_v36, %v518_v49 }
 0x13a   : > { %v482_v54 = vadd.f32 %v725_v59, %v481_v42  ;;  %v550_v31 = vadd.f32 %v549_v52, %v519_v50 }
 0x13c   : > { %v483_v55 = vrot.slane %v482_v54, 4  ;;  %v551_v57 = vadd.f32 %v550_v31, %v520_v53 }
 0x13e   : > { %v484_v61 = vadd.f32 %v483_v55, %v482_v54  ;;  %v552_v63 = vrot.slane %v551_v57, 4 }
 0x140   : > { %v485_v0 = vrot.slane %v484_v61, 2  ;;  %v553_v3 = vadd.f32 %v552_v63, %v551_v57 }
 0x142   : > { %v486_v38 = vadd.f32 %v485_v0, %v484_v61  ;;  %v554_v4 = vrot.slane %v553_v3, 2 }
 0x144   : > { %v487_v56 = vrot.slane %v486_v38, 1  ;;  %v555_v5 = vadd.f32 %v554_v4, %v553_v3 }
 0x146   : > { %v556_v6 = vrot.slane %v555_v5, 1  ;;  %v488_v51 = vadd.f32 %v487_v56, %v486_v38 }
 0x148   : > { %v557_v59 = vadd.f32 %v556_v6, %v555_v5 }
 0x14a   : > { %v559_v1 = vsel %vm558_vm0, %v488_v51, %v557_v59 }
 0x14b   : > { %560 = vst [vmem:[%s176_s8] sm:$0x3] %v559_v1 }
 0x14c PF: > { %s12_s11 = sadd.s32 1, %s796_s11   ;;  %s961_s9 = smov %s792_s10 }
 0x14d   : > { %p9_p5 = scmp.ge.s32.totalorder %s12_s11, 4   ;;  %s962_s10 = smov %s964_s12 }
 0x14f   :  { %11 = sbr.rel (!%p9_p5) target bundleno = 2 (0x2), region = 58 }

// kernel: residual_block_forward.10
= control target key start
LH: loop header
LB: loop body
LE: loop exit
PB: predicated region body
PF: predicated region fallthrough
CT: control target
= control target key end

     0   :  { %s1472_s21 = smov 0   ;;  %s1474_s22 = smov 0   ;;  %s1789_s0 = inlined_call_operand.vmem [shape: bf16[2,16,16,128], index: 0, kind: input, shape index: {}]   ;;  %s1790_s1 = inlined_call_operand.vmem [shape: f32[1,128], index: 1, kind: input, shape index: {}]   ;;  %s1791_s2 = inlined_call_operand.vmem [shape: f32[1,128], index: 2, kind: input, shape index: {}]   ;;  %s1792_s3 = inlined_call_operand.vmem [shape: f32[2,16,16,128], index: 3, kind: input, shape index: {}]   ;;  %s1793_s4 = inlined_call_operand.vmem [shape: bf16[128,128], index: 4, kind: input, shape index: {}]   ;;  %s1794_s5 = inlined_call_operand.vmem [shape: f32[2,16,16,128], index: 5, kind: output, shape index: {0}]   ;;  %s1795_s6 = inlined_call_operand.vmem [shape: f32[2,2,128], index: 6, kind: output, shape index: {1}]  }
   0x1   :  { %s1476_s23 = smov 0  }
   0x2 LB: > { %s29_s24 = sadd.s32 1, %s1431_s22  ;;  %p1191_p0 = scmp.ge.s32.totalorder %s1435_s23, 1  ;;  %s1435_s23 = sphi %s1476_s23, %s17_s23   ;;  %s1431_s22 = sphi %s1474_s22, %s1797_s22   ;;  %s1427_s21 = sphi %s1472_s21, %s1796_s21  }
   0x3   : > { %p31_p1 = scmp.ge.s32.totalorder %s29_s24, 2  ;;  %p257_p2 = scmp.lt.s32.totalorder %s1435_s23, 3 }
   0x5   : > { %s1799_s24 = smov (%p31_p1, %s29_s24), 0  ;;  %p258_p3 = pnand %p1191_p0, %p257_p2 }
   0x6   : > { %v1405_v0 = vld [vmem:[%s1793_s4] sm:$0xff] (!%p258_p3)   ;;  %p313_p4 = scmp.lt.s32.totalorder (!%p258_p3), %s1427_s21, 1  ;;  %v1406_v1 = vld [vmem:[%s1793_s4 + $0x8] sm:$0xff] (!%p258_p3)   ;;  %v1407_v2 = vld [vmem:[%s1793_s4 + $0x10] sm:$0xff] (!%p258_p3)  }
   0x7   : > { %261 = sbr.rel (%p258_p3) target bundleno = 333 (0x14d), region = 40  ;;  %1317 = vmatprep.subr.bf16.mxu0 (!%p258_p3), %v1405_v0  ;;  %1365 = vmatprep.subr.bf16.mxu1 (!%p258_p3), %v1405_v0  ;;  %v1408_v3 = vld [vmem:[%s1793_s4 + $0x18] sm:$0xff] (!%p258_p3)   ;;  %v1515_v5 = vld [vmem:[%s1790_s1] ss:$0 sm:$0xff] (!%p258_p3)  ;;  %v1547_v28 = vld [vmem:[%s1793_s4 + $0x28] sm:$0xff] (!%p258_p3)  }
   0x8   : > { %1318 = vmatpush3.bf16.msra.mxu0 (!%p258_p3), %v1405_v0  ;;  %1373 = vmatpush3.bf16.msra.mxu1 (!%p258_p3), %v1405_v0  ;;  %v1528_v9 = vld [vmem:[%s1791_s2] ss:$0 sm:$0xff] (!%p258_p3)  ;;  %v1411_v49 = vld [vmem:[%s1793_s4 + $0x30] sm:$0xff] (!%p258_p3)  }
   0x9   : > { %1319 = vmatprep.subr.bf16.mxu0 (!%p258_p3), %v1406_v1  ;;  %1366 = vmatprep.subr.bf16.mxu1 (!%p258_p3), %v1406_v1  ;;  %v1409_v18 = vld [vmem:[%s1793_s4 + $0x20] sm:$0xff] (!%p258_p3)  }
   0xc   : > { %1320 = vmatpush3.bf16.msra.mxu0 (!%p258_p3), %v1406_v1  ;;  %1374 = vmatpush3.bf16.msra.mxu1 (!%p258_p3), %v1406_v1 }
   0xd   : > { %1321 = vmatprep.subr.bf16.mxu0 (!%p258_p3), %v1407_v2  ;;  %1367 = vmatprep.subr.bf16.mxu1 (!%p258_p3), %v1407_v2 }
   0xe   : > { %s1801_s21 = smov (!%p313_p4, %s1427_s21), 1 }
   0xf   : > { %s1211_s7 = sshll.u32 %s1801_s21, 7  ;;  %s1212_s11 = sshll.u32 %s1801_s21, 8 }
  0x10   : > { %s1505_s10 = scalar_lea.vmem %s1789_s0, %s1211_s7  ;;  %s1523_s18 = scalar_lea.vmem %s1792_s3, %s1212_s11  ;;  %1322 = vmatpush3.bf16.msra.mxu0 %v1407_v2  ;;  %1375 = vmatpush3.bf16.msra.mxu1 %v1407_v2 }
  0x11   : > { %v1215_v4 = vld [vmem:[%s1505_s10] sm:$0xff]   ;;  %v1278_v8 = vld [vmem:[%s1505_s10 + $0x8] sm:$0xff]   ;;  %v1279_v12 = vld [vmem:[%s1505_s10 + $0x10] sm:$0xff]   ;;  %1323 = vmatprep.subr.bf16.mxu0 %v1408_v3  ;;  %1368 = vmatprep.subr.bf16.mxu1 %v1408_v3  ;;  %s1561_s7 = scalar_lea.vmem %s1794_s5, %s1212_s11 }
  0x12   : > { %v1216_v6 = vunpack.c.l.bf16 %v1215_v4  ;;  %v1217_v7 = vunpack.c.h.bf16 %v1215_v4  ;;  %v1220_v10 = vunpack.c.l.bf16 %v1278_v8  ;;  %v1221_v11 = vunpack.c.h.bf16 %v1278_v8  ;;  %v1280_v17 = vld [vmem:[%s1505_s10 + $0x18] sm:$0xff]   ;;  %v590_v25 = vld [vmem:[%s1523_s18] sm:$0xff]  ;;  %v591_v29 = vld [vmem:[%s1523_s18 + $0x8] sm:$0xff] }
  0x13   : > { %v1224_v15 = vunpack.c.l.bf16 %v1279_v12  ;;  %v1225_v16 = vunpack.c.h.bf16 %v1279_v12  ;;  %v1228_v21 = vunpack.c.l.bf16 %v1280_v17  ;;  %v1229_v22 = vunpack.c.h.bf16 %v1280_v17  ;;  %v592_v32 = vld [vmem:[%s1523_s18 + $0x10] sm:$0xff]  ;;  %v593_v33 = vld [vmem:[%s1523_s18 + $0x18] sm:$0xff]  ;;  %v1281_v48 = vld [vmem:[%s1505_s10 + $0x20] sm:$0xff]  }
  0x14   : > { %v423_v13 = vmul.f32 %v1216_v6, %v1515_v5  ;;  %v424_v14 = vmul.f32 %v1217_v7, %v1515_v5  ;;  %v425_v19 = vmul.f32 %v1220_v10, %v1515_v5  ;;  %v426_v20 = vmul.f32 %v1221_v11, %v1515_v5  ;;  %1324 = vmatpush3.bf16.msra.mxu0 %v1408_v3  ;;  %v594_v55 = vld [vmem:[%s1523_s18 + $0x20] sm:$0xff]  ;;  %v595_v56 = vld [vmem:[%s1523_s18 + $0x28] sm:$0xff]  ;;  %v596_v2 = vld [vmem:[%s1523_s18 + $0x30] sm:$0xff] }
  0x15   : > { %v427_v26 = vmul.f32 %v1224_v15, %v1515_v5  ;;  %v428_v27 = vmul.f32 %v1225_v16, %v1515_v5  ;;  %v429_v34 = vmul.f32 %v1228_v21, %v1515_v5  ;;  %v430_v35 = vmul.f32 %v1229_v22, %v1515_v5  ;;  %1376 = vmatpush3.bf16.msra.mxu1 %v1408_v3  ;;  %v1282_v62 = vld [vmem:[%s1505_s10 + $0x28] sm:$0xff]   ;;  %v597_v7 = vld [vmem:[%s1523_s18 + $0x38] sm:$0xff] }
  0x16   : > { %v462_v23 = vadd.f32 %v1528_v9, %v423_v13  ;;  %v463_v24 = vadd.f32 %v1528_v9, %v424_v14  ;;  %v464_v30 = vadd.f32 %v1528_v9, %v425_v19  ;;  %v465_v31 = vadd.f32 %v1528_v9, %v426_v20  ;;  %1325 = vmatprep.subr.bf16.mxu0 %v1409_v18  ;;  %v1412_v8 = vld [vmem:[%s1793_s4 + $0x38] sm:$0xff]   ;;  %v1283_v14 = vld [vmem:[%s1505_s10 + $0x30] sm:$0xff]  }
  0x17   : > { %1369 = vmatprep.subr.bf16.mxu1 %v1409_v18  ;;  %v466_v42 = vadd.f32 %v1528_v9, %v427_v26  ;;  %v467_v43 = vadd.f32 %v1528_v9, %v428_v27  ;;  %v468_v57 = vadd.f32 %v1528_v9, %v429_v34  ;;  %v469_v59 = vadd.f32 %v1528_v9, %v430_v35  ;;  %v1284_v15 = vld [vmem:[%s1505_s10 + $0x38] sm:$0xff]  }
  0x18   : > { %vm494_vm0 = vcmp.gt.f32.partialorder %v462_v23, 0.0  ;;  %vm495_vm1 = vcmp.gt.f32.partialorder %v463_v24, 0.0  ;;  %v526_v36 = vmul.f32 0.1, %v462_v23  ;;  %v527_v37 = vmul.f32 0.1, %v463_v24  ;;  %1326 = vmatpush3.bf16.msra.mxu0 %v1409_v18 }
  0x19   : > { %vm496_vm2 = vcmp.gt.f32.partialorder %v464_v30, 0.0  ;;  %vm497_vm3 = vcmp.gt.f32.partialorder %v465_v31, 0.0  ;;  %v528_v38 = vmul.f32 0.1, %v464_v30  ;;  %v529_v39 = vmul.f32 0.1, %v465_v31  ;;  %1377 = vmatpush3.bf16.msra.mxu1 %v1409_v18  ;;  %1327 = vmatprep.subr.bf16.mxu0 %v1547_v28 }
  0x1a   : > { %v558_v40 = vsel %vm494_vm0, %v462_v23, %v526_v36  ;;  %v559_v41 = vsel %vm495_vm1, %v463_v24, %v527_v37  ;;  %vm498_vm4 = vcmp.gt.f32.partialorder %v466_v42, 0.0  ;;  %vm499_vm5 = vcmp.gt.f32.partialorder %v467_v43, 0.0  ;;  %1370 = vmatprep.subr.bf16.mxu1 %v1547_v28 }
  0x1b   : > { %v622_v44 = vadd.f32 %v590_v25, %v558_v40  ;;  %v623_v45 = vadd.f32 %v591_v29, %v559_v41  ;;  %v560_v46 = vsel %vm496_vm2, %v464_v30, %v528_v38  ;;  %v561_v47 = vsel %vm497_vm3, %v465_v31, %v529_v39  ;;  %v598_v30 = vld [vmem:[%s1523_s18 + $0x40] sm:$0xff] }
  0x1c   : > { %v1569_v50 = vadd.f32 %v592_v32, %v560_v46  ;;  %v1571_v51 = vadd.f32 %v593_v33, %v561_v47  ;;  %v530_v53 = vmul.f32 0.1, %v466_v42  ;;  %v531_v54 = vmul.f32 0.1, %v467_v43  ;;  %1328 = vmatpush3.bf16.msra.mxu0 %v1547_v28  ;;  %v599_v32 = vld [vmem:[%s1523_s18 + $0x48] sm:$0xff]  ;;  %v1285_v40 = vld [vmem:[%s1505_s10 + $0x40] sm:$0xff]  }
  0x1d   : > { %654 = vst [vmem:[%s1561_s7] sm:$0xff] %v622_v44  ;;  %655 = vst [vmem:[%s1561_s7 + $0x8] sm:$0xff] %v623_v45  ;;  %v686_v52 = vpack.c.bf16 %v623_v45, %v622_v44  ;;  %v1232_v60 = vunpack.c.l.bf16 %v1281_v48  ;;  %v1233_v61 = vunpack.c.h.bf16 %v1281_v48  ;;  %vm500_vm6 = vcmp.gt.f32.partialorder %v468_v57, 0.0  ;;  %1378 = vmatpush3.bf16.msra.mxu1 %v1547_v28  ;;  %1329 = vmatprep.subr.bf16.mxu0 %v1411_v49  ;;  %v600_v46 = vld [vmem:[%s1523_s18 + $0x50] sm:$0xff]  ;;  %v601_v47 = vld [vmem:[%s1523_s18 + $0x58] sm:$0xff] }
  0x1e   : > { %656 = vst [vmem:[%s1561_s7 + $0x10] sm:$0xff] %v1569_v50  ;;  %657 = vst [vmem:[%s1561_s7 + $0x18] sm:$0xff] %v1571_v51  ;;  %v687_v58 = vpack.c.bf16 %v1571_v51, %v1569_v50  ;;  %v562_v63 = vsel %vm498_vm4, %v466_v42, %v530_v53  ;;  %v563_v0 = vsel %vm499_vm5, %v467_v43, %v531_v54  ;;  %v532_v1 = vmul.f32 0.1, %v468_v57  ;;  %v602_v51 = vld [vmem:[%s1523_s18 + $0x60] sm:$0xff] }
  0x1f   : > { %1333 = vmatprep.mubr.bf16.mxu0 %v686_v52  ;;  %v1592_v3 = vadd.f32 %v594_v55, %v562_v63  ;;  %v1594_v4 = vadd.f32 %v595_v56, %v563_v0  ;;  %vm501_vm7 = vcmp.gt.f32.partialorder %v469_v59, 0.0  ;;  %v533_v6 = vmul.f32 0.1, %v469_v59  ;;  %1371 = vmatprep.subr.bf16.mxu1 %v1411_v49 }
  0x20   : > { %v564_v10 = vsel %vm500_vm6, %v468_v57, %v532_v1  ;;  %v431_v11 = vmul.f32 %v1232_v60, %v1515_v5  ;;  %v432_v12 = vmul.f32 %v1233_v61, %v1515_v5  ;;  %v1236_v13 = vunpack.c.l.bf16 %v1282_v62  ;;  %1330 = vmatpush3.bf16.msra.mxu0 %v1411_v49  ;;  %v603_v61 = vld [vmem:[%s1523_s18 + $0x68] sm:$0xff] }
  0x21   : > { %658 = vst [vmem:[%s1561_s7 + $0x20] sm:$0xff] %v1592_v3  ;;  %659 = vst [vmem:[%s1561_s7 + $0x28] sm:$0xff] %v1594_v4  ;;  %v688_v16 = vpack.c.bf16 %v1594_v4, %v1592_v3  ;;  %v565_v17 = vsel %vm501_vm7, %v469_v59, %v533_v6  ;;  %v1612_v18 = vadd.f32 %v596_v2, %v564_v10  ;;  %v1237_v19 = vunpack.c.h.bf16 %v1282_v62  ;;  %v604_v2 = vld [vmem:[%s1523_s18 + $0x70] sm:$0xff]  ;;  %v1286_v6 = vld [vmem:[%s1505_s10 + $0x48] sm:$0xff]  }
  0x22   : > { %v1614_v20 = vadd.f32 %v597_v7, %v565_v17  ;;  %v470_v21 = vadd.f32 %v1528_v9, %v431_v11  ;;  %v471_v22 = vadd.f32 %v1528_v9, %v432_v12  ;;  %v433_v23 = vmul.f32 %v1236_v13, %v1515_v5  ;;  %1379 = vmatpush3.bf16.msra.mxu1 %v1411_v49  ;;  %v605_v11 = vld [vmem:[%s1523_s18 + $0x78] sm:$0xff] }
  0x23   : > { %660 = vst [vmem:[%s1561_s7 + $0x30] sm:$0xff] %v1612_v18  ;;  %v434_v24 = vmul.f32 %v1237_v19, %v1515_v5  ;;  %v1240_v25 = vunpack.c.l.bf16 %v1283_v14  ;;  %v1241_v26 = vunpack.c.h.bf16 %v1283_v14  ;;  %v1244_v27 = vunpack.c.l.bf16 %v1284_v15  ;;  %1331 = vmatprep.subr.bf16.mxu0 %v1412_v8  ;;  %1372 = vmatprep.subr.bf16.mxu1 %v1412_v8 }
  0x24   : > { %661 = vst [vmem:[%s1561_s7 + $0x38] sm:$0xff] %v1614_v20  ;;  %v689_v28 = vpack.c.bf16 %v1614_v20, %v1612_v18  ;;  %vm502_vm8 = vcmp.gt.f32.partialorder %v470_v21, 0.0  ;;  %vm503_vm9 = vcmp.gt.f32.partialorder %v471_v22, 0.0  ;;  %v534_v29 = vmul.f32 0.1, %v470_v21  ;;  %1332 = vmatpush3.bf16.msra.mxu0 %v1412_v8  ;;  %v607_v20 = vld [vmem:[%s1523_s18 + $0x88] sm:$0xff] }
  0x25   : > { %v535_v31 = vmul.f32 0.1, %v471_v22  ;;  %v472_v33 = vadd.f32 %v1528_v9, %v433_v23  ;;  %v473_v34 = vadd.f32 %v1528_v9, %v434_v24  ;;  %v435_v35 = vmul.f32 %v1240_v25, %v1515_v5 }
  0x26   : > { %v566_v36 = vsel %vm502_vm8, %v470_v21, %v534_v29  ;;  %v436_v37 = vmul.f32 %v1241_v26, %v1515_v5  ;;  %v1245_v38 = vunpack.c.h.bf16 %v1284_v15  ;;  %v437_v39 = vmul.f32 %v1244_v27, %v1515_v5  ;;  %1380 = vmatpush3.bf16.msra.mxu1 %v1412_v8  ;;  %v606_v27 = vld [vmem:[%s1523_s18 + $0x80] sm:$0xff] }
  0x27   : > { %v567_v41 = vsel %vm503_vm9, %v471_v22, %v535_v31  ;;  %v1634_v42 = vadd.f32 %v598_v30, %v566_v36  ;;  %vm504_vm10 = vcmp.gt.f32.partialorder %v472_v33, 0.0  ;;  %vm505_vm11 = vcmp.gt.f32.partialorder %v473_v34, 0.0  ;;  %1334 = vmatmul.mubr.bf16.vlgmr.msra.gmra.mrb[0].mxu0 %v687_v58 }
  0x28   : > { %v1636_v43 = vadd.f32 %v599_v32, %v567_v41  ;;  %v536_v44 = vmul.f32 0.1, %v472_v33  ;;  %v537_v45 = vmul.f32 0.1, %v473_v34  ;;  %v474_v48 = vadd.f32 %v1528_v9, %v435_v35  ;;  %1337 = vmatprep.mubr.bf16.mxu0 %v688_v16  ;;  %v1287_v16 = vld [vmem:[%s1505_s10 + $0x50] sm:$0xff]   ;;  %v1288_v32 = vld [vmem:[%s1505_s10 + $0x58] sm:$0xff]  }
  0x29   : > { %662 = vst [vmem:[%s1561_s7 + $0x40] sm:$0xff] %v1634_v42  ;;  %v475_v49 = vadd.f32 %v1528_v9, %v436_v37  ;;  %v438_v52 = vmul.f32 %v1245_v38, %v1515_v5  ;;  %v476_v53 = vadd.f32 %v1528_v9, %v437_v39  ;;  %v1248_v54 = vunpack.c.l.bf16 %v1285_v40 }
  0x2a   : > { %663 = vst [vmem:[%s1561_s7 + $0x48] sm:$0xff] %v1636_v43  ;;  %v690_v55 = vpack.c.bf16 %v1636_v43, %v1634_v42  ;;  %v568_v56 = vsel %vm504_vm10, %v472_v33, %v536_v44  ;;  %v569_v57 = vsel %vm505_vm11, %v473_v34, %v537_v45  ;;  %vm506_vm12 = vcmp.gt.f32.partialorder %v474_v48, 0.0  ;;  %v1289_v42 = vld [vmem:[%s1505_s10 + $0x60] sm:$0xff]   ;;  %v608_v45 = vld [vmem:[%s1523_s18 + $0x90] sm:$0xff] }
  0x2b   : > { %v1655_v59 = vadd.f32 %v600_v46, %v568_v56  ;;  %v1657_v60 = vadd.f32 %v601_v47, %v569_v57  ;;  %vm507_vm13 = vcmp.gt.f32.partialorder %v475_v49, 0.0  ;;  %v538_v50 = vmul.f32 0.1, %v474_v48  ;;  %v609_v47 = vld [vmem:[%s1523_s18 + $0x98] sm:$0xff]  ;;  %v1290_v57 = vld [vmem:[%s1505_s10 + $0x68] sm:$0xff]  }
  0x2c   : > { %v539_v58 = vmul.f32 0.1, %v475_v49  ;;  %v477_v62 = vadd.f32 %v1528_v9, %v438_v52  ;;  %vm508_vm14 = vcmp.gt.f32.partialorder %v476_v53, 0.0  ;;  %v540_v63 = vmul.f32 0.1, %v476_v53 }
  0x2d   : > { %664 = vst [vmem:[%s1561_s7 + $0x50] sm:$0xff] %v1655_v59  ;;  %665 = vst [vmem:[%s1561_s7 + $0x58] sm:$0xff] %v1657_v60  ;;  %v691_v0 = vpack.c.bf16 %v1657_v60, %v1655_v59  ;;  %v570_v1 = vsel %vm506_vm12, %v474_v48, %v538_v50  ;;  %v1249_v3 = vunpack.c.h.bf16 %v1285_v40  ;;  %v439_v4 = vmul.f32 %v1248_v54, %v1515_v5 }
  0x2e   : > { %v571_v7 = vsel %vm507_vm13, %v475_v49, %v539_v58  ;;  %v1672_v8 = vadd.f32 %v602_v51, %v570_v1  ;;  %vm509_vm15 = vcmp.gt.f32.partialorder %v477_v62, 0.0  ;;  %v541_v10 = vmul.f32 0.1, %v477_v62  ;;  %v611_v1 = vld [vmem:[%s1523_s18 + $0xa8] sm:$0xff] }
  0x2f   : > { %v1675_v12 = vadd.f32 %v603_v61, %v571_v7  ;;  %v572_v13 = vsel %vm508_vm14, %v476_v53, %v540_v63  ;;  %v440_v14 = vmul.f32 %v1249_v3, %v1515_v5  ;;  %v478_v15 = vadd.f32 %v1528_v9, %v439_v4  ;;  %1338 = vmatmul.mubr.bf16.gmra.mrb[4].mxu0 %v689_v28  ;;  %v610_v63 = vld [vmem:[%s1523_s18 + $0xa0] sm:$0xff] }
  0x30   : > { %666 = vst [vmem:[%s1561_s7 + $0x60] sm:$0xff] %v1672_v8  ;;  %v573_v17 = vsel %vm509_vm15, %v477_v62, %v541_v10  ;;  %v1683_v19 = vadd.f32 %v604_v2, %v572_v13  ;;  %v1252_v21 = vunpack.c.l.bf16 %v1286_v6  ;;  %v1253_v22 = vunpack.c.h.bf16 %v1286_v6  ;;  %1341 = vmatprep.mubr.bf16.mxu0 %v690_v55  ;;  %v612_v13 = vld [vmem:[%s1523_s18 + $0xb0] sm:$0xff] }
  0x31   : > { %667 = vst [vmem:[%s1561_s7 + $0x68] sm:$0xff] %v1675_v12  ;;  %v692_v23 = vpack.c.bf16 %v1675_v12, %v1672_v8  ;;  %v1689_v24 = vadd.f32 %v605_v11, %v573_v17  ;;  %v479_v25 = vadd.f32 %v1528_v9, %v440_v14  ;;  %vm510_vm0 = vcmp.gt.f32.partialorder %v478_v15, 0.0 }
  0x32   : > { %668 = vst [vmem:[%s1561_s7 + $0x70] sm:$0xff] %v1683_v19  ;;  %v542_v26 = vmul.f32 0.1, %v478_v15  ;;  %v441_v29 = vmul.f32 %v1252_v21, %v1515_v5  ;;  %v442_v30 = vmul.f32 %v1253_v22, %v1515_v5  ;;  %v1256_v31 = vunpack.c.l.bf16 %v1287_v16 }
  0x33   : > { %669 = vst [vmem:[%s1561_s7 + $0x78] sm:$0xff] %v1689_v24  ;;  %v693_v33 = vpack.c.bf16 %v1689_v24, %v1683_v19  ;;  %vm511_vm1 = vcmp.gt.f32.partialorder %v479_v25, 0.0  ;;  %v543_v18 = vmul.f32 0.1, %v479_v25  ;;  %v1257_v28 = vunpack.c.h.bf16 %v1287_v16 }
  0x34   : > { %v574_v34 = vsel %vm510_vm0, %v478_v15, %v542_v26  ;;  %v480_v35 = vadd.f32 %v1528_v9, %v441_v29  ;;  %v481_v36 = vadd.f32 %v1528_v9, %v442_v30  ;;  %v443_v37 = vmul.f32 %v1256_v31, %v1515_v5  ;;  %v613_v15 = vld [vmem:[%s1523_s18 + $0xb8] sm:$0xff]  ;;  %v1291_v26 = vld [vmem:[%s1505_s10 + $0x70] sm:$0xff]  }
  0x35   : > { %v575_v38 = vsel %vm511_vm1, %v479_v25, %v543_v18  ;;  %v638_v39 = vadd.f32 %v606_v27, %v574_v34  ;;  %v444_v40 = vmul.f32 %v1257_v28, %v1515_v5  ;;  %v1260_v41 = vunpack.c.l.bf16 %v1288_v32  ;;  %v614_v18 = vld [vmem:[%s1523_s18 + $0xc0] sm:$0xff] }
  0x36   : > { %v639_v43 = vadd.f32 %v607_v20, %v575_v38  ;;  %vm512_vm2 = vcmp.gt.f32.partialorder %v480_v35, 0.0  ;;  %vm513_vm3 = vcmp.gt.f32.partialorder %v481_v36, 0.0  ;;  %v544_v44 = vmul.f32 0.1, %v480_v35 }
  0x37   : > { %670 = vst [vmem:[%s1561_s7 + $0x80] sm:$0xff] %v638_v39  ;;  %v545_v46 = vmul.f32 0.1, %v481_v36  ;;  %v482_v48 = vadd.f32 %v1528_v9, %v443_v37  ;;  %v483_v49 = vadd.f32 %v1528_v9, %v444_v40  ;;  %v1261_v52 = vunpack.c.h.bf16 %v1288_v32  ;;  %1342 = vmatmul.mubr.bf16.gmra.mrb[8].mxu0 %v691_v0 }
  0x38   : > { %671 = vst [vmem:[%s1561_s7 + $0x88] sm:$0xff] %v639_v43  ;;  %v694_v53 = vpack.c.bf16 %v639_v43, %v638_v39  ;;  %v576_v54 = vsel %vm512_vm2, %v480_v35, %v544_v44  ;;  %v445_v55 = vmul.f32 %v1260_v41, %v1515_v5  ;;  %v1264_v56 = vunpack.c.l.bf16 %v1289_v42  ;;  %1345 = vmatprep.mubr.bf16.mxu0 %v692_v23  ;;  %v615_v35 = vld [vmem:[%s1523_s18 + $0xc8] sm:$0xff]  ;;  %v1292_v41 = vld [vmem:[%s1505_s10 + $0x78] sm:$0xff]   ;;  %s1198_s10 = sshll.u32 %s1801_s21, 1 }
  0x39   : > { %v577_v50 = vsel %vm513_vm3, %v481_v36, %v545_v46  ;;  %v640_v51 = vadd.f32 %v608_v45, %v576_v54  ;;  %vm514_vm4 = vcmp.gt.f32.partialorder %v482_v48, 0.0  ;;  %vm515_vm5 = vcmp.gt.f32.partialorder %v483_v49, 0.0  ;;  %v617_v46 = vld [vmem:[%s1523_s18 + $0xd8] sm:$0xff]  ;;  %s349_s15 = scalar_lea.vmem %s1795_s6, %s1198_s10 }
  0x3a   : > { %1349 = vmatprep.mubr.bf16.mxu1 %v694_v53  ;;  %v641_v58 = vadd.f32 %v609_v47, %v577_v50  ;;  %v546_v61 = vmul.f32 0.1, %v482_v48  ;;  %v547_v62 = vmul.f32 0.1, %v483_v49  ;;  %v446_v2 = vmul.f32 %v1261_v52, %v1515_v5 }
  0x3b   : > { %672 = vst [vmem:[%s1561_s7 + $0x90] sm:$0xff] %v640_v51  ;;  %v484_v3 = vadd.f32 %v1528_v9, %v445_v55  ;;  %v1265_v4 = vunpack.c.h.bf16 %v1289_v42  ;;  %v447_v6 = vmul.f32 %v1264_v56, %v1515_v5  ;;  %v1268_v7 = vunpack.c.l.bf16 %v1290_v57 }
  0x3c   : > { %673 = vst [vmem:[%s1561_s7 + $0x98] sm:$0xff] %v641_v58  ;;  %v695_v59 = vpack.c.bf16 %v641_v58, %v640_v51  ;;  %v578_v60 = vsel %vm514_vm4, %v482_v48, %v546_v61  ;;  %v579_v0 = vsel %vm515_vm5, %v483_v49, %v547_v62  ;;  %v485_v8 = vadd.f32 %v1528_v9, %v446_v2  ;;  %v618_v58 = vld [vmem:[%s1523_s18 + $0xe0] sm:$0xff] }
  0x3d   : > { %v642_v10 = vadd.f32 %v610_v63, %v578_v60  ;;  %v643_v11 = vadd.f32 %v611_v1, %v579_v0  ;;  %vm516_vm6 = vcmp.gt.f32.partialorder %v484_v3, 0.0  ;;  %v548_v12 = vmul.f32 0.1, %v484_v3  ;;  %v619_v63 = vld [vmem:[%s1523_s18 + $0xe8] sm:$0xff] }
  0x3e   : > { %1350 = vmatmul.mubr.bf16.vlgmr.msra.gmra.mrb[0].mxu1 %v695_v59  ;;  %vm517_vm7 = vcmp.gt.f32.partialorder %v485_v8, 0.0  ;;  %v549_v14 = vmul.f32 0.1, %v485_v8  ;;  %v448_v16 = vmul.f32 %v1265_v4, %v1515_v5  ;;  %v486_v17 = vadd.f32 %v1528_v9, %v447_v6 }
  0x3f   : > { %674 = vst [vmem:[%s1561_s7 + $0xa0] sm:$0xff] %v642_v10  ;;  %675 = vst [vmem:[%s1561_s7 + $0xa8] sm:$0xff] %v643_v11  ;;  %v696_v21 = vpack.c.bf16 %v643_v11, %v642_v10  ;;  %v580_v22 = vsel %vm516_vm6, %v484_v3, %v548_v12  ;;  %v1269_v23 = vunpack.c.h.bf16 %v1290_v57  ;;  %v449_v25 = vmul.f32 %v1268_v7, %v1515_v5 }
  0x40   : > { %v581_v27 = vsel %vm517_vm7, %v485_v8, %v549_v14  ;;  %v644_v29 = vadd.f32 %v612_v13, %v580_v22  ;;  %v487_v30 = vadd.f32 %v1528_v9, %v448_v16  ;;  %vm518_vm8 = vcmp.gt.f32.partialorder %v486_v17, 0.0  ;;  %1346 = vmatmul.mubr.bf16.gmra.mrb[12].mxu0 %v693_v33  ;;  %v616_v33 = vld [vmem:[%s1523_s18 + $0xd0] sm:$0xff] }
  0x41   : > { %1353 = vmatprep.mubr.bf16.mxu1 %v696_v21  ;;  %v645_v31 = vadd.f32 %v613_v15, %v581_v27  ;;  %v550_v32 = vmul.f32 0.1, %v486_v17  ;;  %v450_v20 = vmul.f32 %v1269_v23, %v1515_v5  ;;  %v488_v28 = vadd.f32 %v1528_v9, %v449_v25  ;;  %v620_v8 = vld [vmem:[%s1523_s18 + $0xf0] sm:$0xff] }
  0x42   : > { %676 = vst [vmem:[%s1561_s7 + $0xb0] sm:$0xff] %v644_v29  ;;  %vm519_vm9 = vcmp.gt.f32.partialorder %v487_v30, 0.0  ;;  %v551_v34 = vmul.f32 0.1, %v487_v30  ;;  %v1272_v36 = vunpack.c.l.bf16 %v1291_v26  ;;  %v1273_v37 = vunpack.c.h.bf16 %v1291_v26 }
  0x43   : > { %677 = vst [vmem:[%s1561_s7 + $0xb8] sm:$0xff] %v645_v31  ;;  %v697_v38 = vpack.c.bf16 %v645_v31, %v644_v29  ;;  %v582_v39 = vsel %vm518_vm8, %v486_v17, %v550_v32  ;;  %v489_v40 = vadd.f32 %v1528_v9, %v450_v20  ;;  %vm520_vm10 = vcmp.gt.f32.partialorder %v488_v28, 0.0 }
  0x44   : > { %v583_v42 = vsel %vm519_vm9, %v487_v30, %v551_v34  ;;  %v646_v19 = vadd.f32 %v614_v18, %v582_v39  ;;  %v552_v24 = vmul.f32 0.1, %v488_v28  ;;  %v451_v43 = vmul.f32 %v1272_v36, %v1515_v5 }
  0x45   : > { %v647_v44 = vadd.f32 %v615_v35, %v583_v42  ;;  %vm521_vm11 = vcmp.gt.f32.partialorder %v489_v40, 0.0  ;;  %v553_v45 = vmul.f32 0.1, %v489_v40  ;;  %v452_v47 = vmul.f32 %v1273_v37, %v1515_v5 }
  0x46   : > { %1354 = vmatmul.mubr.bf16.gmra.mrb[4].mxu1 %v697_v38  ;;  %678 = vst [vmem:[%s1561_s7 + $0xc0] sm:$0xff] %v646_v19  ;;  %v584_v48 = vsel %vm520_vm10, %v488_v28, %v552_v24  ;;  %v490_v49 = vadd.f32 %v1528_v9, %v451_v43  ;;  %v1276_v52 = vunpack.c.l.bf16 %v1292_v41  ;;  %v1277_v53 = vunpack.c.h.bf16 %v1292_v41 }
  0x47   : > { %679 = vst [vmem:[%s1561_s7 + $0xc8] sm:$0xff] %v647_v44  ;;  %v698_v54 = vpack.c.bf16 %v647_v44, %v646_v19  ;;  %v585_v55 = vsel %vm521_vm11, %v489_v40, %v553_v45  ;;  %v648_v56 = vadd.f32 %v616_v33, %v584_v48  ;;  %v491_v57 = vadd.f32 %v1528_v9, %v452_v47 }
  0x48   : > { %v649_v50 = vadd.f32 %v617_v46, %v585_v55  ;;  %vm522_vm12 = vcmp.gt.f32.partialorder %v490_v49, 0.0  ;;  %v554_v51 = vmul.f32 0.1, %v490_v49  ;;  %v453_v61 = vmul.f32 %v1276_v52, %v1515_v5 }
  0x49   : > { %1357 = vmatprep.mubr.bf16.mxu1 %v698_v54  ;;  %680 = vst [vmem:[%s1561_s7 + $0xd0] sm:$0xff] %v648_v56  ;;  %vm523_vm13 = vcmp.gt.f32.partialorder %v491_v57, 0.0  ;;  %v555_v62 = vmul.f32 0.1, %v491_v57  ;;  %v454_v1 = vmul.f32 %v1277_v53, %v1515_v5  ;;  %v621_v5 = vld [vmem:[%s1523_s18 + $0xf8] sm:$0xff]  ;;  %vm1033_vm0 = vcmask 1040384  }
  0x4a   : > { %681 = vst [vmem:[%s1561_s7 + $0xd8] sm:$0xff] %v649_v50  ;;  %v699_v2 = vpack.c.bf16 %v649_v50, %v648_v56  ;;  %v586_v3 = vsel %vm522_vm12, %v490_v49, %v554_v51  ;;  %v492_v4 = vadd.f32 %v1528_v9, %v453_v61 }
  0x4b   : > { %v587_v6 = vsel %vm523_vm13, %v491_v57, %v555_v62  ;;  %v650_v7 = vadd.f32 %v618_v58, %v586_v3  ;;  %v493_v59 = vadd.f32 %v1528_v9, %v454_v1 }
  0x4c   : > { %v651_v60 = vadd.f32 %v619_v63, %v587_v6  ;;  %vm524_vm14 = vcmp.gt.f32.partialorder %v492_v4, 0.0  ;;  %v556_v0 = vmul.f32 0.1, %v492_v4 }
  0x4d   : > { %682 = vst [vmem:[%s1561_s7 + $0xe0] sm:$0xff] %v650_v7  ;;  %vm525_vm15 = vcmp.gt.f32.partialorder %v493_v59, 0.0  ;;  %v557_v10 = vmul.f32 0.1, %v493_v59 }
  0x4e   : > { %1358 = vmatmul.mubr.bf16.gmra.mrb[8].mxu1 %v699_v2  ;;  %683 = vst [vmem:[%s1561_s7 + $0xe8] sm:$0xff] %v651_v60  ;;  %v700_v11 = vpack.c.bf16 %v651_v60, %v650_v7  ;;  %v588_v12 = vsel %vm524_vm14, %v492_v4, %v556_v0 }
  0x4f   : > { %v589_v13 = vsel %vm525_vm15, %v493_v59, %v557_v10  ;;  %v652_v14 = vadd.f32 %v620_v8, %v588_v12 }
  0x50   : > { %1361 = vmatprep.mubr.bf16.mxu1 %v700_v11  ;;  %v653_v15 = vadd.f32 %v621_v5, %v589_v13 }
  0x51   : > { %684 = vst [vmem:[%s1561_s7 + $0xf0] sm:$0xff] %v652_v14 }
  0x52   : > { %685 = vst [vmem:[%s1561_s7 + $0xf8] sm:$0xff] %v653_v15  ;;  %v701_v9 = vpack.c.bf16 %v653_v15, %v652_v14 }
  0x56   : > { %1362 = vmatmul.mubr.bf16.gmra.mrb[12].mxu1 %v701_v9 }
  0xfa   : > { %v1335_v16 = vpop.f32.mrb[0].mxu0 }
  0xfb   : > { %v800_v17 = vpop.f32.mrb[1].mxu0  ;;  %v966_v27 = vmul.f32 %v1335_v16, %v1335_v16 }
  0xfc   : > { %v1336_v21 = vpop.f32.mrb[2].mxu0  ;;  %v964_v23 = vmul.f32 %v800_v17, %v800_v17 }
  0xfd   : > { %v803_v22 = vpop.f32.mrb[3].mxu0  ;;  %v967_v31 = vmul.f32 %v1336_v21, %v1336_v21 }
  0xfe   : > { %v927_v25 = vadd.f32 %v803_v22, %v800_v17  ;;  %v965_v26 = vmul.f32 %v803_v22, %v803_v22 }
 0x100   : > { %v928_v29 = vadd.f32 %v1335_v16, %v927_v25  ;;  %v996_v30 = vadd.f32 %v965_v26, %v964_v23 }
 0x102   : > { %v997_v32 = vadd.f32 %v996_v30, %v966_v27  ;;  %v1339_v18 = vpop.f32.mrb[4].mxu0  ;;  %v929_v20 = vadd.f32 %v1336_v21, %v928_v29 }
 0x103   : > { %v816_v28 = vpop.f32.mrb[5].mxu0  ;;  %v970_v42 = vmul.f32 %v1339_v18, %v1339_v18 }
 0x104   : > { %v930_v34 = vadd.f32 %v929_v20, %v816_v28  ;;  %v968_v35 = vmul.f32 %v816_v28, %v816_v28  ;;  %v998_v36 = vadd.f32 %v997_v32, %v967_v31  ;;  %v1340_v37 = vpop.f32.mrb[6].mxu0 }
 0x105   : > { %v819_v38 = vpop.f32.mrb[7].mxu0  ;;  %v971_v33 = vmul.f32 %v1340_v37, %v1340_v37 }
 0x106   : > { %v999_v39 = vadd.f32 %v998_v36, %v968_v35  ;;  %v931_v40 = vadd.f32 %v930_v34, %v819_v38  ;;  %v969_v41 = vmul.f32 %v819_v38, %v819_v38 }
 0x108   : > { %v932_v19 = vadd.f32 %v1339_v18, %v931_v40  ;;  %v1000_v24 = vadd.f32 %v999_v39, %v969_v41 }
 0x10a   : > { %v1001_v43 = vadd.f32 %v1000_v24, %v970_v42  ;;  %v1343_v44 = vpop.f32.mrb[8].mxu0  ;;  %v933_v45 = vadd.f32 %v1340_v37, %v932_v19 }
 0x10b   : > { %v832_v46 = vpop.f32.mrb[9].mxu0  ;;  %v974_v51 = vmul.f32 %v1343_v44, %v1343_v44 }
 0x10c   : > { %v934_v47 = vadd.f32 %v933_v45, %v832_v46  ;;  %v972_v48 = vmul.f32 %v832_v46, %v832_v46  ;;  %v1002_v49 = vadd.f32 %v1001_v43, %v971_v33  ;;  %v1344_v52 = vpop.f32.mrb[10].mxu0 }
 0x10d   : > { %v835_v53 = vpop.f32.mrb[11].mxu0  ;;  %v975_v1 = vmul.f32 %v1344_v52, %v1344_v52 }
 0x10e   : > { %v1003_v54 = vadd.f32 %v1002_v49, %v972_v48  ;;  %v935_v55 = vadd.f32 %v934_v47, %v835_v53  ;;  %v973_v56 = vmul.f32 %v835_v53, %v835_v53 }
 0x110   : > { %v936_v58 = vadd.f32 %v1343_v44, %v935_v55  ;;  %v1004_v61 = vadd.f32 %v1003_v54, %v973_v56 }
 0x111   : > { %v1351_v57 = vpop.f32.mrb[0].mxu1 }
 0x112   : > { %v864_v50 = vpop.f32.mrb[1].mxu1  ;;  %v1005_v2 = vadd.f32 %v1004_v61, %v974_v51  ;;  %v937_v4 = vadd.f32 %v1344_v52, %v936_v58  ;;  %v982_v20 = vmul.f32 %v1351_v57, %v1351_v57 }
 0x113   : > { %v1352_v62 = vpop.f32.mrb[2].mxu1  ;;  %v1347_v3 = vpop.f32.mrb[12].mxu0  ;;  %v980_v25 = vmul.f32 %v864_v50, %v864_v50 }
 0x114   : > { %v867_v63 = vpop.f32.mrb[3].mxu1  ;;  %v848_v6 = vpop.f32.mrb[13].mxu0  ;;  %v1006_v60 = vadd.f32 %v1005_v2, %v975_v1  ;;  %v978_v14 = vmul.f32 %v1347_v3, %v1347_v3  ;;  %v983_v37 = vmul.f32 %v1352_v62, %v1352_v62 }
 0x115   : > { %v938_v7 = vadd.f32 %v937_v4, %v848_v6  ;;  %v976_v59 = vmul.f32 %v848_v6, %v848_v6  ;;  %v1348_v0 = vpop.f32.mrb[14].mxu0  ;;  %v981_v31 = vmul.f32 %v867_v63, %v867_v63 }
 0x116   : > { %v851_v8 = vpop.f32.mrb[15].mxu0  ;;  %v979_v21 = vmul.f32 %v1348_v0, %v1348_v0 }
 0x117   : > { %v1007_v10 = vadd.f32 %v1006_v60, %v976_v59  ;;  %v939_v5 = vadd.f32 %v938_v7, %v851_v8  ;;  %v977_v11 = vmul.f32 %v851_v8, %v851_v8 }
 0x119   : > { %v1355_v12 = vpop.f32.mrb[4].mxu1  ;;  %v940_v15 = vadd.f32 %v1347_v3, %v939_v5  ;;  %v1008_v9 = vadd.f32 %v1007_v10, %v977_v11 }
 0x11a   : > { %v880_v13 = vpop.f32.mrb[5].mxu1  ;;  %v986_v45 = vmul.f32 %v1355_v12, %v1355_v12 }
 0x11b   : > { %v1356_v16 = vpop.f32.mrb[6].mxu1  ;;  %v1009_v22 = vadd.f32 %v1008_v9, %v978_v14  ;;  %v941_v23 = vadd.f32 %v1348_v0, %v940_v15  ;;  %v984_v40 = vmul.f32 %v880_v13, %v880_v13 }
 0x11c   : > { %v883_v17 = vpop.f32.mrb[7].mxu1  ;;  %v987_v52 = vmul.f32 %v1356_v16, %v1356_v16 }
 0x11d   : > { %v942_v26 = vadd.f32 %v941_v23, %v864_v50  ;;  %v1010_v27 = vadd.f32 %v1009_v22, %v979_v21  ;;  %v985_v33 = vmul.f32 %v883_v17, %v883_v17 }
 0x11f   : > { %v1011_v29 = vadd.f32 %v1010_v27, %v980_v25  ;;  %v943_v30 = vadd.f32 %v942_v26, %v867_v63 }
 0x121   : > { %v1359_v32 = vpop.f32.mrb[8].mxu1  ;;  %v944_v28 = vadd.f32 %v1351_v57, %v943_v30  ;;  %v1012_v34 = vadd.f32 %v1011_v29, %v981_v31 }
 0x122   : > { %v896_v18 = vpop.f32.mrb[9].mxu1  ;;  %v990_v61 = vmul.f32 %v1359_v32, %v1359_v32 }
 0x123   : > { %v1360_v35 = vpop.f32.mrb[10].mxu1  ;;  %v1013_v38 = vadd.f32 %v1012_v34, %v982_v20  ;;  %v945_v39 = vadd.f32 %v1352_v62, %v944_v28  ;;  %v988_v55 = vmul.f32 %v896_v18, %v896_v18 }
 0x124   : > { %v899_v36 = vpop.f32.mrb[11].mxu1  ;;  %v991_v1 = vmul.f32 %v1360_v35, %v1360_v35 }
 0x125   : > { %v946_v41 = vadd.f32 %v945_v39, %v880_v13  ;;  %v1014_v42 = vadd.f32 %v1013_v38, %v983_v37  ;;  %v989_v58 = vmul.f32 %v899_v36, %v899_v36 }
 0x127   : > { %v1015_v19 = vadd.f32 %v1014_v42, %v984_v40  ;;  %v947_v24 = vadd.f32 %v946_v41, %v883_v17 }
 0x129   : > { %v1363_v43 = vpop.f32.mrb[12].mxu1  ;;  %v948_v46 = vadd.f32 %v1355_v12, %v947_v24  ;;  %v1016_v47 = vadd.f32 %v1015_v19, %v985_v33 }
 0x12a   : > { %v912_v44 = vpop.f32.mrb[13].mxu1  ;;  %v994_v8 = vmul.f32 %v1363_v43, %v1363_v43 }
 0x12b   : > { %v1364_v48 = vpop.f32.mrb[14].mxu1  ;;  %v1017_v53 = vadd.f32 %v1016_v47, %v986_v45  ;;  %v949_v54 = vadd.f32 %v1356_v16, %v948_v46  ;;  %v992_v4 = vmul.f32 %v912_v44, %v912_v44 }
 0x12c   : > { %v915_v49 = vpop.f32.mrb[15].mxu1  ;;  %v995_v11 = vmul.f32 %v1364_v48, %v1364_v48 }
 0x12d   : > { %v950_v56 = vadd.f32 %v949_v54, %v896_v18  ;;  %v1018_v57 = vadd.f32 %v1017_v53, %v987_v52  ;;  %v993_v0 = vmul.f32 %v915_v49, %v915_v49 }
 0x12f   : > { %v1019_v50 = vadd.f32 %v1018_v57, %v988_v55  ;;  %v951_v51 = vadd.f32 %v950_v56, %v899_v36 }
 0x131   : > { %v952_v62 = vadd.f32 %v1359_v32, %v951_v51  ;;  %v1020_v63 = vadd.f32 %v1019_v50, %v989_v58 }
 0x133   : > { %v1021_v2 = vadd.f32 %v1020_v63, %v990_v61  ;;  %v953_v3 = vadd.f32 %v1360_v35, %v952_v62 }
 0x135   : > { %v954_v6 = vadd.f32 %v953_v3, %v912_v44  ;;  %v1022_v7 = vadd.f32 %v1021_v2, %v991_v1 }
 0x137   : > { %v1023_v59 = vadd.f32 %v1022_v7, %v992_v4  ;;  %v955_v60 = vadd.f32 %v954_v6, %v915_v49 }
 0x139   : > { %v956_v10 = vadd.f32 %v1363_v43, %v955_v60  ;;  %v1024_v5 = vadd.f32 %v1023_v59, %v993_v0 }
 0x13b   : > { %v957_v12 = vadd.f32 %v1364_v48, %v956_v10  ;;  %v1025_v13 = vadd.f32 %v1024_v5, %v994_v8 }
 0x13d   : > { %v958_v14 = vrot.slane %v957_v12, 4  ;;  %v1026_v15 = vadd.f32 %v1025_v13, %v995_v11 }
 0x13f   : > { %v959_v9 = vadd.f32 %v958_v14, %v957_v12  ;;  %v1027_v16 = vrot.slane %v1026_v15, 4 }
 0x141   : > { %v960_v17 = vrot.slane %v959_v9, 2  ;;  %v1028_v21 = vadd.f32 %v1027_v16, %v1026_v15 }
 0x143   : > { %v961_v22 = vadd.f32 %v960_v17, %v959_v9  ;;  %v1029_v23 = vrot.slane %v1028_v21, 2 }
 0x145   : > { %v962_v25 = vrot.slane %v961_v22, 1  ;;  %v1030_v26 = vadd.f32 %v1029_v23, %v1028_v21 }
 0x147   : > { %v1031_v27 = vrot.slane %v1030_v26, 1  ;;  %v963_v29 = vadd.f32 %v962_v25, %v961_v22 }
 0x149   : > { %v1032_v30 = vadd.f32 %v1031_v27, %v1030_v26 }
 0x14b   : > { %v1034_v31 = vsel %vm1033_vm0, %v963_v29, %v1032_v30 }
 0x14c   : > { %1035 = vst [vmem:[%s349_s15] sm:$0x3] %v1034_v31 }
 0x14d PF: > { %s17_s23 = sadd.s32 1, %s1435_s23   ;;  %s1796_s21 = smov %s1431_s22 }
 0x14e   : > { %p14_p5 = scmp.ge.s32.totalorder %s17_s23, 4   ;;  %s1797_s22 = smov %s1799_s24 }
 0x150   :  { %16 = sbr.rel (!%p14_p5) target bundleno = 2 (0x2), region = 85 }

// kernel: residual_block_forward.8
= control target key start
LH: loop header
LB: loop body
LE: loop exit
PB: predicated region body
PF: predicated region fallthrough
CT: control target
= control target key end

     0   :  { %s1297_s15 = smov 0   ;;  %s1299_s16 = smov 0   ;;  %s1487_s0 = inlined_call_operand.vmem [shape: f32[2,16,16,128], index: 0, kind: input, shape index: {}]   ;;  %s1488_s1 = inlined_call_operand.vmem [shape: bf16[128,128], index: 1, kind: input, shape index: {}]   ;;  %s1489_s2 = inlined_call_operand.vmem [shape: f32[1,128], index: 2, kind: input, shape index: {}]   ;;  %s1490_s3 = inlined_call_operand.vmem [shape: f32[1,128], index: 3, kind: input, shape index: {}]   ;;  %s1491_s4 = inlined_call_operand.vmem [shape: bf16[2,16,16,128], index: 4, kind: output, shape index: {}]  }
   0x1   :  { %s1301_s17 = smov 0  }
   0x2 LB: > { %s26_s18 = sadd.s32 1, %s1266_s16  ;;  %p950_p0 = scmp.ge.s32.totalorder %s1270_s17, 1  ;;  %s1270_s17 = sphi %s1301_s17, %s14_s17   ;;  %s1266_s16 = sphi %s1299_s16, %s1493_s16   ;;  %s1262_s15 = sphi %s1297_s15, %s1492_s15  }
   0x3   : > { %p28_p1 = scmp.ge.s32.totalorder %s26_s18, 2  ;;  %p184_p2 = scmp.lt.s32.totalorder %s1270_s17, 3 }
   0x5   : > { %s1495_s18 = smov (%p28_p1, %s26_s18), 0  ;;  %p185_p3 = pnand %p950_p0, %p184_p2 }
   0x6   : > { %v1240_v0 = vld [vmem:[%s1488_s1] sm:$0xff] (!%p185_p3)   ;;  %p221_p4 = scmp.lt.s32.totalorder (!%p185_p3), %s1262_s15, 1  ;;  %v1241_v1 = vld [vmem:[%s1488_s1 + $0x8] sm:$0xff] (!%p185_p3)   ;;  %v1242_v2 = vld [vmem:[%s1488_s1 + $0x10] sm:$0xff] (!%p185_p3)  }
   0x7   : > { %188 = sbr.rel (%p185_p3) target bundleno = 301 (0x12d), region = 36  ;;  %1152 = vmatprep.subr.bf16.mxu0 (!%p185_p3), %v1240_v0  ;;  %1200 = vmatprep.subr.bf16.mxu1 (!%p185_p3), %v1240_v0  ;;  %v1243_v3 = vld [vmem:[%s1488_s1 + $0x18] sm:$0xff] (!%p185_p3)   ;;  %v1244_v10 = vld [vmem:[%s1488_s1 + $0x20] sm:$0xff] (!%p185_p3)   ;;  %v1245_v11 = vld [vmem:[%s1488_s1 + $0x28] sm:$0xff] (!%p185_p3)  }
   0x8   : > { %1153 = vmatpush3.bf16.msra.mxu0 (!%p185_p3), %v1240_v0  ;;  %1208 = vmatpush3.bf16.msra.mxu1 (!%p185_p3), %v1240_v0  ;;  %v1246_v12 = vld [vmem:[%s1488_s1 + $0x30] sm:$0xff] (!%p185_p3)   ;;  %v1247_v13 = vld [vmem:[%s1488_s1 + $0x38] sm:$0xff] (!%p185_p3)   ;;  %v1382_v56 = vld [vmem:[%s1489_s2] ss:$0 sm:$0xff] (!%p185_p3) }
   0x9   : > { %1154 = vmatprep.subr.bf16.mxu0 (!%p185_p3), %v1241_v1  ;;  %1201 = vmatprep.subr.bf16.mxu1 (!%p185_p3), %v1241_v1  ;;  %v1387_v58 = vld [vmem:[%s1490_s3] ss:$0 sm:$0xff] (!%p185_p3) }
   0xc   : > { %1155 = vmatpush3.bf16.msra.mxu0 (!%p185_p3), %v1241_v1  ;;  %1209 = vmatpush3.bf16.msra.mxu1 (!%p185_p3), %v1241_v1 }
   0xd   : > { %1156 = vmatprep.subr.bf16.mxu0 (!%p185_p3), %v1242_v2  ;;  %1202 = vmatprep.subr.bf16.mxu1 (!%p185_p3), %v1242_v2 }
   0xe   : > { %s1497_s15 = smov (!%p221_p4, %s1262_s15), 1 }
   0xf   : > { %s999_s25 = sshll.u32 %s1497_s15, 8  ;;  %s1000_s21 = sshll.u32 %s1497_s15, 7 }
  0x10   : > { %s1330_s28 = scalar_lea.vmem %s1487_s0, %s999_s25  ;;  %1157 = vmatpush3.bf16.msra.mxu0 %v1242_v2  ;;  %1210 = vmatpush3.bf16.msra.mxu1 %v1242_v2  ;;  %s1409_s24 = scalar_lea.vmem %s1491_s4, %s1000_s21 }
  0x11   : > { %v243_v4 = vld [vmem:[%s1330_s28] sm:$0xff]  ;;  %v244_v5 = vld [vmem:[%s1330_s28 + $0x8] sm:$0xff]  ;;  %1158 = vmatprep.subr.bf16.mxu0 %v1243_v3  ;;  %1203 = vmatprep.subr.bf16.mxu1 %v1243_v3  ;;  %v245_v14 = vld [vmem:[%s1330_s28 + $0x10] sm:$0xff] }
  0x12   : > { %v259_v6 = vld [vmem:[%s1330_s28 + $0x80] sm:$0xff]  ;;  %v275_v7 = vpack.c.bf16 %v244_v5, %v243_v4  ;;  %v260_v8 = vld [vmem:[%s1330_s28 + $0x88] sm:$0xff]  ;;  %v246_v15 = vld [vmem:[%s1330_s28 + $0x18] sm:$0xff] }
  0x13   : > { %v283_v9 = vpack.c.bf16 %v260_v8, %v259_v6  ;;  %v261_v16 = vld [vmem:[%s1330_s28 + $0x90] sm:$0xff]  ;;  %v262_v17 = vld [vmem:[%s1330_s28 + $0x98] sm:$0xff]  ;;  %v247_v18 = vld [vmem:[%s1330_s28 + $0x20] sm:$0xff]  ;;  %v276_v22 = vpack.c.bf16 %v246_v15, %v245_v14 }
  0x14   : > { %1168 = vmatprep.mubr.bf16.mxu0 %v275_v7  ;;  %1159 = vmatpush3.bf16.msra.mxu0 %v1243_v3  ;;  %v248_v19 = vld [vmem:[%s1330_s28 + $0x28] sm:$0xff]  ;;  %v263_v20 = vld [vmem:[%s1330_s28 + $0xa0] sm:$0xff]  ;;  %v284_v23 = vpack.c.bf16 %v262_v17, %v261_v16  ;;  %v249_v26 = vld [vmem:[%s1330_s28 + $0x30] sm:$0xff] }
  0x15   : > { %1184 = vmatprep.mubr.bf16.mxu1 %v283_v9  ;;  %1211 = vmatpush3.bf16.msra.mxu1 %v1243_v3  ;;  %v264_v21 = vld [vmem:[%s1330_s28 + $0xa8] sm:$0xff]  ;;  %v277_v24 = vpack.c.bf16 %v248_v19, %v247_v18  ;;  %v250_v27 = vld [vmem:[%s1330_s28 + $0x38] sm:$0xff]  ;;  %v265_v28 = vld [vmem:[%s1330_s28 + $0xb0] sm:$0xff] }
  0x16   : > { %1160 = vmatprep.subr.bf16.mxu0 %v1244_v10  ;;  %1204 = vmatprep.subr.bf16.mxu1 %v1244_v10  ;;  %v285_v25 = vpack.c.bf16 %v264_v21, %v263_v20  ;;  %v266_v29 = vld [vmem:[%s1330_s28 + $0xb8] sm:$0xff]  ;;  %v251_v30 = vld [vmem:[%s1330_s28 + $0x40] sm:$0xff]  ;;  %v252_v31 = vld [vmem:[%s1330_s28 + $0x48] sm:$0xff]  ;;  %v278_v34 = vpack.c.bf16 %v250_v27, %v249_v26 }
  0x17   : > { %v267_v32 = vld [vmem:[%s1330_s28 + $0xc0] sm:$0xff]  ;;  %v268_v33 = vld [vmem:[%s1330_s28 + $0xc8] sm:$0xff]  ;;  %v286_v35 = vpack.c.bf16 %v266_v29, %v265_v28  ;;  %v279_v36 = vpack.c.bf16 %v252_v31, %v251_v30  ;;  %v253_v38 = vld [vmem:[%s1330_s28 + $0x50] sm:$0xff] }
  0x18   : > { %1161 = vmatpush3.bf16.msra.mxu0 %v1244_v10  ;;  %v287_v37 = vpack.c.bf16 %v268_v33, %v267_v32  ;;  %v254_v39 = vld [vmem:[%s1330_s28 + $0x58] sm:$0xff]  ;;  %v269_v40 = vld [vmem:[%s1330_s28 + $0xd0] sm:$0xff]  ;;  %v255_v42 = vld [vmem:[%s1330_s28 + $0x60] sm:$0xff] }
  0x19   : > { %1212 = vmatpush3.bf16.msra.mxu1 %v1244_v10  ;;  %1162 = vmatprep.subr.bf16.mxu0 %v1245_v11  ;;  %v270_v41 = vld [vmem:[%s1330_s28 + $0xd8] sm:$0xff]  ;;  %v256_v43 = vld [vmem:[%s1330_s28 + $0x68] sm:$0xff]  ;;  %v271_v44 = vld [vmem:[%s1330_s28 + $0xe0] sm:$0xff]  ;;  %v280_v46 = vpack.c.bf16 %v254_v39, %v253_v38 }
  0x1a   : > { %1205 = vmatprep.subr.bf16.mxu1 %v1245_v11  ;;  %v272_v45 = vld [vmem:[%s1330_s28 + $0xe8] sm:$0xff]  ;;  %v288_v47 = vpack.c.bf16 %v270_v41, %v269_v40  ;;  %v281_v48 = vpack.c.bf16 %v256_v43, %v255_v42  ;;  %v257_v50 = vld [vmem:[%s1330_s28 + $0x70] sm:$0xff]  ;;  %v258_v51 = vld [vmem:[%s1330_s28 + $0x78] sm:$0xff] }
  0x1b   : > { %v289_v49 = vpack.c.bf16 %v272_v45, %v271_v44  ;;  %v273_v52 = vld [vmem:[%s1330_s28 + $0xf0] sm:$0xff]  ;;  %v274_v53 = vld [vmem:[%s1330_s28 + $0xf8] sm:$0xff]  ;;  %v282_v54 = vpack.c.bf16 %v258_v51, %v257_v50 }
  0x1c   : > { %1163 = vmatpush3.bf16.msra.mxu0 %v1245_v11  ;;  %v290_v55 = vpack.c.bf16 %v274_v53, %v273_v52 }
  0x1d   : > { %1213 = vmatpush3.bf16.msra.mxu1 %v1245_v11  ;;  %1164 = vmatprep.subr.bf16.mxu0 %v1246_v12 }
  0x1e   : > { %1206 = vmatprep.subr.bf16.mxu1 %v1246_v12 }
  0x20   : > { %1165 = vmatpush3.bf16.msra.mxu0 %v1246_v12 }
  0x21   : > { %1214 = vmatpush3.bf16.msra.mxu1 %v1246_v12  ;;  %1166 = vmatprep.subr.bf16.mxu0 %v1247_v13 }
  0x22   : > { %1207 = vmatprep.subr.bf16.mxu1 %v1247_v13 }
  0x24   : > { %1167 = vmatpush3.bf16.msra.mxu0 %v1247_v13 }
  0x25   : > { %1215 = vmatpush3.bf16.msra.mxu1 %v1247_v13 }
  0x27   : > { %1169 = vmatmul.mubr.bf16.vlgmr.msra.gmra.mrb[0].mxu0 %v276_v22 }
  0x28   : > { %1185 = vmatmul.mubr.bf16.vlgmr.msra.gmra.mrb[0].mxu1 %v284_v23  ;;  %1172 = vmatprep.mubr.bf16.mxu0 %v277_v24 }
  0x29   : > { %1188 = vmatprep.mubr.bf16.mxu1 %v285_v25 }
  0x2f   : > { %1173 = vmatmul.mubr.bf16.gmra.mrb[4].mxu0 %v278_v34 }
  0x30   : > { %1189 = vmatmul.mubr.bf16.gmra.mrb[4].mxu1 %v286_v35  ;;  %1176 = vmatprep.mubr.bf16.mxu0 %v279_v36 }
  0x31   : > { %1192 = vmatprep.mubr.bf16.mxu1 %v287_v37 }
  0x37   : > { %1177 = vmatmul.mubr.bf16.gmra.mrb[8].mxu0 %v280_v46 }
  0x38   : > { %1193 = vmatmul.mubr.bf16.gmra.mrb[8].mxu1 %v288_v47  ;;  %1180 = vmatprep.mubr.bf16.mxu0 %v281_v48 }
  0x39   : > { %1196 = vmatprep.mubr.bf16.mxu1 %v289_v49 }
  0x3f   : > { %1181 = vmatmul.mubr.bf16.gmra.mrb[12].mxu0 %v282_v54 }
  0x40   : > { %1197 = vmatmul.mubr.bf16.gmra.mrb[12].mxu1 %v290_v55 }
  0xfa   : > { %v1170_v57 = vpop.f32.mrb[0].mxu0 }
  0xfb   : > { %v1186_v59 = vpop.f32.mrb[0].mxu1  ;;  %v525_v60 = vmul.f32 %v1170_v57, %v1382_v56  ;;  %v389_v62 = vpop.f32.mrb[1].mxu0 }
  0xfc   : > { %v541_v61 = vmul.f32 %v1186_v59, %v1382_v56  ;;  %v453_v63 = vpop.f32.mrb[1].mxu1  ;;  %v523_v0 = vmul.f32 %v1382_v56, %v389_v62  ;;  %v1171_v2 = vpop.f32.mrb[2].mxu0 }
  0xfd   : > { %v539_v1 = vmul.f32 %v1382_v56, %v453_v63  ;;  %v1187_v3 = vpop.f32.mrb[2].mxu1  ;;  %v564_v4 = vadd.f32 %v1387_v58, %v525_v60  ;;  %v526_v6 = vmul.f32 %v1171_v2, %v1382_v56  ;;  %v392_v8 = vpop.f32.mrb[3].mxu0 }
  0xfe   : > { %v580_v5 = vadd.f32 %v1387_v58, %v541_v61  ;;  %v542_v7 = vmul.f32 %v1187_v3, %v1382_v56  ;;  %v456_v9 = vpop.f32.mrb[3].mxu1  ;;  %v562_v10 = vadd.f32 %v1387_v58, %v523_v0  ;;  %v524_v12 = vmul.f32 %v1382_v56, %v392_v8 }
  0xff   : > { %v578_v11 = vadd.f32 %v1387_v58, %v539_v1  ;;  %v540_v13 = vmul.f32 %v1382_v56, %v456_v9  ;;  %vm596_vm0 = vcmp.gt.f32.partialorder %v564_v4, 0.0  ;;  %v628_v14 = vmul.f32 0.1, %v564_v4 }
 0x100   : > { %vm612_vm1 = vcmp.gt.f32.partialorder %v580_v5, 0.0  ;;  %v644_v15 = vmul.f32 0.1, %v580_v5  ;;  %vm594_vm2 = vcmp.gt.f32.partialorder %v562_v10, 0.0  ;;  %v626_v16 = vmul.f32 0.1, %v562_v10 }
 0x101   : > { %vm610_vm3 = vcmp.gt.f32.partialorder %v578_v11, 0.0  ;;  %v642_v17 = vmul.f32 0.1, %v578_v11  ;;  %v660_v18 = vsel %vm596_vm0, %v564_v4, %v628_v14  ;;  %v565_v20 = vadd.f32 %v1387_v58, %v526_v6 }
 0x102   : > { %v676_v19 = vsel %vm612_vm1, %v580_v5, %v644_v15  ;;  %v581_v21 = vadd.f32 %v1387_v58, %v542_v7  ;;  %v658_v22 = vsel %vm594_vm2, %v562_v10, %v626_v16  ;;  %v563_v24 = vadd.f32 %v1387_v58, %v524_v12  ;;  %v1174_v26 = vpop.f32.mrb[4].mxu0 }
 0x103   : > { %v674_v23 = vsel %vm610_vm3, %v578_v11, %v642_v17  ;;  %v579_v25 = vadd.f32 %v1387_v58, %v540_v13  ;;  %v1190_v27 = vpop.f32.mrb[4].mxu1  ;;  %vm597_vm4 = vcmp.gt.f32.partialorder %v565_v20, 0.0  ;;  %v629_v28 = vmul.f32 0.1, %v565_v20  ;;  %v405_v36 = vpop.f32.mrb[5].mxu0 }
 0x104   : > { %vm613_vm5 = vcmp.gt.f32.partialorder %v581_v21, 0.0  ;;  %v645_v29 = vmul.f32 0.1, %v581_v21  ;;  %vm595_vm6 = vcmp.gt.f32.partialorder %v563_v24, 0.0  ;;  %v627_v30 = vmul.f32 0.1, %v563_v24 }
 0x105   : > { %vm611_vm7 = vcmp.gt.f32.partialorder %v579_v25, 0.0  ;;  %v643_v31 = vmul.f32 0.1, %v579_v25  ;;  %v661_v32 = vsel %vm597_vm4, %v565_v20, %v629_v28  ;;  %v529_v34 = vmul.f32 %v1174_v26, %v1382_v56  ;;  %v469_v37 = vpop.f32.mrb[5].mxu1  ;;  %v1175_v42 = vpop.f32.mrb[6].mxu0 }
 0x106   : > { %v677_v33 = vsel %vm613_vm5, %v581_v21, %v645_v29  ;;  %v545_v35 = vmul.f32 %v1190_v27, %v1382_v56  ;;  %v1041_v38 = vpack.c.bf16 %v661_v32, %v660_v18  ;;  %v659_v40 = vsel %vm595_vm6, %v563_v24, %v627_v30  ;;  %v1191_v43 = vpop.f32.mrb[6].mxu1  ;;  %v408_v48 = vpop.f32.mrb[7].mxu0 }
 0x107   : > { %v1081_v39 = vpack.c.bf16 %v677_v33, %v676_v19  ;;  %v675_v41 = vsel %vm611_vm7, %v579_v25, %v643_v31  ;;  %v1036_v44 = vpack.c.bf16 %v659_v40, %v658_v22  ;;  %v568_v46 = vadd.f32 %v1387_v58, %v529_v34  ;;  %v472_v49 = vpop.f32.mrb[7].mxu1 }
 0x108   : > { %v1076_v45 = vpack.c.bf16 %v675_v41, %v674_v23  ;;  %v584_v47 = vadd.f32 %v1387_v58, %v545_v35  ;;  %1113 = vst [vmem:[%s1409_s24 + $0x8] sm:$0xff] %v1041_v38   ;;  %v527_v50 = vmul.f32 %v1382_v56, %v405_v36  ;;  %v543_v51 = vmul.f32 %v1382_v56, %v469_v37 }
 0x109   : > { %1121 = vst [vmem:[%s1409_s24 + $0x48] sm:$0xff] %v1081_v39   ;;  %v530_v52 = vmul.f32 %v1175_v42, %v1382_v56  ;;  %v546_v53 = vmul.f32 %v1191_v43, %v1382_v56  ;;  %1037 = vst [vmem:[%s1409_s24] sm:$0xff] %v1036_v44   ;;  %vm600_vm8 = vcmp.gt.f32.partialorder %v568_v46, 0.0  ;;  %v632_v54 = vmul.f32 0.1, %v568_v46 }
 0x10a   : > { %1120 = vst [vmem:[%s1409_s24 + $0x40] sm:$0xff] %v1076_v45   ;;  %vm616_vm9 = vcmp.gt.f32.partialorder %v584_v47, 0.0  ;;  %v648_v55 = vmul.f32 0.1, %v584_v47  ;;  %v566_v57 = vadd.f32 %v1387_v58, %v527_v50  ;;  %v582_v59 = vadd.f32 %v1387_v58, %v543_v51  ;;  %v1178_v62 = vpop.f32.mrb[8].mxu0 }
 0x10b   : > { %v569_v60 = vadd.f32 %v1387_v58, %v530_v52  ;;  %v585_v61 = vadd.f32 %v1387_v58, %v546_v53  ;;  %v1194_v63 = vpop.f32.mrb[8].mxu1  ;;  %v664_v0 = vsel %vm600_vm8, %v568_v46, %v632_v54  ;;  %v528_v2 = vmul.f32 %v1382_v56, %v408_v48  ;;  %v421_v4 = vpop.f32.mrb[9].mxu0 }
 0x10c   : > { %v680_v1 = vsel %vm616_vm9, %v584_v47, %v648_v55  ;;  %v544_v3 = vmul.f32 %v1382_v56, %v472_v49  ;;  %v485_v5 = vpop.f32.mrb[9].mxu1  ;;  %vm598_vm10 = vcmp.gt.f32.partialorder %v566_v57, 0.0  ;;  %v630_v6 = vmul.f32 0.1, %v566_v57  ;;  %v1179_v14 = vpop.f32.mrb[10].mxu0 }
 0x10d   : > { %vm614_vm11 = vcmp.gt.f32.partialorder %v582_v59, 0.0  ;;  %v646_v7 = vmul.f32 0.1, %v582_v59  ;;  %vm601_vm12 = vcmp.gt.f32.partialorder %v569_v60, 0.0  ;;  %v633_v8 = vmul.f32 0.1, %v569_v60 }
 0x10e   : > { %vm617_vm13 = vcmp.gt.f32.partialorder %v585_v61, 0.0  ;;  %v649_v9 = vmul.f32 0.1, %v585_v61  ;;  %v662_v10 = vsel %vm598_vm10, %v566_v57, %v630_v6  ;;  %v567_v12 = vadd.f32 %v1387_v58, %v528_v2  ;;  %v1195_v15 = vpop.f32.mrb[10].mxu1  ;;  %v424_v20 = vpop.f32.mrb[11].mxu0 }
 0x10f   : > { %v678_v11 = vsel %vm614_vm11, %v582_v59, %v646_v7  ;;  %v583_v13 = vadd.f32 %v1387_v58, %v544_v3  ;;  %v665_v16 = vsel %vm601_vm12, %v569_v60, %v633_v8  ;;  %v533_v18 = vmul.f32 %v1178_v62, %v1382_v56  ;;  %v488_v21 = vpop.f32.mrb[11].mxu1 }
 0x110   : > { %v681_v17 = vsel %vm617_vm13, %v585_v61, %v649_v9  ;;  %v549_v19 = vmul.f32 %v1194_v63, %v1382_v56  ;;  %v1051_v22 = vpack.c.bf16 %v665_v16, %v664_v0  ;;  %vm599_vm14 = vcmp.gt.f32.partialorder %v567_v12, 0.0 }
 0x111   : > { %v1091_v23 = vpack.c.bf16 %v681_v17, %v680_v1  ;;  %v631_v24 = vmul.f32 0.1, %v567_v12  ;;  %vm615_vm15 = vcmp.gt.f32.partialorder %v583_v13, 0.0  ;;  %v647_v25 = vmul.f32 0.1, %v583_v13 }
 0x112   : > { %v572_v26 = vadd.f32 %v1387_v58, %v533_v18  ;;  %v588_v27 = vadd.f32 %v1387_v58, %v549_v19  ;;  %1115 = vst [vmem:[%s1409_s24 + $0x18] sm:$0xff] %v1051_v22   ;;  %v531_v29 = vmul.f32 %v1382_v56, %v421_v4  ;;  %v547_v30 = vmul.f32 %v1382_v56, %v485_v5  ;;  %v1182_v32 = vpop.f32.mrb[12].mxu0 }
 0x113   : > { %1123 = vst [vmem:[%s1409_s24 + $0x58] sm:$0xff] %v1091_v23   ;;  %v663_v28 = vsel %vm599_vm14, %v567_v12, %v631_v24  ;;  %v534_v31 = vmul.f32 %v1179_v14, %v1382_v56  ;;  %v1198_v33 = vpop.f32.mrb[12].mxu1  ;;  %v679_v35 = vsel %vm615_vm15, %v583_v13, %v647_v25  ;;  %v437_v37 = vpop.f32.mrb[13].mxu0  ;;  %v550_v46 = vmul.f32 %v1195_v15, %v1382_v56 }
 0x114   : > { %v1046_v34 = vpack.c.bf16 %v663_v28, %v662_v10  ;;  %vm604_vm0 = vcmp.gt.f32.partialorder %v572_v26, 0.0  ;;  %v636_v36 = vmul.f32 0.1, %v572_v26  ;;  %v501_v38 = vpop.f32.mrb[13].mxu1  ;;  %v1086_v39 = vpack.c.bf16 %v679_v35, %v678_v11  ;;  %v1183_v42 = vpop.f32.mrb[14].mxu0 }
 0x115   : > { %vm620_vm1 = vcmp.gt.f32.partialorder %v588_v27, 0.0  ;;  %v652_v40 = vmul.f32 0.1, %v588_v27  ;;  %v570_v41 = vadd.f32 %v1387_v58, %v531_v29  ;;  %v1199_v43 = vpop.f32.mrb[14].mxu1  ;;  %v586_v44 = vadd.f32 %v1387_v58, %v547_v30  ;;  %v440_v47 = vpop.f32.mrb[15].mxu0 }
 0x116   : > { %1114 = vst [vmem:[%s1409_s24 + $0x10] sm:$0xff] %v1046_v34   ;;  %v573_v45 = vadd.f32 %v1387_v58, %v534_v31  ;;  %v504_v48 = vpop.f32.mrb[15].mxu1  ;;  %1122 = vst [vmem:[%s1409_s24 + $0x50] sm:$0xff] %v1086_v39   ;;  %v668_v49 = vsel %vm604_vm0, %v572_v26, %v636_v36  ;;  %v532_v51 = vmul.f32 %v1382_v56, %v424_v20 }
 0x117   : > { %v684_v50 = vsel %vm620_vm1, %v588_v27, %v652_v40  ;;  %vm602_vm2 = vcmp.gt.f32.partialorder %v570_v41, 0.0  ;;  %v634_v52 = vmul.f32 0.1, %v570_v41  ;;  %vm618_vm4 = vcmp.gt.f32.partialorder %v586_v44, 0.0 }
 0x118   : > { %vm605_vm3 = vcmp.gt.f32.partialorder %v573_v45, 0.0  ;;  %v637_v53 = vmul.f32 0.1, %v573_v45  ;;  %v589_v54 = vadd.f32 %v1387_v58, %v550_v46  ;;  %v571_v55 = vadd.f32 %v1387_v58, %v532_v51 }
 0x119   : > { %v548_v57 = vmul.f32 %v1382_v56, %v488_v21  ;;  %v650_v59 = vmul.f32 0.1, %v586_v44  ;;  %v537_v61 = vmul.f32 %v1182_v32, %v1382_v56  ;;  %v553_v62 = vmul.f32 %v1198_v33, %v1382_v56 }
 0x11a   : > { %v669_v60 = vsel %vm605_vm3, %v573_v45, %v637_v53  ;;  %vm621_vm5 = vcmp.gt.f32.partialorder %v589_v54, 0.0  ;;  %v653_v0 = vmul.f32 0.1, %v589_v54  ;;  %vm603_vm6 = vcmp.gt.f32.partialorder %v571_v55, 0.0 }
 0x11b   : > { %v1061_v63 = vpack.c.bf16 %v669_v60, %v668_v49  ;;  %v666_v1 = vsel %vm602_vm2, %v570_v41, %v634_v52  ;;  %v635_v2 = vmul.f32 0.1, %v571_v55  ;;  %v587_v3 = vadd.f32 %v1387_v58, %v548_v57 }
 0x11c   : > { %v576_v4 = vadd.f32 %v1387_v58, %v537_v61  ;;  %v685_v5 = vsel %vm621_vm5, %v589_v54, %v653_v0  ;;  %v592_v6 = vadd.f32 %v1387_v58, %v553_v62  ;;  %v535_v7 = vmul.f32 %v1382_v56, %v437_v37 }
 0x11d   : > { %1117 = vst [vmem:[%s1409_s24 + $0x28] sm:$0xff] %v1061_v63   ;;  %v538_v8 = vmul.f32 %v1183_v42, %v1382_v56  ;;  %v1101_v9 = vpack.c.bf16 %v685_v5, %v684_v50  ;;  %v667_v10 = vsel %vm603_vm6, %v571_v55, %v635_v2  ;;  %vm619_vm7 = vcmp.gt.f32.partialorder %v587_v3, 0.0 }
 0x11e   : > { %v651_v11 = vmul.f32 0.1, %v587_v3  ;;  %v1056_v12 = vpack.c.bf16 %v667_v10, %v666_v1  ;;  %v551_v13 = vmul.f32 %v1382_v56, %v501_v38  ;;  %v682_v14 = vsel %vm618_vm4, %v586_v44, %v650_v59 }
 0x11f   : > { %1125 = vst [vmem:[%s1409_s24 + $0x68] sm:$0xff] %v1101_v9   ;;  %vm608_vm8 = vcmp.gt.f32.partialorder %v576_v4, 0.0  ;;  %v640_v16 = vmul.f32 0.1, %v576_v4  ;;  %v656_v18 = vmul.f32 0.1, %v592_v6  ;;  %v577_v19 = vadd.f32 %v1387_v58, %v538_v8 }
 0x120   : > { %v683_v15 = vsel %vm619_vm7, %v587_v3, %v651_v11  ;;  %1116 = vst [vmem:[%s1409_s24 + $0x20] sm:$0xff] %v1056_v12   ;;  %v554_v20 = vmul.f32 %v1199_v43, %v1382_v56  ;;  %vm624_vm9 = vcmp.gt.f32.partialorder %v592_v6, 0.0  ;;  %v574_v21 = vadd.f32 %v1387_v58, %v535_v7 }
 0x121   : > { %v1096_v17 = vpack.c.bf16 %v683_v15, %v682_v14  ;;  %v590_v22 = vadd.f32 %v1387_v58, %v551_v13  ;;  %vm609_vm10 = vcmp.gt.f32.partialorder %v577_v19, 0.0  ;;  %v641_v23 = vmul.f32 0.1, %v577_v19 }
 0x122   : > { %v593_v24 = vadd.f32 %v1387_v58, %v554_v20  ;;  %v672_v25 = vsel %vm608_vm8, %v576_v4, %v640_v16  ;;  %v536_v26 = vmul.f32 %v1382_v56, %v440_v47  ;;  %v552_v27 = vmul.f32 %v1382_v56, %v504_v48 }
 0x123   : > { %1124 = vst [vmem:[%s1409_s24 + $0x60] sm:$0xff] %v1096_v17   ;;  %v688_v28 = vsel %vm624_vm9, %v592_v6, %v656_v18  ;;  %v673_v29 = vsel %vm609_vm10, %v577_v19, %v641_v23  ;;  %v638_v31 = vmul.f32 0.1, %v574_v21  ;;  %vm606_vm12 = vcmp.gt.f32.partialorder %v574_v21, 0.0 }
 0x124   : > { %vm625_vm11 = vcmp.gt.f32.partialorder %v593_v24, 0.0  ;;  %v657_v30 = vmul.f32 0.1, %v593_v24  ;;  %v1071_v32 = vpack.c.bf16 %v673_v29, %v672_v25  ;;  %v575_v33 = vadd.f32 %v1387_v58, %v536_v26 }
 0x125   : > { %v591_v34 = vadd.f32 %v1387_v58, %v552_v27  ;;  %vm622_vm13 = vcmp.gt.f32.partialorder %v590_v22, 0.0  ;;  %v654_v35 = vmul.f32 0.1, %v590_v22  ;;  %v670_v39 = vsel %vm606_vm12, %v574_v21, %v638_v31 }
 0x126   : > { %v689_v36 = vsel %vm625_vm11, %v593_v24, %v657_v30  ;;  %1119 = vst [vmem:[%s1409_s24 + $0x38] sm:$0xff] %v1071_v32   ;;  %vm607_vm14 = vcmp.gt.f32.partialorder %v575_v33, 0.0  ;;  %v639_v56 = vmul.f32 0.1, %v575_v33 }
 0x127   : > { %v1111_v37 = vpack.c.bf16 %v689_v36, %v688_v28  ;;  %vm623_vm15 = vcmp.gt.f32.partialorder %v591_v34, 0.0  ;;  %v655_v38 = vmul.f32 0.1, %v591_v34  ;;  %v686_v41 = vsel %vm622_vm13, %v590_v22, %v654_v35 }
 0x128   : > { %v671_v40 = vsel %vm607_vm14, %v575_v33, %v639_v56 }
 0x129   : > { %1127 = vst [vmem:[%s1409_s24 + $0x78] sm:$0xff] %v1111_v37   ;;  %v1066_v42 = vpack.c.bf16 %v671_v40, %v670_v39  ;;  %v687_v43 = vsel %vm623_vm15, %v591_v34, %v655_v38 }
 0x12a   : > { %v1106_v44 = vpack.c.bf16 %v687_v43, %v686_v41 }
 0x12b   : > { %1118 = vst [vmem:[%s1409_s24 + $0x30] sm:$0xff] %v1066_v42  }
 0x12c   : > { %1126 = vst [vmem:[%s1409_s24 + $0x70] sm:$0xff] %v1106_v44  }
 0x12d PF: > { %s14_s17 = sadd.s32 1, %s1270_s17   ;;  %s1492_s15 = smov %s1266_s16 }
 0x12e   : > { %p11_p5 = scmp.ge.s32.totalorder %s14_s17, 4   ;;  %s1493_s16 = smov %s1495_s18 }
 0x130   :  { %13 = sbr.rel (!%p11_p5) target bundleno = 2 (0x2), region = 66 }

// kernel: residual_block_forward.13
= control target key start
LH: loop header
LB: loop body
LE: loop exit
PB: predicated region body
PF: predicated region fallthrough
CT: control target
= control target key end

     0   :  { %s902_s15 = smov 0   ;;  %s904_s16 = smov 0   ;;  %s1106_s0 = inlined_call_operand.vmem [shape: bf16[2,16,16,128], index: 0, kind: input, shape index: {}]   ;;  %s1107_s1 = inlined_call_operand.vmem [shape: f32[1,128], index: 1, kind: input, shape index: {}]   ;;  %s1108_s2 = inlined_call_operand.vmem [shape: f32[1,128], index: 2, kind: input, shape index: {}]   ;;  %s1109_s3 = inlined_call_operand.vmem [shape: f32[2,16,16,128], index: 3, kind: input, shape index: {}]   ;;  %s1110_s4 = inlined_call_operand.vmem [shape: f32[2,16,16,128], index: 4, kind: output, shape index: {}]  }
   0x1   :  { %s906_s17 = smov 0  }
   0x2 LB: > { %s26_s18 = sadd.s32 1, %s871_s16  ;;  %p736_p0 = scmp.ge.s32.totalorder %s875_s17, 1  ;;  %s875_s17 = sphi %s906_s17, %s14_s17   ;;  %s871_s16 = sphi %s904_s16, %s1112_s16   ;;  %s867_s15 = sphi %s902_s15, %s1111_s15  }
   0x3   : > { %p28_p1 = scmp.ge.s32.totalorder %s26_s18, 2  ;;  %p202_p2 = scmp.lt.s32.totalorder %s875_s17, 3 }
   0x5   : > { %s1114_s18 = smov (%p28_p1, %s26_s18), 0  ;;  %p203_p3 = pnand %p736_p0, %p202_p2 }
   0x6   : > { %p249_p4 = scmp.lt.s32.totalorder (!%p203_p3), %s867_s15, 1  ;;  %v933_v1 = vld [vmem:[%s1107_s1] ss:$0 sm:$0xff] (!%p203_p3) }
   0x7   : > { %206 = sbr.rel (%p203_p3) target bundleno = 81 (0x51), region = 36  ;;  %v946_v5 = vld [vmem:[%s1108_s2] ss:$0 sm:$0xff] (!%p203_p3) }
   0xe   : > { %s1116_s15 = smov (!%p249_p4, %s867_s15), 1 }
   0xf   : > { %s747_s19 = sshll.u32 %s1116_s15, 7  ;;  %s748_s23 = sshll.u32 %s1116_s15, 8 }
  0x10   : > { %s926_s22 = scalar_lea.vmem %s1106_s0, %s747_s19  ;;  %s941_s28 = scalar_lea.vmem %s1109_s3, %s748_s23 }
  0x11   : > { %v751_v0 = vld [vmem:[%s926_s22] sm:$0xff]   ;;  %v814_v4 = vld [vmem:[%s926_s22 + $0x8] sm:$0xff]   ;;  %v815_v8 = vld [vmem:[%s926_s22 + $0x10] sm:$0xff]   ;;  %s971_s7 = scalar_lea.vmem %s1110_s4, %s748_s23 }
  0x12   : > { %v752_v2 = vunpack.c.l.bf16 %v751_v0  ;;  %v753_v3 = vunpack.c.h.bf16 %v751_v0  ;;  %v756_v6 = vunpack.c.l.bf16 %v814_v4  ;;  %v757_v7 = vunpack.c.h.bf16 %v814_v4  ;;  %v816_v13 = vld [vmem:[%s926_s22 + $0x18] sm:$0xff]   ;;  %v519_v19 = vld [vmem:[%s941_s28] sm:$0xff]  ;;  %v520_v23 = vld [vmem:[%s941_s28 + $0x8] sm:$0xff] }
  0x13   : > { %v760_v11 = vunpack.c.l.bf16 %v815_v8  ;;  %v761_v12 = vunpack.c.h.bf16 %v815_v8  ;;  %v764_v16 = vunpack.c.l.bf16 %v816_v13  ;;  %v765_v17 = vunpack.c.h.bf16 %v816_v13  ;;  %v521_v25 = vld [vmem:[%s941_s28 + $0x10] sm:$0xff]  ;;  %v522_v27 = vld [vmem:[%s941_s28 + $0x18] sm:$0xff]  ;;  %v817_v42 = vld [vmem:[%s926_s22 + $0x20] sm:$0xff]  }
  0x14   : > { %v352_v9 = vmul.f32 %v752_v2, %v933_v1  ;;  %v353_v10 = vmul.f32 %v753_v3, %v933_v1  ;;  %v354_v14 = vmul.f32 %v756_v6, %v933_v1  ;;  %v355_v15 = vmul.f32 %v757_v7, %v933_v1  ;;  %v818_v43 = vld [vmem:[%s926_s22 + $0x28] sm:$0xff]   ;;  %v523_v47 = vld [vmem:[%s941_s28 + $0x20] sm:$0xff]  ;;  %v525_v59 = vld [vmem:[%s941_s28 + $0x30] sm:$0xff] }
  0x15   : > { %v356_v21 = vmul.f32 %v760_v11, %v933_v1  ;;  %v357_v22 = vmul.f32 %v761_v12, %v933_v1  ;;  %v358_v28 = vmul.f32 %v764_v16, %v933_v1  ;;  %v359_v29 = vmul.f32 %v765_v17, %v933_v1  ;;  %v524_v49 = vld [vmem:[%s941_s28 + $0x28] sm:$0xff]  ;;  %v819_v60 = vld [vmem:[%s926_s22 + $0x30] sm:$0xff]   ;;  %v526_v63 = vld [vmem:[%s941_s28 + $0x38] sm:$0xff] }
  0x16   : > { %v391_v18 = vadd.f32 %v946_v5, %v352_v9  ;;  %v392_v20 = vadd.f32 %v946_v5, %v353_v10  ;;  %v393_v24 = vadd.f32 %v946_v5, %v354_v14  ;;  %v394_v26 = vadd.f32 %v946_v5, %v355_v15  ;;  %v527_v12 = vld [vmem:[%s941_s28 + $0x40] sm:$0xff]  ;;  %v528_v17 = vld [vmem:[%s941_s28 + $0x48] sm:$0xff] }
  0x17   : > { %v395_v36 = vadd.f32 %v946_v5, %v356_v21  ;;  %v396_v37 = vadd.f32 %v946_v5, %v357_v22  ;;  %v397_v50 = vadd.f32 %v946_v5, %v358_v28  ;;  %v398_v51 = vadd.f32 %v946_v5, %v359_v29  ;;  %v820_v21 = vld [vmem:[%s926_s22 + $0x38] sm:$0xff]  }
  0x18   : > { %vm423_vm0 = vcmp.gt.f32.partialorder %v391_v18, 0.0  ;;  %v455_v30 = vmul.f32 0.1, %v391_v18  ;;  %vm424_vm1 = vcmp.gt.f32.partialorder %v392_v20, 0.0  ;;  %v456_v31 = vmul.f32 0.1, %v392_v20 }
  0x19   : > { %vm425_vm2 = vcmp.gt.f32.partialorder %v393_v24, 0.0  ;;  %v457_v32 = vmul.f32 0.1, %v393_v24  ;;  %vm426_vm3 = vcmp.gt.f32.partialorder %v394_v26, 0.0  ;;  %v458_v33 = vmul.f32 0.1, %v394_v26 }
  0x1a   : > { %v487_v34 = vsel %vm423_vm0, %v391_v18, %v455_v30  ;;  %v488_v35 = vsel %vm424_vm1, %v392_v20, %v456_v31  ;;  %vm427_vm4 = vcmp.gt.f32.partialorder %v395_v36, 0.0  ;;  %v459_v46 = vmul.f32 0.1, %v395_v36  ;;  %v529_v18 = vld [vmem:[%s941_s28 + $0x50] sm:$0xff] }
  0x1b   : > { %v551_v38 = vadd.f32 %v519_v19, %v487_v34  ;;  %v552_v39 = vadd.f32 %v520_v23, %v488_v35  ;;  %v489_v40 = vsel %vm425_vm2, %v393_v24, %v457_v32  ;;  %v490_v41 = vsel %vm426_vm3, %v394_v26, %v458_v33  ;;  %v821_v32 = vld [vmem:[%s926_s22 + $0x40] sm:$0xff]  }
  0x1c   : > { %v553_v44 = vadd.f32 %v521_v25, %v489_v40  ;;  %v554_v45 = vadd.f32 %v522_v27, %v490_v41  ;;  %vm428_vm5 = vcmp.gt.f32.partialorder %v396_v37, 0.0  ;;  %v460_v48 = vmul.f32 0.1, %v396_v37 }
  0x1d   : > { %583 = vst [vmem:[%s971_s7] sm:$0xff] %v551_v38  ;;  %584 = vst [vmem:[%s971_s7 + $0x8] sm:$0xff] %v552_v39  ;;  %v491_v52 = vsel %vm427_vm4, %v395_v36, %v459_v46  ;;  %v768_v53 = vunpack.c.l.bf16 %v817_v42  ;;  %v769_v54 = vunpack.c.h.bf16 %v817_v42  ;;  %v772_v55 = vunpack.c.l.bf16 %v818_v43  ;;  %v530_v36 = vld [vmem:[%s941_s28 + $0x58] sm:$0xff]  ;;  %v531_v38 = vld [vmem:[%s941_s28 + $0x60] sm:$0xff] }
  0x1e   : > { %585 = vst [vmem:[%s971_s7 + $0x10] sm:$0xff] %v553_v44  ;;  %586 = vst [vmem:[%s971_s7 + $0x18] sm:$0xff] %v554_v45  ;;  %v555_v56 = vadd.f32 %v523_v47, %v491_v52  ;;  %v492_v57 = vsel %vm428_vm5, %v396_v37, %v460_v48  ;;  %vm429_vm6 = vcmp.gt.f32.partialorder %v397_v50, 0.0  ;;  %v461_v58 = vmul.f32 0.1, %v397_v50  ;;  %v822_v45 = vld [vmem:[%s926_s22 + $0x48] sm:$0xff]  }
  0x1f   : > { %v556_v61 = vadd.f32 %v524_v49, %v492_v57  ;;  %vm430_vm7 = vcmp.gt.f32.partialorder %v398_v51, 0.0  ;;  %v462_v62 = vmul.f32 0.1, %v398_v51  ;;  %v360_v0 = vmul.f32 %v768_v53, %v933_v1  ;;  %v532_v49 = vld [vmem:[%s941_s28 + $0x68] sm:$0xff] }
  0x20   : > { %587 = vst [vmem:[%s971_s7 + $0x20] sm:$0xff] %v555_v56  ;;  %v493_v2 = vsel %vm429_vm6, %v397_v50, %v461_v58  ;;  %v361_v3 = vmul.f32 %v769_v54, %v933_v1  ;;  %v362_v4 = vmul.f32 %v772_v55, %v933_v1  ;;  %v773_v6 = vunpack.c.h.bf16 %v818_v43  ;;  %v823_v58 = vld [vmem:[%s926_s22 + $0x50] sm:$0xff]  }
  0x21   : > { %588 = vst [vmem:[%s971_s7 + $0x28] sm:$0xff] %v556_v61  ;;  %v557_v7 = vadd.f32 %v525_v59, %v493_v2  ;;  %v494_v8 = vsel %vm430_vm7, %v398_v51, %v462_v62  ;;  %v399_v9 = vadd.f32 %v946_v5, %v360_v0  ;;  %v776_v10 = vunpack.c.l.bf16 %v819_v60  ;;  %v533_v61 = vld [vmem:[%s941_s28 + $0x70] sm:$0xff] }
  0x22   : > { %v558_v11 = vadd.f32 %v526_v63, %v494_v8  ;;  %v400_v13 = vadd.f32 %v946_v5, %v361_v3  ;;  %v401_v14 = vadd.f32 %v946_v5, %v362_v4  ;;  %v363_v15 = vmul.f32 %v773_v6, %v933_v1 }
  0x23   : > { %589 = vst [vmem:[%s971_s7 + $0x30] sm:$0xff] %v557_v7  ;;  %vm431_vm8 = vcmp.gt.f32.partialorder %v399_v9, 0.0  ;;  %v463_v16 = vmul.f32 0.1, %v399_v9  ;;  %v364_v19 = vmul.f32 %v776_v10, %v933_v1  ;;  %v777_v20 = vunpack.c.h.bf16 %v819_v60  ;;  %v534_v7 = vld [vmem:[%s941_s28 + $0x78] sm:$0xff] }
  0x24   : > { %590 = vst [vmem:[%s971_s7 + $0x38] sm:$0xff] %v558_v11  ;;  %vm432_vm9 = vcmp.gt.f32.partialorder %v400_v13, 0.0  ;;  %v464_v22 = vmul.f32 0.1, %v400_v13  ;;  %vm433_vm10 = vcmp.gt.f32.partialorder %v401_v14, 0.0  ;;  %v402_v25 = vadd.f32 %v946_v5, %v363_v15  ;;  %v535_v11 = vld [vmem:[%s941_s28 + $0x80] sm:$0xff] }
  0x25   : > { %v465_v23 = vmul.f32 0.1, %v401_v14  ;;  %v495_v24 = vsel %vm431_vm8, %v399_v9, %v463_v16  ;;  %v403_v26 = vadd.f32 %v946_v5, %v364_v19  ;;  %v365_v27 = vmul.f32 %v777_v20, %v933_v1 }
  0x26   : > { %v559_v28 = vadd.f32 %v527_v12, %v495_v24  ;;  %v496_v29 = vsel %vm432_vm9, %v400_v13, %v464_v22  ;;  %v780_v31 = vunpack.c.l.bf16 %v820_v21  ;;  %vm434_vm11 = vcmp.gt.f32.partialorder %v402_v25, 0.0 }
  0x27   : > { %v497_v30 = vsel %vm433_vm10, %v401_v14, %v465_v23  ;;  %v560_v33 = vadd.f32 %v528_v17, %v496_v29  ;;  %v466_v35 = vmul.f32 0.1, %v402_v25  ;;  %vm435_vm12 = vcmp.gt.f32.partialorder %v403_v26, 0.0  ;;  %v536_v14 = vld [vmem:[%s941_s28 + $0x88] sm:$0xff] }
  0x28   : > { %v561_v34 = vadd.f32 %v529_v18, %v497_v30  ;;  %591 = vst [vmem:[%s971_s7 + $0x40] sm:$0xff] %v559_v28  ;;  %v467_v37 = vmul.f32 0.1, %v403_v26  ;;  %v404_v39 = vadd.f32 %v946_v5, %v365_v27  ;;  %v366_v40 = vmul.f32 %v780_v31, %v933_v1  ;;  %v538_v28 = vld [vmem:[%s941_s28 + $0x98] sm:$0xff] }
  0x29   : > { %592 = vst [vmem:[%s971_s7 + $0x48] sm:$0xff] %v560_v33  ;;  %v498_v41 = vsel %vm434_vm11, %v402_v25, %v466_v35  ;;  %v781_v42 = vunpack.c.h.bf16 %v820_v21  ;;  %v784_v43 = vunpack.c.l.bf16 %v821_v32  ;;  %v785_v44 = vunpack.c.h.bf16 %v821_v32  ;;  %v824_v21 = vld [vmem:[%s926_s22 + $0x58] sm:$0xff]   ;;  %v537_v25 = vld [vmem:[%s941_s28 + $0x90] sm:$0xff]  ;;  %v826_v35 = vld [vmem:[%s926_s22 + $0x68] sm:$0xff]  }
  0x2a   : > { %593 = vst [vmem:[%s971_s7 + $0x50] sm:$0xff] %v561_v34  ;;  %v562_v46 = vadd.f32 %v530_v36, %v498_v41  ;;  %v499_v47 = vsel %vm435_vm12, %v403_v26, %v467_v37  ;;  %vm436_vm13 = vcmp.gt.f32.partialorder %v404_v39, 0.0  ;;  %v468_v48 = vmul.f32 0.1, %v404_v39  ;;  %v825_v34 = vld [vmem:[%s926_s22 + $0x60] sm:$0xff]  }
  0x2b   : > { %v563_v50 = vadd.f32 %v531_v38, %v499_v47  ;;  %v405_v51 = vadd.f32 %v946_v5, %v366_v40  ;;  %v367_v52 = vmul.f32 %v781_v42, %v933_v1  ;;  %v368_v53 = vmul.f32 %v784_v43, %v933_v1 }
  0x2c   : > { %594 = vst [vmem:[%s971_s7 + $0x58] sm:$0xff] %v562_v46  ;;  %v500_v54 = vsel %vm436_vm13, %v404_v39, %v468_v48  ;;  %v369_v55 = vmul.f32 %v785_v44, %v933_v1  ;;  %v788_v56 = vunpack.c.l.bf16 %v822_v45  ;;  %v789_v57 = vunpack.c.h.bf16 %v822_v45  ;;  %v539_v39 = vld [vmem:[%s941_s28 + $0xa0] sm:$0xff] }
  0x2d   : > { %595 = vst [vmem:[%s971_s7 + $0x60] sm:$0xff] %v563_v50  ;;  %v564_v59 = vadd.f32 %v532_v49, %v500_v54  ;;  %vm437_vm14 = vcmp.gt.f32.partialorder %v405_v51, 0.0  ;;  %v469_v60 = vmul.f32 0.1, %v405_v51  ;;  %v406_v62 = vadd.f32 %v946_v5, %v367_v52  ;;  %v540_v50 = vld [vmem:[%s941_s28 + $0xa8] sm:$0xff] }
  0x2e   : > { %v407_v63 = vadd.f32 %v946_v5, %v368_v53  ;;  %v408_v0 = vadd.f32 %v946_v5, %v369_v55  ;;  %v370_v2 = vmul.f32 %v788_v56, %v933_v1  ;;  %v371_v3 = vmul.f32 %v789_v57, %v933_v1 }
  0x2f   : > { %596 = vst [vmem:[%s971_s7 + $0x68] sm:$0xff] %v564_v59  ;;  %v501_v4 = vsel %vm437_vm14, %v405_v51, %v469_v60  ;;  %vm438_vm15 = vcmp.gt.f32.partialorder %v406_v62, 0.0  ;;  %v470_v6 = vmul.f32 0.1, %v406_v62  ;;  %v792_v8 = vunpack.c.l.bf16 %v823_v58 }
  0x30   : > { %v565_v9 = vadd.f32 %v533_v61, %v501_v4  ;;  %vm439_vm0 = vcmp.gt.f32.partialorder %v407_v63, 0.0  ;;  %v471_v10 = vmul.f32 0.1, %v407_v63  ;;  %vm440_vm1 = vcmp.gt.f32.partialorder %v408_v0, 0.0 }
  0x31   : > { %v502_v12 = vsel %vm438_vm15, %v406_v62, %v470_v6  ;;  %v472_v13 = vmul.f32 0.1, %v408_v0  ;;  %v409_v15 = vadd.f32 %v946_v5, %v370_v2  ;;  %v410_v16 = vadd.f32 %v946_v5, %v371_v3  ;;  %v542_v62 = vld [vmem:[%s941_s28 + $0xb8] sm:$0xff]  ;;  %v827_v6 = vld [vmem:[%s926_s22 + $0x70] sm:$0xff]  }
  0x32   : > { %597 = vst [vmem:[%s971_s7 + $0x70] sm:$0xff] %v565_v9  ;;  %v566_v17 = vadd.f32 %v534_v7, %v502_v12  ;;  %v503_v18 = vsel %vm439_vm0, %v407_v63, %v471_v10  ;;  %v372_v19 = vmul.f32 %v792_v8, %v933_v1  ;;  %v793_v20 = vunpack.c.h.bf16 %v823_v58  ;;  %v541_v58 = vld [vmem:[%s941_s28 + $0xb0] sm:$0xff]  ;;  %v543_v10 = vld [vmem:[%s941_s28 + $0xc0] sm:$0xff] }
  0x33   : > { %v567_v22 = vadd.f32 %v535_v11, %v503_v18  ;;  %v504_v23 = vsel %vm440_vm1, %v408_v0, %v472_v13  ;;  %vm441_vm2 = vcmp.gt.f32.partialorder %v409_v15, 0.0  ;;  %v473_v24 = vmul.f32 0.1, %v409_v15  ;;  %v828_v11 = vld [vmem:[%s926_s22 + $0x78] sm:$0xff]  }
  0x34   : > { %598 = vst [vmem:[%s971_s7 + $0x78] sm:$0xff] %v566_v17  ;;  %v568_v26 = vadd.f32 %v536_v14, %v504_v23  ;;  %vm442_vm3 = vcmp.gt.f32.partialorder %v410_v16, 0.0  ;;  %v474_v27 = vmul.f32 0.1, %v410_v16  ;;  %v411_v29 = vadd.f32 %v946_v5, %v372_v19  ;;  %v544_v14 = vld [vmem:[%s941_s28 + $0xc8] sm:$0xff]  ;;  %v545_v17 = vld [vmem:[%s941_s28 + $0xd0] sm:$0xff] }
  0x35   : > { %599 = vst [vmem:[%s971_s7 + $0x80] sm:$0xff] %v567_v22  ;;  %v505_v30 = vsel %vm441_vm2, %v409_v15, %v473_v24  ;;  %v373_v31 = vmul.f32 %v793_v20, %v933_v1  ;;  %v796_v32 = vunpack.c.l.bf16 %v824_v21  ;;  %v797_v33 = vunpack.c.h.bf16 %v824_v21 }
  0x36   : > { %600 = vst [vmem:[%s971_s7 + $0x88] sm:$0xff] %v568_v26  ;;  %v569_v36 = vadd.f32 %v537_v25, %v505_v30  ;;  %v506_v37 = vsel %vm442_vm3, %v410_v16, %v474_v27  ;;  %vm443_vm4 = vcmp.gt.f32.partialorder %v411_v29, 0.0  ;;  %v475_v38 = vmul.f32 0.1, %v411_v29  ;;  %v546_v27 = vld [vmem:[%s941_s28 + $0xd8] sm:$0xff] }
  0x37   : > { %v570_v40 = vadd.f32 %v538_v28, %v506_v37  ;;  %v412_v41 = vadd.f32 %v946_v5, %v373_v31  ;;  %v374_v42 = vmul.f32 %v796_v32, %v933_v1  ;;  %v375_v43 = vmul.f32 %v797_v33, %v933_v1 }
  0x38   : > { %601 = vst [vmem:[%s971_s7 + $0x90] sm:$0xff] %v569_v36  ;;  %v507_v44 = vsel %vm443_vm4, %v411_v29, %v475_v38  ;;  %v800_v45 = vunpack.c.l.bf16 %v825_v34  ;;  %v801_v46 = vunpack.c.h.bf16 %v825_v34  ;;  %v804_v47 = vunpack.c.l.bf16 %v826_v35  ;;  %v547_v38 = vld [vmem:[%s941_s28 + $0xe0] sm:$0xff] }
  0x39   : > { %602 = vst [vmem:[%s971_s7 + $0x98] sm:$0xff] %v570_v40  ;;  %v571_v48 = vadd.f32 %v539_v39, %v507_v44  ;;  %vm444_vm5 = vcmp.gt.f32.partialorder %v412_v41, 0.0  ;;  %v476_v49 = vmul.f32 0.1, %v412_v41  ;;  %v413_v51 = vadd.f32 %v946_v5, %v374_v42  ;;  %v548_v39 = vld [vmem:[%s941_s28 + $0xe8] sm:$0xff]  ;;  %v549_v44 = vld [vmem:[%s941_s28 + $0xf0] sm:$0xff] }
  0x3a   : > { %v414_v52 = vadd.f32 %v946_v5, %v375_v43  ;;  %v376_v53 = vmul.f32 %v800_v45, %v933_v1  ;;  %v377_v54 = vmul.f32 %v801_v46, %v933_v1  ;;  %v378_v55 = vmul.f32 %v804_v47, %v933_v1 }
  0x3b   : > { %603 = vst [vmem:[%s971_s7 + $0xa0] sm:$0xff] %v571_v48  ;;  %v508_v56 = vsel %vm444_vm5, %v412_v41, %v476_v49  ;;  %vm445_vm6 = vcmp.gt.f32.partialorder %v413_v51, 0.0  ;;  %v477_v57 = vmul.f32 0.1, %v413_v51  ;;  %v805_v59 = vunpack.c.h.bf16 %v826_v35 }
  0x3c   : > { %v572_v60 = vadd.f32 %v540_v50, %v508_v56  ;;  %vm446_vm7 = vcmp.gt.f32.partialorder %v414_v52, 0.0  ;;  %v478_v61 = vmul.f32 0.1, %v414_v52  ;;  %v415_v63 = vadd.f32 %v946_v5, %v376_v53 }
  0x3d   : > { %v509_v0 = vsel %vm445_vm6, %v413_v51, %v477_v57  ;;  %v416_v2 = vadd.f32 %v946_v5, %v377_v54  ;;  %v417_v3 = vadd.f32 %v946_v5, %v378_v55  ;;  %v379_v4 = vmul.f32 %v805_v59, %v933_v1 }
  0x3e   : > { %604 = vst [vmem:[%s971_s7 + $0xa8] sm:$0xff] %v572_v60  ;;  %v573_v7 = vadd.f32 %v541_v58, %v509_v0  ;;  %v510_v8 = vsel %vm446_vm7, %v414_v52, %v478_v61  ;;  %vm447_vm8 = vcmp.gt.f32.partialorder %v415_v63, 0.0  ;;  %v479_v9 = vmul.f32 0.1, %v415_v63  ;;  %v550_v52 = vld [vmem:[%s941_s28 + $0xf8] sm:$0xff] }
  0x3f   : > { %v574_v12 = vadd.f32 %v542_v62, %v510_v8  ;;  %vm448_vm9 = vcmp.gt.f32.partialorder %v416_v2, 0.0  ;;  %v480_v13 = vmul.f32 0.1, %v416_v2  ;;  %vm449_vm10 = vcmp.gt.f32.partialorder %v417_v3, 0.0 }
  0x40   : > { %605 = vst [vmem:[%s971_s7 + $0xb0] sm:$0xff] %v573_v7  ;;  %v511_v15 = vsel %vm447_vm8, %v415_v63, %v479_v9  ;;  %v481_v16 = vmul.f32 0.1, %v417_v3  ;;  %v418_v18 = vadd.f32 %v946_v5, %v379_v4  ;;  %v808_v19 = vunpack.c.l.bf16 %v827_v6 }
  0x41   : > { %606 = vst [vmem:[%s971_s7 + $0xb8] sm:$0xff] %v574_v12  ;;  %v575_v20 = vadd.f32 %v543_v10, %v511_v15  ;;  %v512_v21 = vsel %vm448_vm9, %v416_v2, %v480_v13  ;;  %v809_v22 = vunpack.c.h.bf16 %v827_v6  ;;  %v812_v23 = vunpack.c.l.bf16 %v828_v11 }
  0x42   : > { %v576_v24 = vadd.f32 %v544_v14, %v512_v21  ;;  %v513_v25 = vsel %vm449_vm10, %v417_v3, %v481_v16  ;;  %vm450_vm11 = vcmp.gt.f32.partialorder %v418_v18, 0.0  ;;  %v482_v26 = vmul.f32 0.1, %v418_v18 }
  0x43   : > { %607 = vst [vmem:[%s971_s7 + $0xc0] sm:$0xff] %v575_v20  ;;  %v577_v28 = vadd.f32 %v545_v17, %v513_v25  ;;  %v380_v29 = vmul.f32 %v808_v19, %v933_v1  ;;  %v381_v30 = vmul.f32 %v809_v22, %v933_v1  ;;  %v382_v31 = vmul.f32 %v812_v23, %v933_v1 }
  0x44   : > { %608 = vst [vmem:[%s971_s7 + $0xc8] sm:$0xff] %v576_v24  ;;  %v514_v32 = vsel %vm450_vm11, %v418_v18, %v482_v26  ;;  %v813_v33 = vunpack.c.h.bf16 %v828_v11 }
  0x45   : > { %609 = vst [vmem:[%s971_s7 + $0xd0] sm:$0xff] %v577_v28  ;;  %v578_v34 = vadd.f32 %v546_v27, %v514_v32  ;;  %v419_v35 = vadd.f32 %v946_v5, %v380_v29  ;;  %v420_v36 = vadd.f32 %v946_v5, %v381_v30  ;;  %v421_v37 = vadd.f32 %v946_v5, %v382_v31 }
  0x46   : > { %v383_v40 = vmul.f32 %v813_v33, %v933_v1 }
  0x47   : > { %610 = vst [vmem:[%s971_s7 + $0xd8] sm:$0xff] %v578_v34  ;;  %vm451_vm12 = vcmp.gt.f32.partialorder %v419_v35, 0.0  ;;  %v483_v41 = vmul.f32 0.1, %v419_v35  ;;  %vm452_vm13 = vcmp.gt.f32.partialorder %v420_v36, 0.0  ;;  %vm453_vm14 = vcmp.gt.f32.partialorder %v421_v37, 0.0 }
  0x48   : > { %v484_v42 = vmul.f32 0.1, %v420_v36  ;;  %v485_v43 = vmul.f32 0.1, %v421_v37  ;;  %v422_v45 = vadd.f32 %v946_v5, %v383_v40 }
  0x49   : > { %v515_v46 = vsel %vm451_vm12, %v419_v35, %v483_v41 }
  0x4a   : > { %v516_v47 = vsel %vm452_vm13, %v420_v36, %v484_v42  ;;  %v579_v48 = vadd.f32 %v547_v38, %v515_v46  ;;  %v517_v1 = vsel %vm453_vm14, %v421_v37, %v485_v43  ;;  %vm454_vm15 = vcmp.gt.f32.partialorder %v422_v45, 0.0 }
  0x4b   : > { %v580_v49 = vadd.f32 %v548_v39, %v516_v47  ;;  %v581_v50 = vadd.f32 %v549_v44, %v517_v1  ;;  %v486_v51 = vmul.f32 0.1, %v422_v45 }
  0x4c   : > { %611 = vst [vmem:[%s971_s7 + $0xe0] sm:$0xff] %v579_v48 }
  0x4d   : > { %612 = vst [vmem:[%s971_s7 + $0xe8] sm:$0xff] %v580_v49  ;;  %613 = vst [vmem:[%s971_s7 + $0xf0] sm:$0xff] %v581_v50  ;;  %v518_v53 = vsel %vm454_vm15, %v422_v45, %v486_v51 }
  0x4e   : > { %v582_v54 = vadd.f32 %v550_v52, %v518_v53 }
  0x50   : > { %614 = vst [vmem:[%s971_s7 + $0xf8] sm:$0xff] %v582_v54 }
  0x51 PF: > { %s14_s17 = sadd.s32 1, %s875_s17   ;;  %s1111_s15 = smov %s871_s16 }
  0x52   : > { %p11_p5 = scmp.ge.s32.totalorder %s14_s17, 4   ;;  %s1112_s16 = smov %s1114_s18 }
  0x54   :  { %13 = sbr.rel (!%p11_p5) target bundleno = 2 (0x2), region = 69 }

// kernel: residual_block_forward.9
= control target key start
LH: loop header
LB: loop body
LE: loop exit
PB: predicated region body
PF: predicated region fallthrough
CT: control target
= control target key end

     0   :  { %s4982_s12 = smov 0   ;;  %s4984_s13 = smov 0   ;;  %s5828_s0 = inlined_call_operand.vmem [shape: bf16[2,16,16,128], index: 0, kind: input, shape index: {}]   ;;  %s5829_s1 = inlined_call_operand.vmem [shape: bf16[9,128,128], index: 1, kind: input, shape index: {}]   ;;  %s5830_s2 = inlined_call_operand.vmem [shape: bf16[2,16,16,128], index: 2, kind: output, shape index: {0}]   ;;  %s5831_s3 = inlined_call_operand.vmem [shape: f32[2,2,128], index: 3, kind: output, shape index: {1}]  }
   0x1   :  { %s4986_s14 = smov 0  }
   0x2 LB: > { %s26_s15 = sadd.s32 1, %s4956_s13  ;;  %p3509_p0 = scmp.ge.s32.totalorder %s4960_s14, 1  ;;  %s4960_s14 = sphi %s4986_s14, %s14_s14   ;;  %s4956_s13 = sphi %s4984_s13, %s5845_s13   ;;  %s4952_s12 = sphi %s4982_s12, %s5844_s12  }
   0x3   : > { %p28_p1 = scmp.ge.s32.totalorder %s26_s15, 2  ;;  %p156_p2 = scmp.lt.s32.totalorder %s4960_s14, 3 }
   0x5   : > { %s5847_s15 = smov (%p28_p1, %s26_s15), 0  ;;  %p157_p3 = pnand %p3509_p0, %p156_p2 }
   0x6   : > { %v4842_v0 = vld [vmem:[%s5829_s1 + $0x40] sm:$0xff] (!%p157_p3)   ;;  %v4844_v2 = vld [vmem:[%s5829_s1 + $0x48] sm:$0xff] (!%p157_p3)   ;;  %p190_p4 = scmp.lt.s32.totalorder (!%p157_p3), %s4952_s12, 1  ;;  %v4846_v4 = vld [vmem:[%s5829_s1 + $0x50] sm:$0xff] (!%p157_p3)   ;;  %vm614_vm0 = vsmask.f32 (!%p157_p3), 7424 }
   0x7   : > { %160 = sbr.rel (%p157_p3) target bundleno = 559 (0x22f), region = 28  ;;  %v4843_v1 = vld [vmem:[%s5829_s1 + $0x100] sm:$0xff] (!%p157_p3)   ;;  %4114 = vmatprep.subr.bf16.mxu1 (!%p157_p3), %v4842_v0  ;;  %v4845_v3 = vld [vmem:[%s5829_s1 + $0x108] sm:$0xff] (!%p157_p3)   ;;  %v4847_v5 = vld [vmem:[%s5829_s1 + $0x110] sm:$0xff] (!%p157_p3)   ;;  %vm613_vm1 = vcmask (!%p157_p3), 1047552   ;;  %vm538_vm3 = vcmask (!%p157_p3), 1040384  }
   0x8   : > { %4306 = vmatprep.subr.bf16.mxu0 (!%p157_p3), %v4843_v1  ;;  %4115 = vmatpush3.bf16.msra.mxu1 (!%p157_p3), %v4842_v0  ;;  %v4848_v6 = vld [vmem:[%s5829_s1 + $0x58] sm:$0xff] (!%p157_p3)   ;;  %v4850_v8 = vld [vmem:[%s5829_s1 + $0x60] sm:$0xff] (!%p157_p3)   ;;  %v4852_v10 = vld [vmem:[%s5829_s1 + $0x68] sm:$0xff] (!%p157_p3)   ;;  %vm539_vm4 = vsmask.f32 (!%p157_p3), 256 }
   0x9   : > { %4307 = vmatpush3.bf16.msra.mxu0 (!%p157_p3), %v4843_v1  ;;  %4116 = vmatprep.subr.bf16.mxu1 (!%p157_p3), %v4844_v2  ;;  %v4849_v7 = vld [vmem:[%s5829_s1 + $0x118] sm:$0xff] (!%p157_p3)   ;;  %v4851_v9 = vld [vmem:[%s5829_s1 + $0x120] sm:$0xff] (!%p157_p3)   ;;  %v4853_v13 = vld [vmem:[%s5829_s1 + $0x128] sm:$0xff] (!%p157_p3)  }
   0xa   : > { %4308 = vmatprep.subr.bf16.mxu0 (!%p157_p3), %v4845_v3  ;;  %v4854_v18 = vld [vmem:[%s5829_s1 + $0x70] sm:$0xff] (!%p157_p3)   ;;  %v4856_v20 = vld [vmem:[%s5829_s1 + $0x78] sm:$0xff] (!%p157_p3)   ;;  %v4859_v22 = vld [vmem:[%s5829_s1] sm:$0xff] (!%p157_p3)  }
   0xb   : > { %v4855_v19 = vld [vmem:[%s5829_s1 + $0x130] sm:$0xff] (!%p157_p3)   ;;  %v4857_v21 = vld [vmem:[%s5829_s1 + $0x138] sm:$0xff] (!%p157_p3)   ;;  %v4861_v23 = vld [vmem:[%s5829_s1 + $0x140] sm:$0xff] (!%p157_p3)  }
   0xc   : > { %4117 = vmatpush3.bf16.msra.mxu1 (!%p157_p3), %v4844_v2  ;;  %v4862_v25 = vld [vmem:[%s5829_s1 + $0x148] sm:$0xff] (!%p157_p3)   ;;  %v4869_v28 = vld [vmem:[%s5829_s1 + $0x10] sm:$0xff] (!%p157_p3)   ;;  %v4867_v32 = vld [vmem:[%s5829_s1 + $0x158] sm:$0xff] (!%p157_p3)  }
   0xd   : > { %4309 = vmatpush3.bf16.msra.mxu0 (!%p157_p3), %v4845_v3  ;;  %4118 = vmatprep.subr.bf16.mxu1 (!%p157_p3), %v4846_v4  ;;  %v4864_v27 = vld [vmem:[%s5829_s1 + $0x8] sm:$0xff] (!%p157_p3)   ;;  %v4866_v29 = vld [vmem:[%s5829_s1 + $0x150] sm:$0xff] (!%p157_p3)   ;;  %v4874_v33 = vld [vmem:[%s5829_s1 + $0x18] sm:$0xff] (!%p157_p3)  }
   0xe   : > { %s5849_s12 = smov (!%p190_p4, %s4952_s12), 1  ;;  %4310 = vmatprep.subr.bf16.mxu0 %v4847_v5  ;;  %v4871_v36 = vld [vmem:[%s5829_s1 + $0x160] sm:$0xff]   ;;  %v4872_v38 = vld [vmem:[%s5829_s1 + $0x168] sm:$0xff]   ;;  %v4876_v43 = vld [vmem:[%s5829_s1 + $0x170] sm:$0xff]  }
   0xf   : > { %s3769_s5 = sshll.u32 %s5849_s12, 7  ;;  %v4879_v37 = vld [vmem:[%s5829_s1 + $0x20] sm:$0xff]   ;;  %v4883_v42 = vld [vmem:[%s5829_s1 + $0x28] sm:$0xff]   ;;  %vm5144_vm2 = vmand %vm613_vm1, %vm614_vm0 }
  0x10   : > { %4119 = vmatpush3.bf16.msra.mxu1 %v4846_v4  ;;  %s5038_s16 = scalar_lea.vmem %s5828_s0, %s3769_s5  ;;  %v4887_v48 = vld [vmem:[%s5829_s1 + $0x30] sm:$0xff]   ;;  %v4877_v54 = vld [vmem:[%s5829_s1 + $0x178] sm:$0xff]   ;;  %v4880_v60 = vld [vmem:[%s5829_s1 + $0x180] sm:$0xff]   ;;  %s5792_s4 = scalar_lea.vmem %s5830_s2, %s3769_s5 }
  0x11   : > { %4311 = vmatpush3.bf16.msra.mxu0 %v4847_v5  ;;  %4120 = vmatprep.subr.bf16.mxu1 %v4848_v6  ;;  %v255_v11 = vld [vmem:[%s5038_s16] sm:$0xf]  ;;  %v256_v12 = vld [vmem:[%s5038_s16 + $0x4] sm:$0xf]  ;;  %v5074_v24 = vld [vmem:[%s5038_s16 + $0x8] sm:$0xff]   ;;  %s3514_s5 = sshll.u32 %s5849_s12, 1 }
  0x12   : > { %4312 = vmatprep.subr.bf16.mxu0 %v4849_v7  ;;  %v282_v14 = vmul.bf16 0.0, %v255_v11  ;;  %v283_v15 = vmul.bf16 0.0, %v256_v12  ;;  %v5049_v16 = vld [vmem:[%s5038_s16] sm:$0xff]   ;;  %v5080_v26 = vld [vmem:[%s5038_s16 + $0x10] sm:$0xff]   ;;  %v5096_v30 = vld [vmem:[%s5038_s16 + $0x18] sm:$0xff]   ;;  %v412_v44 = vshll.u32 %v5074_v24, 16  ;;  %s210_s7 = scalar_lea.vmem %s5831_s3, %s3514_s5 }
  0x13   : > { %4322 = vmatprep.mubr.bf16.mxu0 %v5049_v16  ;;  %v5099_v31 = vld [vmem:[%s5038_s16 + $0x20] sm:$0xff]   ;;  %v405_v34 = vshll.u32 %v5049_v16, 16  ;;  %v5113_v35 = vld [vmem:[%s5038_s16 + $0x28] sm:$0xff]   ;;  %v402_v39 = vshrl.u32 %v5049_v16, 16  ;;  %v5126_v40 = vld [vmem:[%s5038_s16 + $0x30] sm:$0xff]   ;;  %v419_v45 = vshll.u32 %v5080_v26, 16 }
  0x14   : > { %4121 = vmatpush3.bf16.msra.mxu1 %v4848_v6  ;;  %v5051_v17 = vcombine.low %v282_v14, %v283_v15  ;;  %v5152_v49 = vld [vmem:[%s5038_s16 + $0x38] sm:$0xff]   ;;  %v409_v50 = vshrl.u32 %v5074_v24, 16  ;;  %v563_v51 = vrot.slane %v412_v44, 1  ;;  %v416_v52 = vshrl.u32 %v5080_v26, 16  ;;  %v5184_v62 = vld [vmem:[%s5038_s16 + $0x40] sm:$0xff]   ;;  %v5192_v0 = vld [vmem:[%s5038_s16 + $0x48] sm:$0xff]  }
  0x15   : > { %4313 = vmatpush3.bf16.msra.mxu0 %v4849_v7  ;;  %4122 = vmatprep.subr.bf16.mxu1 %v4850_v8  ;;  %v561_v41 = vrot.slane %v405_v34, 1  ;;  %v565_v53 = vrot.slane %v419_v45, 1  ;;  %v4891_v56 = vld [vmem:[%s5829_s1 + $0x38] sm:$0xff]   ;;  %v426_v58 = vshll.u32 %v5096_v30, 16  ;;  %v433_v59 = vshll.u32 %v5099_v31, 16  ;;  %v5189_v63 = vld [vmem:[%s5829_s1 + $0x80] sm:$0xff]   ;;  %vm5299_vm5 = vmand %vm538_vm3, %vm539_vm4 }
  0x16   : > { %4314 = vmatprep.subr.bf16.mxu0 %v4851_v9  ;;  %4130 = vmatprep.mubr.bf16.mxu1 %v5051_v17  ;;  %v564_v57 = vor.u32 %v563_v51, %v409_v50  ;;  %v423_v1 = vshrl.u32 %v5096_v30, 16  ;;  %v430_v2 = vshrl.u32 %v5099_v31, 16  ;;  %v440_v6 = vshll.u32 %v5113_v35, 16  ;;  %v4888_v14 = vld [vmem:[%s5829_s1 + $0x190] sm:$0xff]  }
  0x17   : > { %v562_v46 = vor.u32 %v561_v41, %v402_v39  ;;  %v566_v61 = vor.u32 %v565_v53, %v416_v52  ;;  %v567_v4 = vrot.slane %v426_v58, 1  ;;  %v569_v5 = vrot.slane %v433_v59, 1  ;;  %v5268_v41 = vld [vmem:[%s5038_s16 + $0x68] sm:$0xff]  }
  0x18   : > { %4123 = vmatpush3.bf16.msra.mxu1 %v4850_v8  ;;  %v5198_v3 = vsel %vm5144_vm2, %v564_v57, 0  ;;  %v4884_v8 = vld [vmem:[%s5829_s1 + $0x188] sm:$0xff]   ;;  %v437_v11 = vshrl.u32 %v5113_v35, 16  ;;  %v571_v12 = vrot.slane %v440_v6, 1  ;;  %v444_v15 = vshrl.u32 %v5126_v40, 16 }
  0x19   : > { %4315 = vmatpush3.bf16.msra.mxu0 %v4851_v9  ;;  %4124 = vmatprep.subr.bf16.mxu1 %v4852_v10  ;;  %v5165_v55 = vsel %vm5144_vm2, %v562_v46, 0  ;;  %v5207_v7 = vsel %vm5144_vm2, %v566_v61, 0  ;;  %v447_v9 = vshll.u32 %v5126_v40, 16  ;;  %v458_v53 = vshrl.u32 %v5184_v62, 16 }
  0x1a   : > { %4316 = vmatprep.subr.bf16.mxu0 %v4853_v13  ;;  %v404_v61 = vrot.slane %v402_v39, 7  ;;  %v4898_v39 = vld [vmem:[%s5829_s1 + $0x1b0] sm:$0xff]  }
  0x1c   : > { %4125 = vmatpush3.bf16.msra.mxu1 %v4852_v10  ;;  %v568_v10 = vor.u32 %v567_v4, %v423_v1 }
  0x1d   : > { %4317 = vmatpush3.bf16.msra.mxu0 %v4853_v13  ;;  %4126 = vmatprep.subr.bf16.mxu1 %v4854_v18  ;;  %v570_v13 = vor.u32 %v569_v5, %v430_v2  ;;  %v4921_v5 = vld [vmem:[%s5829_s1 + $0x208] sm:$0xff]  }
  0x1e   : > { %4318 = vmatprep.subr.bf16.mxu0 %v4855_v19 }
  0x20   : > { %4127 = vmatpush3.bf16.msra.mxu1 %v4854_v18  ;;  %v5230_v18 = vld [vmem:[%s5038_s16 + $0x50] sm:$0xff]  }
  0x21   : > { %4319 = vmatpush3.bf16.msra.mxu0 %v4855_v19  ;;  %4128 = vmatprep.subr.bf16.mxu1 %v4856_v20  ;;  %v573_v19 = vrot.slane %v447_v9, 1 }
  0x22   : > { %4320 = vmatprep.subr.bf16.mxu0 %v4857_v21 }
  0x24   : > { %4129 = vmatpush3.bf16.msra.mxu1 %v4856_v20  ;;  %v5235_v20 = vld [vmem:[%s5038_s16 + $0x58] sm:$0xff]  }
  0x25   : > { %4321 = vmatpush3.bf16.msra.mxu0 %v4857_v21  ;;  %4162 = vmatprep.subr.bf16.mxu1 %v4859_v22  ;;  %v5239_v21 = vsel %vm5144_vm2, %v568_v10, 0  ;;  %v475_v10 = vshll.u32 %v5230_v18, 16 }
  0x26   : > { %4354 = vmatprep.subr.bf16.mxu0 %v4861_v23 }
  0x27   : > { %4131 = vmatmul.mubr.bf16.vlgmr.msra.gmra.mrb[0].mxu1 %v5049_v16 }
  0x28   : > { %4323 = vmatmul.mubr.bf16.vlgmr.msra.gmra.mrb[0].mxu0 %v5074_v24  ;;  %4163 = vmatpush3.bf16.msra.mxu1 %v4859_v22  ;;  %v572_v22 = vor.u32 %v571_v12, %v437_v11  ;;  %v5310_v12 = vld [vmem:[%s5038_s16 + $0x70] sm:$0xff]  }
  0x29   : > { %4355 = vmatpush3.bf16.msra.mxu0 %v4861_v23  ;;  %4134 = vmatprep.mubr.bf16.mxu1 %v5074_v24  ;;  %v5245_v23 = vsel %vm5144_vm2, %v570_v13, 0  ;;  %v465_v13 = vshrl.u32 %v5192_v0, 16 }
  0x2a   : > { %4356 = vmatprep.subr.bf16.mxu0 %v4862_v25  ;;  %4326 = vmatprep.mubr.bf16.mxu0 %v5080_v26 }
  0x2b   : > { %4164 = vmatprep.subr.bf16.mxu1 %v4864_v27 }
  0x2c   : > { %4165 = vmatpush3.bf16.msra.mxu1 %v4864_v27  ;;  %v398_v27 = vshll.u32 %v5051_v17, 16 }
  0x2d   : > { %4357 = vmatpush3.bf16.msra.mxu0 %v4862_v25  ;;  %4166 = vmatprep.subr.bf16.mxu1 %v4869_v28  ;;  %v4892_v25 = vld [vmem:[%s5829_s1 + $0x198] sm:$0xff]  }
  0x2e   : > { %4358 = vmatprep.subr.bf16.mxu0 %v4866_v29 }
  0x2f   : > { %4135 = vmatmul.mubr.bf16.gmra.mrb[4].mxu1 %v5080_v26 }
  0x30   : > { %4327 = vmatmul.mubr.bf16.gmra.mrb[4].mxu0 %v5096_v30  ;;  %4138 = vmatprep.mubr.bf16.mxu1 %v5096_v30 }
  0x31   : > { %4359 = vmatpush3.bf16.msra.mxu0 %v4866_v29  ;;  %4330 = vmatprep.mubr.bf16.mxu0 %v5099_v31  ;;  %v454_v29 = vshll.u32 %v5152_v49, 16 }
  0x32   : > { %4360 = vmatprep.subr.bf16.mxu0 %v4867_v32  ;;  %4167 = vmatpush3.bf16.msra.mxu1 %v4869_v28  ;;  %v574_v28 = vor.u32 %v573_v19, %v444_v15 }
  0x33   : > { %4168 = vmatprep.subr.bf16.mxu1 %v4874_v33 }
  0x34   : > { %v5278_v46 = vsel %vm5144_vm2, %v574_v28, 0 }
  0x35   : > { %4361 = vmatpush3.bf16.msra.mxu0 %v4867_v32  ;;  %v395_v32 = vshrl.u32 %v5051_v17, 16  ;;  %v4894_v17 = vld [vmem:[%s5829_s1 + $0x1a0] sm:$0xff]  }
  0x36   : > { %4362 = vmatprep.subr.bf16.mxu0 %v4871_v36  ;;  %4169 = vmatpush3.bf16.msra.mxu1 %v4874_v33  ;;  %v559_v33 = vrot.slane %v398_v27, 1 }
  0x37   : > { %4139 = vmatmul.mubr.bf16.gmra.mrb[8].mxu1 %v5099_v31  ;;  %4170 = vmatprep.subr.bf16.mxu1 %v4879_v37  ;;  %v397_v51 = vrot.slane %v395_v32, 7 }
  0x38   : > { %4331 = vmatmul.mubr.bf16.gmra.mrb[8].mxu0 %v5113_v35  ;;  %4142 = vmatprep.mubr.bf16.mxu1 %v5113_v35 }
  0x39   : > { %4363 = vmatpush3.bf16.msra.mxu0 %v4871_v36  ;;  %4334 = vmatprep.mubr.bf16.mxu0 %v5126_v40  ;;  %v5260_v36 = vld [vmem:[%s5038_s16 + $0x60] sm:$0xff]   ;;  %v400_v4 = vor.u32 %v398_v27, %v397_v51  ;;  %v411_v27 = vrot.slane %v409_v50, 7 }
  0x3a   : > { %4364 = vmatprep.subr.bf16.mxu0 %v4872_v38  ;;  %4171 = vmatpush3.bf16.msra.mxu1 %v4879_v37  ;;  %v5264_v37 = vsel %vm5144_vm2, %v572_v22, 0 }
  0x3b   : > { %4172 = vmatprep.subr.bf16.mxu1 %v4883_v42  ;;  %v541_v22 = vsel %vm5299_vm5, 0, %v400_v4  ;;  %v414_v51 = vor.u32 %v412_v44, %v411_v27  ;;  %v4895_v44 = vld [vmem:[%s5829_s1 + $0x88] sm:$0xff]  }
  0x3d   : > { %4365 = vmatpush3.bf16.msra.mxu0 %v4872_v38  ;;  %v451_v38 = vshrl.u32 %v5152_v49, 16 }
  0x3e   : > { %4366 = vmatprep.subr.bf16.mxu0 %v4876_v43  ;;  %4173 = vmatpush3.bf16.msra.mxu1 %v4883_v42  ;;  %v461_v42 = vshll.u32 %v5184_v62, 16 }
  0x3f   : > { %4143 = vmatmul.mubr.bf16.gmra.mrb[12].mxu1 %v5126_v40  ;;  %4174 = vmatprep.subr.bf16.mxu1 %v4887_v48 }
  0x40   : > { %4335 = vmatmul.mubr.bf16.gmra.mrb[12].mxu0 %v5152_v49  ;;  %4146 = vmatprep.mubr.bf16.mxu1 %v5152_v49 }
  0x41   : > { %4367 = vmatpush3.bf16.msra.mxu0 %v4876_v43  ;;  %4370 = vmatprep.mubr.bf16.mxu0 %v5165_v55  ;;  %v5274_v43 = vor.u32 %v559_v33, %v395_v32  ;;  %v472_v32 = vshrl.u32 %v5230_v18, 16  ;;  %v581_v33 = vrot.slane %v475_v10, 1 }
  0x42   : > { %4368 = vmatprep.subr.bf16.mxu0 %v4877_v54  ;;  %4175 = vmatpush3.bf16.msra.mxu1 %v4887_v48  ;;  %v575_v48 = vrot.slane %v454_v29, 1 }
  0x43   : > { %4176 = vmatprep.subr.bf16.mxu1 %v4891_v56 }
  0x44   : > { %v576_v57 = vor.u32 %v575_v48, %v451_v38  ;;  %v418_v48 = vrot.slane %v416_v52, 7  ;;  %v425_v52 = vrot.slane %v423_v1, 7  ;;  %v5835_v1 = vshrl.u32 %v5260_v36, 16 }
  0x45   : > { %4369 = vmatpush3.bf16.msra.mxu0 %v4877_v54  ;;  %v577_v54 = vrot.slane %v461_v42, 1 }
  0x46   : > { %4402 = vmatprep.subr.bf16.mxu0 %v4880_v60  ;;  %4177 = vmatpush3.bf16.msra.mxu1 %v4891_v56  ;;  %v4896_v56 = vld [vmem:[%s5829_s1 + $0x1a8] sm:$0xff]  }
  0x47   : > { %4147 = vmatmul.mubr.bf16.gmra.mrb[16].mxu1 %v5184_v62  ;;  %4210 = vmatprep.subr.bf16.mxu1 %v5189_v63 }
  0x48   : > { %4371 = vmatmul.mubr.bf16.vlgmr.msra.gmra.mrb[0].mxu0 %v5198_v3  ;;  %4150 = vmatprep.mubr.bf16.mxu1 %v5192_v0 }
  0x49   : > { %4403 = vmatpush3.bf16.msra.mxu0 %v4880_v60  ;;  %4374 = vmatprep.mubr.bf16.mxu0 %v5207_v7  ;;  %v468_v60 = vshll.u32 %v5192_v0, 16 }
  0x4a   : > { %4404 = vmatprep.subr.bf16.mxu0 %v4884_v8 }
  0x4b   : > { %v579_v19 = vrot.slane %v468_v60, 1 }
  0x4d   : > { %4405 = vmatpush3.bf16.msra.mxu0 %v4884_v8  ;;  %v578_v8 = vor.u32 %v577_v54, %v458_v53  ;;  %v580_v16 = vor.u32 %v579_v19, %v465_v13  ;;  %v582_v54 = vor.u32 %v581_v33, %v472_v32  ;;  %v428_v33 = vor.u32 %v426_v58, %v425_v52 }
  0x4e   : > { %4406 = vmatprep.subr.bf16.mxu0 %v4888_v14  ;;  %v432_v58 = vrot.slane %v430_v2, 7 }
  0x4f   : > { %4151 = vmatmul.mubr.bf16.gmra.mrb[20].mxu1 %v5230_v18  ;;  %v5327_v28 = vsel %vm5144_vm2, %v578_v8, 0  ;;  %v5362_v4 = vsel %vm5144_vm2, %v580_v16, 0  ;;  %v5375_v19 = vsel %vm5144_vm2, %v582_v54, 0  ;;  %v5832_v16 = vshll.u32 %v5310_v12, 16 }
  0x50   : > { %4375 = vmatmul.mubr.bf16.gmra.mrb[4].mxu0 %v5239_v21  ;;  %4154 = vmatprep.mubr.bf16.mxu1 %v5235_v20  ;;  %v5413_v52 = vsel %vm5299_vm5, 0, %v428_v33  ;;  %v435_v33 = vor.u32 %v433_v59, %v432_v58 }
  0x51   : > { %4378 = vmatprep.mubr.bf16.mxu0 %v5245_v23  ;;  %4407 = vmatpush3.bf16.msra.mxu0 %v4888_v14  ;;  %v5315_v14 = vsel %vm5144_vm2, %v576_v57, 0  ;;  %v5355_v57 = vld [vmem:[%s5829_s1 + $0x1c0] sm:$0xff]  }
  0x52   : > { %4408 = vmatprep.subr.bf16.mxu0 %v4892_v25  ;;  %v5449_v59 = vsel %vm5299_vm5, 0, %v435_v33 }
  0x55   : > { %4409 = vmatpush3.bf16.msra.mxu0 %v4892_v25  ;;  %v407_v25 = vor.u32 %v405_v34, %v404_v61  ;;  %v482_v34 = vshll.u32 %v5235_v20, 16  ;;  %v479_v61 = vshrl.u32 %v5235_v20, 16 }
  0x56   : > { %4410 = vmatprep.subr.bf16.mxu0 %v4894_v17 }
  0x57   : > { %4155 = vmatmul.mubr.bf16.gmra.mrb[24].mxu1 %v5260_v36  ;;  %v5343_v50 = vsel %vm5299_vm5, 0, %v407_v25  ;;  %v583_v8 = vrot.slane %v482_v34, 1  ;;  %v421_v25 = vor.u32 %v419_v45, %v418_v48 }
  0x58   : > { %4379 = vmatmul.mubr.bf16.gmra.mrb[8].mxu0 %v5264_v37  ;;  %4158 = vmatprep.mubr.bf16.mxu1 %v5268_v41 }
  0x59   : > { %4382 = vmatprep.mubr.bf16.mxu0 %v5278_v46  ;;  %4411 = vmatpush3.bf16.msra.mxu0 %v4894_v17  ;;  %v4901_v17 = vld [vmem:[%s5829_s1 + $0x1b8] sm:$0xff]   ;;  %v584_v27 = vor.u32 %v583_v8, %v479_v61  ;;  %v5401_v48 = vsel %vm5299_vm5, 0, %v421_v25  ;;  %v493_v8 = vshrl.u32 %v5268_v41, 16  ;;  %v589_v25 = vrot.slane %v5832_v16, 1 }
  0x5a   : > { %4412 = vmatprep.subr.bf16.mxu0 %v4896_v56 }
  0x5b   : > { %v5409_v54 = vsel %vm5144_vm2, %v584_v27, 0  ;;  %v4899_v27 = vld [vmem:[%s5829_s1 + $0x98] sm:$0xff]  }
  0x5d   : > { %4413 = vmatpush3.bf16.msra.mxu0 %v4896_v56  ;;  %v5834_v56 = vshll.u32 %v5260_v36, 16 }
  0x5e   : > { %4414 = vmatprep.subr.bf16.mxu0 %v4898_v39 }
  0x5f   : > { %4159 = vmatmul.mubr.bf16.gmra.mrb[28].mxu1 %v5310_v12 }
  0x60   : > { %4383 = vmatmul.mubr.bf16.gmra.mrb[12].mxu0 %v5315_v14  ;;  %4178 = vmatprep.mubr.bf16.mxu1 %v541_v22  ;;  %v585_v22 = vrot.slane %v5834_v56, 1 }
  0x61   : > { %4386 = vmatprep.mubr.bf16.mxu0 %v5327_v28  ;;  %4415 = vmatpush3.bf16.msra.mxu0 %v4898_v39  ;;  %v5371_v39 = vsel %vm5299_vm5, 0, %v414_v51  ;;  %v439_v51 = vrot.slane %v437_v11, 7  ;;  %v500_v11 = vshrl.u32 %v5310_v12, 16 }
  0x62   : > { %4416 = vmatprep.subr.bf16.mxu0 %v4901_v17  ;;  %v586_v45 = vor.u32 %v585_v22, %v5835_v1  ;;  %v5419_v22 = vld [vmem:[%s5038_s16 + $0x78] sm:$0xff]   ;;  %v4902_v1 = vld [vmem:[%s5829_s1 + $0xa0] sm:$0xff]  }
  0x63   : > { %v590_v56 = vor.u32 %v589_v25, %v500_v11  ;;  %v453_v25 = vrot.slane %v451_v38, 7 }
  0x64   : > { %v5423_v2 = vsel %vm5144_vm2, %v586_v45, 0  ;;  %v442_v45 = vor.u32 %v440_v6, %v439_v51  ;;  %v507_v51 = vshrl.u32 %v5419_v22, 16 }
  0x65   : > { %4417 = vmatpush3.bf16.msra.mxu0 %v4901_v17  ;;  %v4897_v17 = vld [vmem:[%s5829_s1 + $0x90] sm:$0xff]   ;;  %v5468_v33 = vsel %vm5144_vm2, %v590_v56, 0  ;;  %v456_v56 = vor.u32 %v454_v29, %v453_v25  ;;  %v5516_v25 = vld [vmem:[%s5829_s1 + $0xc0] sm:$0xff]  }
  0x66   : > { %4450 = vmatprep.subr.bf16.mxu0 %v5355_v57  ;;  %v5453_v6 = vsel %vm5299_vm5, 0, %v442_v45 }
  0x67   : > { %4179 = vmatmul.mubr.bf16.vlgmr.msra.gmra.mrb[0].mxu1 %v5343_v50  ;;  %v5498_v29 = vsel %vm5299_vm5, 0, %v456_v56  ;;  %v4907_v56 = vld [vmem:[%s5829_s1 + $0x1d0] sm:$0xff]  }
  0x68   : > { %4387 = vmatmul.mubr.bf16.gmra.mrb[16].mxu0 %v5362_v4  ;;  %4211 = vmatpush3.bf16.msra.mxu1 %v5189_v63  ;;  %v5833_v63 = vshll.u32 %v5268_v41, 16 }
  0x69   : > { %4182 = vmatprep.mubr.bf16.mxu1 %v5371_v39  ;;  %4390 = vmatprep.mubr.bf16.mxu0 %v5375_v19 }
  0x6a   : > { %4212 = vmatprep.subr.bf16.mxu1 %v4895_v44 }
  0x6c   : > { %4213 = vmatpush3.bf16.msra.mxu1 %v4895_v44  ;;  %v587_v44 = vrot.slane %v5833_v63, 1  ;;  %v510_v63 = vshll.u32 %v5419_v22, 16 }
  0x6d   : > { %4214 = vmatprep.subr.bf16.mxu1 %v4897_v17 }
  0x6e   : > { %v588_v16 = vor.u32 %v587_v44, %v493_v8  ;;  %v591_v44 = vrot.slane %v510_v63, 1 }
  0x6f   : > { %4183 = vmatmul.mubr.bf16.gmra.mrb[4].mxu1 %v5401_v48 }
  0x70   : > { %4391 = vmatmul.mubr.bf16.gmra.mrb[20].mxu0 %v5409_v54  ;;  %4186 = vmatprep.mubr.bf16.mxu1 %v5413_v52  ;;  %v5459_v58 = vsel %vm5144_vm2, %v588_v16, 0  ;;  %v592_v38 = vor.u32 %v591_v44, %v507_v51  ;;  %v4908_v44 = vld [vmem:[%s5829_s1 + $0xb8] sm:$0xff]  }
  0x71   : > { %4394 = vmatprep.mubr.bf16.mxu0 %v5423_v2  ;;  %4215 = vmatpush3.bf16.msra.mxu1 %v4897_v17  ;;  %v446_v17 = vrot.slane %v444_v15, 7  ;;  %v4904_v15 = vld [vmem:[%s5829_s1 + $0xa8] sm:$0xff]  }
  0x72   : > { %4216 = vmatprep.subr.bf16.mxu1 %v4899_v27 }
  0x73   : > { %v449_v16 = vor.u32 %v447_v9, %v446_v17  ;;  %v460_v9 = vrot.slane %v458_v53, 7  ;;  %v5494_v17 = vsel %vm5144_vm2, %v592_v38, 0  ;;  %v4905_v38 = vld [vmem:[%s5829_s1 + $0x1c8] sm:$0xff]  }
  0x75   : > { %4217 = vmatpush3.bf16.msra.mxu1 %v4899_v27  ;;  %v4906_v27 = vld [vmem:[%s5829_s1 + $0xb0] sm:$0xff]   ;;  %v5488_v45 = vsel %vm5299_vm5, 0, %v449_v16  ;;  %v463_v53 = vor.u32 %v461_v42, %v460_v9  ;;  %v474_v16 = vrot.slane %v472_v32, 7  ;;  %v5840_v9 = vshrl.u32 %v5260_v36, 16 }
  0x76   : > { %4218 = vmatprep.subr.bf16.mxu1 %v4902_v1 }
  0x77   : > { %4187 = vmatmul.mubr.bf16.gmra.mrb[8].mxu1 %v5449_v59  ;;  %v477_v32 = vor.u32 %v475_v10, %v474_v16  ;;  %v4911_v16 = vld [vmem:[%s5829_s1 + $0x1e0] sm:$0xff]  }
  0x78   : > { %4395 = vmatmul.mubr.bf16.gmra.mrb[24].mxu0 %v5459_v58  ;;  %4190 = vmatprep.mubr.bf16.mxu1 %v5453_v6 }
  0x79   : > { %4398 = vmatprep.mubr.bf16.mxu0 %v5468_v33  ;;  %4219 = vmatpush3.bf16.msra.mxu1 %v4902_v1  ;;  %v467_v1 = vrot.slane %v465_v13, 7 }
  0x7a   : > { %4220 = vmatprep.subr.bf16.mxu1 %v4904_v15 }
  0x7b   : > { %v470_v13 = vor.u32 %v468_v60, %v467_v1  ;;  %v481_v60 = vrot.slane %v479_v61, 7  ;;  %v488_v1 = vrot.slane %v5840_v9, 7 }
  0x7d   : > { %4221 = vmatpush3.bf16.msra.mxu1 %v4904_v15  ;;  %v5520_v15 = vsel %vm5299_vm5, 0, %v463_v53  ;;  %v5526_v42 = vsel %vm5299_vm5, 0, %v470_v13  ;;  %v484_v61 = vor.u32 %v482_v34, %v481_v60  ;;  %v495_v34 = vrot.slane %v493_v8, 7 }
  0x7e   : > { %4222 = vmatprep.subr.bf16.mxu1 %v4906_v27  ;;  %v5842_v13 = vshll.u32 %v5268_v41, 16 }
  0x7f   : > { %4191 = vmatmul.mubr.bf16.gmra.mrb[12].mxu1 %v5488_v45  ;;  %v5554_v10 = vsel %vm5299_vm5, 0, %v484_v61  ;;  %v4913_v61 = vld [vmem:[%s5829_s1 + $0x1e8] sm:$0xff]  }
  0x80   : > { %4399 = vmatmul.mubr.bf16.gmra.mrb[28].mxu0 %v5494_v17  ;;  %4194 = vmatprep.mubr.bf16.mxu1 %v5498_v29  ;;  %v498_v8 = vor.u32 %v5842_v13, %v495_v34  ;;  %v616_v34 = vsel %vm5144_vm2, %v5274_v43, 0  ;;  %v4912_v43 = vld [vmem:[%s5829_s1 + $0xc8] sm:$0xff]   ;;  %v3516_v13 = vld [vmem:[%s5038_s16 + $0x7c] sm:$0xf] }
  0x81   : > { %4418 = vmatprep.mubr.bf16.mxu0 %v5371_v39  ;;  %4223 = vmatpush3.bf16.msra.mxu1 %v4906_v27  ;;  %v5548_v27 = vsel %vm5299_vm5, 0, %v477_v32 }
  0x82   : > { %4224 = vmatprep.subr.bf16.mxu1 %v4908_v44  ;;  %v5580_v32 = vsel %vm5299_vm5, 0, %v498_v8  ;;  %v4914_v8 = vld [vmem:[%s5829_s1 + $0xd0] sm:$0xff]  }
  0x85   : > { %4225 = vmatpush3.bf16.msra.mxu1 %v4908_v44  ;;  %v5841_v44 = vshll.u32 %v5260_v36, 16 }
  0x86   : > { %4258 = vmatprep.subr.bf16.mxu1 %v5516_v25 }
  0x87   : > { %4195 = vmatmul.mubr.bf16.gmra.mrb[16].mxu1 %v5520_v15  ;;  %v491_v53 = vor.u32 %v5841_v44, %v488_v1  ;;  %v4919_v44 = vld [vmem:[%s5829_s1 + $0x200] sm:$0xff]  }
  0x88   : > { %4419 = vmatmul.mubr.bf16.vlgmr.msra.gmra.mrb[0].mxu0 %v5401_v48  ;;  %4198 = vmatprep.mubr.bf16.mxu1 %v5526_v42 }
  0x89   : > { %4451 = vmatpush3.bf16.msra.mxu0 %v5355_v57  ;;  %4422 = vmatprep.mubr.bf16.mxu0 %v5413_v52  ;;  %v4909_v57 = vld [vmem:[%s5829_s1 + $0x1d8] sm:$0xff]   ;;  %v5574_v60 = vsel %vm5299_vm5, 0, %v491_v53 }
  0x8a   : > { %4452 = vmatprep.subr.bf16.mxu0 %v4905_v38  ;;  %v3515_v53 = vld [vmem:[%s5038_s16 + $0x78] sm:$0xf] }
  0x8d   : > { %4453 = vmatpush3.bf16.msra.mxu0 %v4905_v38  ;;  %v502_v38 = vrot.slane %v500_v11, 7  ;;  %v4915_v11 = vld [vmem:[%s5829_s1 + $0x1f0] sm:$0xff]  }
  0x8e   : > { %4454 = vmatprep.subr.bf16.mxu0 %v4907_v56 }
  0x8f   : > { %4199 = vmatmul.mubr.bf16.gmra.mrb[20].mxu1 %v5548_v27 }
  0x90   : > { %4423 = vmatmul.mubr.bf16.gmra.mrb[4].mxu0 %v5449_v59  ;;  %4202 = vmatprep.mubr.bf16.mxu1 %v5554_v10 }
  0x91   : > { %4426 = vmatprep.mubr.bf16.mxu0 %v5453_v6  ;;  %4455 = vmatpush3.bf16.msra.mxu0 %v4907_v56  ;;  %v5843_v56 = vshll.u32 %v5310_v12, 16 }
  0x92   : > { %4456 = vmatprep.subr.bf16.mxu0 %v4909_v57 }
  0x93   : > { %v505_v9 = vor.u32 %v5843_v56, %v502_v38  ;;  %v303_v38 = vmul.bf16 0.0, %v3516_v13 }
  0x95   : > { %4457 = vmatpush3.bf16.msra.mxu0 %v4909_v57  ;;  %v5596_v1 = vsel %vm5299_vm5, 0, %v505_v9  ;;  %v4917_v57 = vld [vmem:[%s5829_s1 + $0x1f8] sm:$0xff]  }
  0x96   : > { %4458 = vmatprep.subr.bf16.mxu0 %v4911_v16 }
  0x97   : > { %4203 = vmatmul.mubr.bf16.gmra.mrb[24].mxu1 %v5574_v60 }
  0x98   : > { %4427 = vmatmul.mubr.bf16.gmra.mrb[8].mxu0 %v5488_v45  ;;  %4206 = vmatprep.mubr.bf16.mxu1 %v5580_v32 }
  0x99   : > { %4430 = vmatprep.mubr.bf16.mxu0 %v5498_v29  ;;  %4459 = vmatpush3.bf16.msra.mxu0 %v4911_v16  ;;  %v302_v16 = vmul.bf16 0.0, %v3515_v53  ;;  %v4922_v53 = vld [vmem:[%s5829_s1 + $0xf0] sm:$0xff]  }
  0x9a   : > { %4460 = vmatprep.subr.bf16.mxu0 %v4913_v61 }
  0x9d   : > { %4461 = vmatpush3.bf16.msra.mxu0 %v4913_v61  ;;  %v5623_v61 = vcombine.low %v302_v16, %v303_v38  ;;  %v4930_v16 = vld [vmem:[%s5829_s1 + $0x100] sm:$0xff]   ;;  %v4925_v38 = vld [vmem:[%s5829_s1 + $0x218] sm:$0xff]  }
  0x9e   : > { %4462 = vmatprep.subr.bf16.mxu0 %v4915_v11 }
  0x9f   : > { %4207 = vmatmul.mubr.bf16.gmra.mrb[28].mxu1 %v5596_v1  ;;  %v514_v56 = vshrl.u32 %v5623_v61, 16 }
  0xa0   : > { %4431 = vmatmul.mubr.bf16.gmra.mrb[12].mxu0 %v5520_v15  ;;  %4226 = vmatprep.mubr.bf16.mxu1 %v616_v34  ;;  %v517_v34 = vshll.u32 %v5623_v61, 16 }
  0xa1   : > { %4434 = vmatprep.mubr.bf16.mxu0 %v5526_v42  ;;  %4463 = vmatpush3.bf16.msra.mxu0 %v4915_v11  ;;  %v516_v11 = vrot.slane %v514_v56, 7 }
  0xa2   : > { %4464 = vmatprep.subr.bf16.mxu0 %v4917_v57 }
  0xa5   : > { %4465 = vmatpush3.bf16.msra.mxu0 %v4917_v57 }
  0xa6   : > { %4498 = vmatprep.subr.bf16.mxu0 %v4919_v44 }
  0xa7   : > { %4227 = vmatmul.mubr.bf16.vlgmr.msra.gmra.mrb[0].mxu1 %v5165_v55  ;;  %v509_v55 = vrot.slane %v507_v51, 7  ;;  %v4918_v51 = vld [vmem:[%s5829_s1 + $0xe0] sm:$0xff]  }
  0xa8   : > { %4435 = vmatmul.mubr.bf16.gmra.mrb[16].mxu0 %v5548_v27  ;;  %4259 = vmatpush3.bf16.msra.mxu1 %v5516_v25  ;;  %v4916_v25 = vld [vmem:[%s5829_s1 + $0xd8] sm:$0xff]  }
  0xa9   : > { %4230 = vmatprep.mubr.bf16.mxu1 %v5198_v3  ;;  %4438 = vmatprep.mubr.bf16.mxu0 %v5554_v10  ;;  %v512_v9 = vor.u32 %v510_v63, %v509_v55  ;;  %v4920_v63 = vld [vmem:[%s5829_s1 + $0xe8] sm:$0xff]  }
  0xaa   : > { %4260 = vmatprep.subr.bf16.mxu1 %v4912_v43 }
  0xab   : > { %v5645_v57 = vsel %vm5299_vm5, 0, %v512_v9 }
  0xac   : > { %4261 = vmatpush3.bf16.msra.mxu1 %v4912_v43  ;;  %v519_v43 = vor.u32 %v517_v34, %v516_v11 }
  0xad   : > { %4262 = vmatprep.subr.bf16.mxu1 %v4914_v8 }
  0xae   : > { %v558_v13 = vsel %vm5299_vm5, 0, %v519_v43 }
  0xaf   : > { %4231 = vmatmul.mubr.bf16.gmra.mrb[4].mxu1 %v5207_v7 }
  0xb0   : > { %4439 = vmatmul.mubr.bf16.gmra.mrb[20].mxu0 %v5574_v60  ;;  %4234 = vmatprep.mubr.bf16.mxu1 %v5239_v21 }
  0xb1   : > { %4442 = vmatprep.mubr.bf16.mxu0 %v5580_v32  ;;  %4263 = vmatpush3.bf16.msra.mxu1 %v4914_v8  ;;  %v4924_v8 = vld [vmem:[%s5829_s1 + $0xf8] sm:$0xff]  }
  0xb2   : > { %4264 = vmatprep.subr.bf16.mxu1 %v4916_v25 }
  0xb5   : > { %4265 = vmatpush3.bf16.msra.mxu1 %v4916_v25 }
  0xb6   : > { %4266 = vmatprep.subr.bf16.mxu1 %v4918_v51 }
  0xb7   : > { %4235 = vmatmul.mubr.bf16.gmra.mrb[8].mxu1 %v5245_v23 }
  0xb8   : > { %4443 = vmatmul.mubr.bf16.gmra.mrb[24].mxu0 %v5596_v1  ;;  %4238 = vmatprep.mubr.bf16.mxu1 %v5264_v37 }
  0xb9   : > { %4446 = vmatprep.mubr.bf16.mxu0 %v5645_v57  ;;  %4267 = vmatpush3.bf16.msra.mxu1 %v4918_v51 }
  0xba   : > { %4268 = vmatprep.subr.bf16.mxu1 %v4920_v63 }
  0xbd   : > { %4269 = vmatpush3.bf16.msra.mxu1 %v4920_v63 }
  0xbe   : > { %4270 = vmatprep.subr.bf16.mxu1 %v4922_v53 }
  0xbf   : > { %4239 = vmatmul.mubr.bf16.gmra.mrb[12].mxu1 %v5278_v46 }
  0xc0   : > { %4447 = vmatmul.mubr.bf16.gmra.mrb[28].mxu0 %v558_v13  ;;  %4242 = vmatprep.mubr.bf16.mxu1 %v5315_v14 }
  0xc1   : > { %4466 = vmatprep.mubr.bf16.mxu0 %v5074_v24  ;;  %4271 = vmatpush3.bf16.msra.mxu1 %v4922_v53  ;;  %v4923_v24 = vld [vmem:[%s5829_s1 + $0x210] sm:$0xff]  }
  0xc2   : > { %4272 = vmatprep.subr.bf16.mxu1 %v4924_v8 }
  0xc5   : > { %4273 = vmatpush3.bf16.msra.mxu1 %v4924_v8 }
  0xc6   : > { %4546 = vmatprep.subr.bf16.mxu1 %v4930_v16 }
  0xc7   : > { %4243 = vmatmul.mubr.bf16.gmra.mrb[16].mxu1 %v5327_v28 }
  0xc8   : > { %4467 = vmatmul.mubr.bf16.vlgmr.msra.gmra.mrb[0].mxu0 %v5080_v26  ;;  %4246 = vmatprep.mubr.bf16.mxu1 %v5362_v4  ;;  %v4926_v26 = vld [vmem:[%s5829_s1 + $0x220] sm:$0xff]  }
  0xc9   : > { %4499 = vmatpush3.bf16.msra.mxu0 %v4919_v44  ;;  %4470 = vmatprep.mubr.bf16.mxu0 %v5096_v30  ;;  %v4927_v30 = vld [vmem:[%s5829_s1 + $0x228] sm:$0xff]  }
  0xca   : > { %4500 = vmatprep.subr.bf16.mxu0 %v4921_v5 }
  0xcd   : > { %4501 = vmatpush3.bf16.msra.mxu0 %v4921_v5 }
  0xce   : > { %4502 = vmatprep.subr.bf16.mxu0 %v4923_v24 }
  0xcf   : > { %4247 = vmatmul.mubr.bf16.gmra.mrb[20].mxu1 %v5375_v19 }
  0xd0   : > { %4471 = vmatmul.mubr.bf16.gmra.mrb[4].mxu0 %v5099_v31  ;;  %4250 = vmatprep.mubr.bf16.mxu1 %v5409_v54  ;;  %v4928_v31 = vld [vmem:[%s5829_s1 + $0x230] sm:$0xff]  }
  0xd1   : > { %4474 = vmatprep.mubr.bf16.mxu0 %v5113_v35  ;;  %4503 = vmatpush3.bf16.msra.mxu0 %v4923_v24  ;;  %v4929_v35 = vld [vmem:[%s5829_s1 + $0x238] sm:$0xff]  }
  0xd2   : > { %4504 = vmatprep.subr.bf16.mxu0 %v4925_v38 }
  0xd5   : > { %4505 = vmatpush3.bf16.msra.mxu0 %v4925_v38 }
  0xd6   : > { %4506 = vmatprep.subr.bf16.mxu0 %v4926_v26 }
  0xd7   : > { %4251 = vmatmul.mubr.bf16.gmra.mrb[24].mxu1 %v5423_v2 }
  0xd8   : > { %4475 = vmatmul.mubr.bf16.gmra.mrb[8].mxu0 %v5126_v40  ;;  %4254 = vmatprep.mubr.bf16.mxu1 %v5459_v58  ;;  %v4931_v40 = vld [vmem:[%s5829_s1 + $0x108] sm:$0xff]  }
  0xd9   : > { %4478 = vmatprep.mubr.bf16.mxu0 %v5152_v49  ;;  %4507 = vmatpush3.bf16.msra.mxu0 %v4926_v26  ;;  %v4932_v49 = vld [vmem:[%s5829_s1 + $0x110] sm:$0xff]  }
  0xda   : > { %4508 = vmatprep.subr.bf16.mxu0 %v4927_v30 }
  0xdd   : > { %4509 = vmatpush3.bf16.msra.mxu0 %v4927_v30 }
  0xde   : > { %4510 = vmatprep.subr.bf16.mxu0 %v4928_v31 }
  0xdf   : > { %4255 = vmatmul.mubr.bf16.gmra.mrb[28].mxu1 %v5468_v33 }
  0xe0   : > { %4479 = vmatmul.mubr.bf16.gmra.mrb[12].mxu0 %v5184_v62  ;;  %4274 = vmatprep.mubr.bf16.mxu1 %v5343_v50  ;;  %v4933_v50 = vld [vmem:[%s5829_s1 + $0x118] sm:$0xff]  }
  0xe1   : > { %4482 = vmatprep.mubr.bf16.mxu0 %v5192_v0  ;;  %4511 = vmatpush3.bf16.msra.mxu0 %v4928_v31 }
  0xe2   : > { %4512 = vmatprep.subr.bf16.mxu0 %v4929_v35 }
  0xe5   : > { %4513 = vmatpush3.bf16.msra.mxu0 %v4929_v35 }
  0xe7   : > { %4275 = vmatmul.mubr.bf16.vlgmr.msra.gmra.mrb[0].mxu1 %v5371_v39  ;;  %v4934_v39 = vld [vmem:[%s5829_s1 + $0x120] sm:$0xff]  }
  0xe8   : > { %4483 = vmatmul.mubr.bf16.gmra.mrb[16].mxu0 %v5230_v18  ;;  %4554 = vmatpush3.bf16.msra.mxu1 %v4930_v16 }
  0xe9   : > { %4278 = vmatprep.mubr.bf16.mxu1 %v5401_v48  ;;  %4486 = vmatprep.mubr.bf16.mxu0 %v5235_v20  ;;  %v4935_v48 = vld [vmem:[%s5829_s1 + $0x128] sm:$0xff]  }
  0xea   : > { %4547 = vmatprep.subr.bf16.mxu1 %v4931_v40 }
  0xec   : > { %4555 = vmatpush3.bf16.msra.mxu1 %v4931_v40 }
  0xed   : > { %4548 = vmatprep.subr.bf16.mxu1 %v4932_v49 }
  0xef   : > { %4279 = vmatmul.mubr.bf16.gmra.mrb[4].mxu1 %v5413_v52  ;;  %v4936_v52 = vld [vmem:[%s5829_s1 + $0x130] sm:$0xff]  }
  0xf0   : > { %4487 = vmatmul.mubr.bf16.gmra.mrb[20].mxu0 %v5260_v36  ;;  %4282 = vmatprep.mubr.bf16.mxu1 %v5449_v59  ;;  %v4937_v59 = vld [vmem:[%s5829_s1 + $0x138] sm:$0xff]  }
  0xf1   : > { %4490 = vmatprep.mubr.bf16.mxu0 %v5268_v41  ;;  %4556 = vmatpush3.bf16.msra.mxu1 %v4932_v49 }
  0xf2   : > { %4549 = vmatprep.subr.bf16.mxu1 %v4933_v50 }
  0xf5   : > { %4557 = vmatpush3.bf16.msra.mxu1 %v4933_v50 }
  0xf6   : > { %4550 = vmatprep.subr.bf16.mxu1 %v4934_v39 }
  0xf7   : > { %4283 = vmatmul.mubr.bf16.gmra.mrb[8].mxu1 %v5453_v6 }
  0xf8   : > { %4491 = vmatmul.mubr.bf16.gmra.mrb[24].mxu0 %v5310_v12  ;;  %4286 = vmatprep.mubr.bf16.mxu1 %v5488_v45 }
  0xf9   : > { %4494 = vmatprep.mubr.bf16.mxu0 %v5419_v22  ;;  %4558 = vmatpush3.bf16.msra.mxu1 %v4934_v39 }
  0xfa   : > { %4551 = vmatprep.subr.bf16.mxu1 %v4935_v48 }
  0xfd   : > { %4559 = vmatpush3.bf16.msra.mxu1 %v4935_v48 }
  0xfe   : > { %4552 = vmatprep.subr.bf16.mxu1 %v4936_v52 }
  0xff   : > { %4287 = vmatmul.mubr.bf16.gmra.mrb[12].mxu1 %v5498_v29 }
 0x100   : > { %4495 = vmatmul.mubr.bf16.gmra.mrb[28].mxu0 %v5623_v61  ;;  %4290 = vmatprep.mubr.bf16.mxu1 %v5520_v15 }
 0x101   : > { %4514 = vmatprep.mubr.bf16.mxu0 %v5198_v3  ;;  %4560 = vmatpush3.bf16.msra.mxu1 %v4936_v52 }
 0x102   : > { %4553 = vmatprep.subr.bf16.mxu1 %v4937_v59 }
 0x105   : > { %4561 = vmatpush3.bf16.msra.mxu1 %v4937_v59 }
 0x107   : > { %4291 = vmatmul.mubr.bf16.gmra.mrb[16].mxu1 %v5526_v42 }
 0x108   : > { %4515 = vmatmul.mubr.bf16.vlgmr.msra.gmra.mrb[0].mxu0 %v5207_v7  ;;  %4294 = vmatprep.mubr.bf16.mxu1 %v5548_v27 }
 0x109   : > { %4518 = vmatprep.mubr.bf16.mxu0 %v5239_v21 }
 0x10f   : > { %4295 = vmatmul.mubr.bf16.gmra.mrb[20].mxu1 %v5554_v10 }
 0x110   : > { %4519 = vmatmul.mubr.bf16.gmra.mrb[4].mxu0 %v5245_v23  ;;  %4298 = vmatprep.mubr.bf16.mxu1 %v5574_v60 }
 0x111   : > { %4522 = vmatprep.mubr.bf16.mxu0 %v5264_v37 }
 0x117   : > { %4299 = vmatmul.mubr.bf16.gmra.mrb[24].mxu1 %v5580_v32 }
 0x118   : > { %4523 = vmatmul.mubr.bf16.gmra.mrb[8].mxu0 %v5278_v46  ;;  %4302 = vmatprep.mubr.bf16.mxu1 %v5596_v1 }
 0x119   : > { %4526 = vmatprep.mubr.bf16.mxu0 %v5315_v14 }
 0x11f   : > { %4303 = vmatmul.mubr.bf16.gmra.mrb[28].mxu1 %v5645_v57 }
 0x120   : > { %4527 = vmatmul.mubr.bf16.gmra.mrb[12].mxu0 %v5327_v28  ;;  %4338 = vmatprep.mubr.bf16.mxu1 %v5184_v62  ;;  %v593_v62 = vrot.slane %v517_v34, 1 }
 0x121   : > { %4530 = vmatprep.mubr.bf16.mxu0 %v5362_v4 }
 0x127   : > { %4339 = vmatmul.mubr.bf16.vlgmr.msra.gmra.mrb[16].mxu1 %v5192_v0  ;;  %v594_v0 = vor.u32 %v593_v62, %v514_v56 }
 0x128   : > { %4531 = vmatmul.mubr.bf16.gmra.mrb[16].mxu0 %v5375_v19  ;;  %4342 = vmatprep.mubr.bf16.mxu1 %v5230_v18 }
 0x129   : > { %4534 = vmatprep.mubr.bf16.mxu0 %v5409_v54  ;;  %v633_v3 = vsel %vm5144_vm2, %v594_v0, 0 }
 0x12f   : > { %4343 = vmatmul.mubr.bf16.gmra.mrb[20].mxu1 %v5235_v20 }
 0x130   : > { %4535 = vmatmul.mubr.bf16.gmra.mrb[20].mxu0 %v5423_v2  ;;  %4346 = vmatprep.mubr.bf16.mxu1 %v5260_v36 }
 0x131   : > { %4538 = vmatprep.mubr.bf16.mxu0 %v5459_v58 }
 0x137   : > { %4347 = vmatmul.mubr.bf16.gmra.mrb[24].mxu1 %v5268_v41 }
 0x138   : > { %4539 = vmatmul.mubr.bf16.gmra.mrb[24].mxu0 %v5468_v33  ;;  %4350 = vmatprep.mubr.bf16.mxu1 %v5310_v12 }
 0x139   : > { %4542 = vmatprep.mubr.bf16.mxu0 %v5494_v17 }
 0x13f   : > { %4351 = vmatmul.mubr.bf16.gmra.mrb[28].mxu1 %v5419_v22 }
 0x140   : > { %4543 = vmatmul.mubr.bf16.gmra.mrb[28].mxu0 %v633_v3 }
 0x1ba   : > { %v4276_v7 = vpop.f32.mrb[0].mxu1 }
 0x1bb   : > { %v1578_v18 = vpop.f32.mrb[1].mxu1 }
 0x1bc   : > { %v4277_v20 = vpop.f32.mrb[2].mxu1 }
 0x1bd   : > { %v1581_v21 = vpop.f32.mrb[3].mxu1 }
 0x1c2   : > { %v4280_v23 = vpop.f32.mrb[4].mxu1 }
 0x1c3   : > { %v1594_v36 = vpop.f32.mrb[5].mxu1 }
 0x1c4   : > { %v4281_v37 = vpop.f32.mrb[6].mxu1 }
 0x1c5   : > { %v1597_v41 = vpop.f32.mrb[7].mxu1 }
 0x1ca   : > { %v4284_v46 = vpop.f32.mrb[8].mxu1 }
 0x1cb   : > { %v1610_v12 = vpop.f32.mrb[9].mxu1 }
 0x1cc   : > { %v4285_v14 = vpop.f32.mrb[10].mxu1 }
 0x1cd   : > { %v1613_v28 = vpop.f32.mrb[11].mxu1 }
 0x1d2   : > { %v5779_v4 = vpop.f32.mrb[12].mxu1 }
 0x1d3   : > { %v5781_v47 = vpop.f32.mrb[13].mxu1 }
 0x1d4   : > { %v5783_v19 = vpop.f32.mrb[14].mxu1 }
 0x1d5   : > { %v5785_v54 = vpop.f32.mrb[15].mxu1 }
 0x1db   : > { %v4516_v22 = vpop.f32.mrb[0].mxu0 }
 0x1dc   : > { %v4562_v2 = vadd.f32 %v4516_v22, %v4276_v7  ;;  %v2948_v6 = vpop.f32.mrb[1].mxu0 }
 0x1dd   : > { %v4563_v58 = vadd.f32 %v2948_v6, %v1578_v18  ;;  %v4517_v33 = vpop.f32.mrb[2].mxu0 }
 0x1de   : > { %v4564_v45 = vadd.f32 %v4517_v33, %v4277_v20  ;;  %v2951_v17 = vpop.f32.mrb[3].mxu0  ;;  %v3147_v32 = vmul.f32 %v4562_v2, %v4562_v2 }
 0x1df   : > { %v4565_v29 = vadd.f32 %v2951_v17, %v1581_v21  ;;  %v3145_v42 = vmul.f32 %v4563_v58, %v4563_v58 }
 0x1e0   : > { %v3811_v15 = vpack.c.bf16 %v4564_v45, %v4562_v2  ;;  %v3148_v56 = vmul.f32 %v4564_v45, %v4564_v45 }
 0x1e1   : > { %v3107_v27 = vadd.f32 %v4565_v29, %v4563_v58  ;;  %v3146_v10 = vmul.f32 %v4565_v29, %v4565_v29  ;;  %v3806_v60 = vpack.c.bf16 %v4565_v29, %v4563_v58 }
 0x1e2   : > { %3883 = vst [vmem:[%s5792_s4 + $0x8] sm:$0xff] %v3811_v15  }
 0x1e3   : > { %v3108_v1 = vadd.f32 %v4562_v2, %v3107_v27  ;;  %v3177_v44 = vadd.f32 %v3146_v10, %v3145_v42  ;;  %3807 = vst [vmem:[%s5792_s4] sm:$0xff] %v3806_v60   ;;  %v4520_v61 = vpop.f32.mrb[4].mxu0 }
 0x1e4   : > { %v4566_v55 = vadd.f32 %v4520_v61, %v4280_v23  ;;  %v2964_v25 = vpop.f32.mrb[5].mxu0 }
 0x1e5   : > { %v3178_v9 = vadd.f32 %v3177_v44, %v3147_v32  ;;  %v4567_v51 = vadd.f32 %v2964_v25, %v1594_v36  ;;  %v3109_v11 = vadd.f32 %v4564_v45, %v3108_v1  ;;  %v4521_v34 = vpop.f32.mrb[6].mxu0 }
 0x1e6   : > { %v4568_v57 = vadd.f32 %v4521_v34, %v4281_v37  ;;  %v2967_v63 = vpop.f32.mrb[7].mxu0  ;;  %v3151_v30 = vmul.f32 %v4566_v55, %v4566_v55 }
 0x1e7   : > { %v3110_v43 = vadd.f32 %v4567_v51, %v3109_v11  ;;  %v3149_v53 = vmul.f32 %v4567_v51, %v4567_v51  ;;  %v3179_v13 = vadd.f32 %v3178_v9, %v3148_v56  ;;  %v4569_v8 = vadd.f32 %v2967_v63, %v1597_v41 }
 0x1e8   : > { %v3821_v5 = vpack.c.bf16 %v4568_v57, %v4566_v55  ;;  %v3152_v39 = vmul.f32 %v4568_v57, %v4568_v57 }
 0x1e9   : > { %v3180_v16 = vadd.f32 %v3179_v13, %v3149_v53  ;;  %v3111_v24 = vadd.f32 %v4569_v8, %v3110_v43  ;;  %v3150_v38 = vmul.f32 %v4569_v8, %v4569_v8  ;;  %v3816_v26 = vpack.c.bf16 %v4569_v8, %v4567_v51 }
 0x1ea   : > { %3885 = vst [vmem:[%s5792_s4 + $0x18] sm:$0xff] %v3821_v5  }
 0x1eb   : > { %v3112_v31 = vadd.f32 %v4566_v55, %v3111_v24  ;;  %v3181_v35 = vadd.f32 %v3180_v16, %v3150_v38  ;;  %3884 = vst [vmem:[%s5792_s4 + $0x10] sm:$0xff] %v3816_v26   ;;  %v4524_v40 = vpop.f32.mrb[8].mxu0 }
 0x1ec   : > { %v4570_v49 = vadd.f32 %v4524_v40, %v4284_v46  ;;  %v2980_v50 = vpop.f32.mrb[9].mxu0 }
 0x1ed   : > { %v3182_v48 = vadd.f32 %v3181_v35, %v3151_v30  ;;  %v4571_v52 = vadd.f32 %v2980_v50, %v1610_v12  ;;  %v3113_v59 = vadd.f32 %v4568_v57, %v3112_v31  ;;  %v4525_v62 = vpop.f32.mrb[10].mxu0 }
 0x1ee   : > { %v4572_v0 = vadd.f32 %v4525_v62, %v4285_v14  ;;  %v2983_v3 = vpop.f32.mrb[11].mxu0  ;;  %v3155_v46 = vmul.f32 %v4570_v49, %v4570_v49 }
 0x1ef   : > { %v3114_v7 = vadd.f32 %v4571_v52, %v3113_v59  ;;  %v3153_v18 = vmul.f32 %v4571_v52, %v4571_v52  ;;  %v3183_v20 = vadd.f32 %v3182_v48, %v3152_v39  ;;  %v4573_v21 = vadd.f32 %v2983_v3, %v1613_v28 }
 0x1f0   : > { %v3831_v23 = vpack.c.bf16 %v4572_v0, %v4570_v49  ;;  %v3156_v14 = vmul.f32 %v4572_v0, %v4572_v0 }
 0x1f1   : > { %v3184_v36 = vadd.f32 %v3183_v20, %v3153_v18  ;;  %v3115_v37 = vadd.f32 %v4573_v21, %v3114_v7  ;;  %v3154_v41 = vmul.f32 %v4573_v21, %v4573_v21  ;;  %v3826_v22 = vpack.c.bf16 %v4573_v21, %v4571_v52 }
 0x1f2   : > { %3887 = vst [vmem:[%s5792_s4 + $0x28] sm:$0xff] %v3831_v23  }
 0x1f3   : > { %v3116_v2 = vadd.f32 %v4570_v49, %v3115_v37  ;;  %v3185_v6 = vadd.f32 %v3184_v36, %v3154_v41  ;;  %3886 = vst [vmem:[%s5792_s4 + $0x20] sm:$0xff] %v3826_v22   ;;  %v4528_v12 = vpop.f32.mrb[12].mxu0 }
 0x1f4   : > { %v4574_v58 = vadd.f32 %v4528_v12, %v5779_v4  ;;  %v2996_v33 = vpop.f32.mrb[13].mxu0 }
 0x1f5   : > { %v3186_v45 = vadd.f32 %v3185_v6, %v3155_v46  ;;  %v4575_v17 = vadd.f32 %v2996_v33, %v5781_v47  ;;  %v3117_v28 = vadd.f32 %v4572_v0, %v3116_v2  ;;  %v4529_v29 = vpop.f32.mrb[14].mxu0 }
 0x1f6   : > { %v4576_v15 = vadd.f32 %v4529_v29, %v5783_v19  ;;  %v2999_v42 = vpop.f32.mrb[15].mxu0  ;;  %v3159_v56 = vmul.f32 %v4574_v58, %v4574_v58 }
 0x1f7   : > { %v3118_v27 = vadd.f32 %v4575_v17, %v3117_v28  ;;  %v3157_v10 = vmul.f32 %v4575_v17, %v4575_v17  ;;  %v3187_v60 = vadd.f32 %v3186_v45, %v3156_v14  ;;  %v4577_v32 = vadd.f32 %v2999_v42, %v5785_v54 }
 0x1f8   : > { %v3841_v1 = vpack.c.bf16 %v4576_v15, %v4574_v58  ;;  %v3160_v63 = vmul.f32 %v4576_v15, %v4576_v15 }
 0x1f9   : > { %v3188_v44 = vadd.f32 %v3187_v60, %v3157_v10  ;;  %v3119_v4 = vadd.f32 %v4577_v32, %v3118_v27  ;;  %v3158_v61 = vmul.f32 %v4577_v32, %v4577_v32  ;;  %v3836_v55 = vpack.c.bf16 %v4577_v32, %v4575_v17 }
 0x1fa   : > { %3889 = vst [vmem:[%s5792_s4 + $0x38] sm:$0xff] %v3841_v1   ;;  %v4340_v25 = vpop.f32.mrb[16].mxu1 }
 0x1fb   : > { %v3120_v47 = vadd.f32 %v4574_v58, %v3119_v4  ;;  %v3189_v9 = vadd.f32 %v3188_v44, %v3158_v61  ;;  %3888 = vst [vmem:[%s5792_s4 + $0x30] sm:$0xff] %v3836_v55   ;;  %v4532_v51 = vpop.f32.mrb[16].mxu0  ;;  %v1916_v19 = vpop.f32.mrb[17].mxu1 }
 0x1fc   : > { %v4578_v11 = vadd.f32 %v4532_v51, %v4340_v25  ;;  %v3012_v34 = vpop.f32.mrb[17].mxu0  ;;  %v4341_v57 = vpop.f32.mrb[18].mxu1 }
 0x1fd   : > { %v3190_v43 = vadd.f32 %v3189_v9, %v3159_v56  ;;  %v4579_v54 = vadd.f32 %v3012_v34, %v1916_v19  ;;  %v3121_v53 = vadd.f32 %v4576_v15, %v3120_v47  ;;  %v4533_v13 = vpop.f32.mrb[18].mxu0  ;;  %v1919_v8 = vpop.f32.mrb[19].mxu1 }
 0x1fe   : > { %v4580_v5 = vadd.f32 %v4533_v13, %v4341_v57  ;;  %v3015_v16 = vpop.f32.mrb[19].mxu0  ;;  %v3163_v48 = vmul.f32 %v4578_v11, %v4578_v11 }
 0x1ff   : > { %v3122_v24 = vadd.f32 %v4579_v54, %v3121_v53  ;;  %v3161_v38 = vmul.f32 %v4579_v54, %v4579_v54  ;;  %v3191_v26 = vadd.f32 %v3190_v43, %v3160_v63  ;;  %v4581_v30 = vadd.f32 %v3015_v16, %v1919_v8 }
 0x200   : > { %v3851_v31 = vpack.c.bf16 %v4580_v5, %v4578_v11  ;;  %v3164_v20 = vmul.f32 %v4580_v5, %v4580_v5 }
 0x201   : > { %v3192_v35 = vadd.f32 %v3191_v26, %v3161_v38  ;;  %v3123_v40 = vadd.f32 %v4581_v30, %v3122_v24  ;;  %v3162_v49 = vmul.f32 %v4581_v30, %v4581_v30  ;;  %v3846_v50 = vpack.c.bf16 %v4581_v30, %v4579_v54 }
 0x202   : > { %3891 = vst [vmem:[%s5792_s4 + $0x48] sm:$0xff] %v3851_v31   ;;  %v4344_v39 = vpop.f32.mrb[20].mxu1 }
 0x203   : > { %v3124_v52 = vadd.f32 %v4578_v11, %v3123_v40  ;;  %v3193_v59 = vadd.f32 %v3192_v35, %v3162_v49  ;;  %3890 = vst [vmem:[%s5792_s4 + $0x40] sm:$0xff] %v3846_v50   ;;  %v4536_v62 = vpop.f32.mrb[20].mxu0  ;;  %v1932_v0 = vpop.f32.mrb[21].mxu1 }
 0x204   : > { %v4582_v3 = vadd.f32 %v4536_v62, %v4344_v39  ;;  %v3028_v7 = vpop.f32.mrb[21].mxu0  ;;  %v4345_v18 = vpop.f32.mrb[22].mxu1 }
 0x205   : > { %v3194_v21 = vadd.f32 %v3193_v59, %v3163_v48  ;;  %v4583_v23 = vadd.f32 %v3028_v7, %v1932_v0  ;;  %v3125_v36 = vadd.f32 %v4580_v5, %v3124_v52  ;;  %v4537_v37 = vpop.f32.mrb[22].mxu0  ;;  %v1935_v41 = vpop.f32.mrb[23].mxu1 }
 0x206   : > { %v4584_v22 = vadd.f32 %v4537_v37, %v4345_v18  ;;  %v3031_v46 = vpop.f32.mrb[23].mxu0  ;;  %v3167_v15 = vmul.f32 %v4582_v3, %v4582_v3 }
 0x207   : > { %v3126_v2 = vadd.f32 %v4583_v23, %v3125_v36  ;;  %v3165_v6 = vmul.f32 %v4583_v23, %v4583_v23  ;;  %v3195_v12 = vadd.f32 %v3194_v21, %v3164_v20  ;;  %v4585_v58 = vadd.f32 %v3031_v46, %v1935_v41 }
 0x208   : > { %v3861_v33 = vpack.c.bf16 %v4584_v22, %v4582_v3  ;;  %v3168_v4 = vmul.f32 %v4584_v22, %v4584_v22 }
 0x209   : > { %v3196_v14 = vadd.f32 %v3195_v12, %v3165_v6  ;;  %v3127_v45 = vadd.f32 %v4585_v58, %v3126_v2  ;;  %v3166_v17 = vmul.f32 %v4585_v58, %v4585_v58  ;;  %v3856_v28 = vpack.c.bf16 %v4585_v58, %v4583_v23 }
 0x20a   : > { %3893 = vst [vmem:[%s5792_s4 + $0x58] sm:$0xff] %v3861_v33   ;;  %v4348_v29 = vpop.f32.mrb[24].mxu1 }
 0x20b   : > { %v3128_v42 = vadd.f32 %v4582_v3, %v3127_v45  ;;  %v3197_v27 = vadd.f32 %v3196_v14, %v3166_v17  ;;  %3892 = vst [vmem:[%s5792_s4 + $0x50] sm:$0xff] %v3856_v28   ;;  %v4540_v10 = vpop.f32.mrb[24].mxu0  ;;  %v1948_v60 = vpop.f32.mrb[25].mxu1 }
 0x20c   : > { %v4586_v32 = vadd.f32 %v4540_v10, %v4348_v29  ;;  %v3044_v1 = vpop.f32.mrb[25].mxu0  ;;  %v4349_v44 = vpop.f32.mrb[26].mxu1 }
 0x20d   : > { %v3198_v61 = vadd.f32 %v3197_v27, %v3167_v15  ;;  %v4587_v55 = vadd.f32 %v3044_v1, %v1948_v60  ;;  %v3129_v25 = vadd.f32 %v4584_v22, %v3128_v42  ;;  %v4541_v56 = vpop.f32.mrb[26].mxu0  ;;  %v1951_v47 = vpop.f32.mrb[27].mxu1 }
 0x20e   : > { %v4588_v9 = vadd.f32 %v4541_v56, %v4349_v44  ;;  %v3047_v51 = vpop.f32.mrb[27].mxu0  ;;  %v3171_v5 = vmul.f32 %v4586_v32, %v4586_v32 }
 0x20f   : > { %v3130_v19 = vadd.f32 %v4587_v55, %v3129_v25  ;;  %v3169_v11 = vmul.f32 %v4587_v55, %v4587_v55  ;;  %v3199_v34 = vadd.f32 %v3198_v61, %v3168_v4  ;;  %v4589_v57 = vadd.f32 %v3047_v51, %v1951_v47 }
 0x210   : > { %v3871_v63 = vpack.c.bf16 %v4588_v9, %v4586_v32  ;;  %v3172_v40 = vmul.f32 %v4588_v9, %v4588_v9 }
 0x211   : > { %v3200_v43 = vadd.f32 %v3199_v34, %v3169_v11  ;;  %v3131_v54 = vadd.f32 %v4589_v57, %v3130_v19  ;;  %v3170_v53 = vmul.f32 %v4589_v57, %v4589_v57  ;;  %v3866_v13 = vpack.c.bf16 %v4589_v57, %v4587_v55 }
 0x212   : > { %3895 = vst [vmem:[%s5792_s4 + $0x68] sm:$0xff] %v3871_v63   ;;  %v4352_v8 = vpop.f32.mrb[28].mxu1 }
 0x213   : > { %v3132_v16 = vadd.f32 %v4586_v32, %v3131_v54  ;;  %v3201_v24 = vadd.f32 %v3200_v43, %v3170_v53  ;;  %3894 = vst [vmem:[%s5792_s4 + $0x60] sm:$0xff] %v3866_v13   ;;  %v4544_v38 = vpop.f32.mrb[28].mxu0  ;;  %v1964_v26 = vpop.f32.mrb[29].mxu1 }
 0x214   : > { %v4590_v30 = vadd.f32 %v4544_v38, %v4352_v8  ;;  %v3060_v31 = vpop.f32.mrb[29].mxu0  ;;  %v4353_v35 = vpop.f32.mrb[30].mxu1 }
 0x215   : > { %v3202_v49 = vadd.f32 %v3201_v24, %v3171_v5  ;;  %v4591_v50 = vadd.f32 %v3060_v31, %v1964_v26  ;;  %v3133_v39 = vadd.f32 %v4588_v9, %v3132_v16  ;;  %v4545_v48 = vpop.f32.mrb[30].mxu0  ;;  %v1967_v52 = vpop.f32.mrb[31].mxu1 }
 0x216   : > { %v4592_v59 = vadd.f32 %v4545_v48, %v4353_v35  ;;  %v3063_v62 = vpop.f32.mrb[31].mxu0  ;;  %v3175_v41 = vmul.f32 %v4590_v30, %v4590_v30 }
 0x217   : > { %v3134_v0 = vadd.f32 %v4591_v50, %v3133_v39  ;;  %v3173_v3 = vmul.f32 %v4591_v50, %v4591_v50  ;;  %v3203_v7 = vadd.f32 %v3202_v49, %v3172_v40  ;;  %v4593_v18 = vadd.f32 %v3063_v62, %v1967_v52 }
 0x218   : > { %v3881_v20 = vpack.c.bf16 %v4592_v59, %v4590_v30  ;;  %v3176_v2 = vmul.f32 %v4592_v59, %v4592_v59 }
 0x219   : > { %v3204_v21 = vadd.f32 %v3203_v7, %v3173_v3  ;;  %v3135_v23 = vadd.f32 %v4593_v18, %v3134_v0  ;;  %v3174_v36 = vmul.f32 %v4593_v18, %v4593_v18  ;;  %v3876_v37 = vpack.c.bf16 %v4593_v18, %v4591_v50 }
 0x21a   : > { %3897 = vst [vmem:[%s5792_s4 + $0x78] sm:$0xff] %v3881_v20  }
 0x21b   : > { %v3136_v22 = vadd.f32 %v4590_v30, %v3135_v23  ;;  %v3205_v46 = vadd.f32 %v3204_v21, %v3174_v36  ;;  %3896 = vst [vmem:[%s5792_s4 + $0x70] sm:$0xff] %v3876_v37  }
 0x21d   : > { %v3137_v6 = vadd.f32 %v4592_v59, %v3136_v22  ;;  %v3206_v12 = vadd.f32 %v3205_v46, %v3175_v41 }
 0x21f   : > { %v3138_v58 = vrot.slane %v3137_v6, 4  ;;  %v3207_v33 = vadd.f32 %v3206_v12, %v3176_v2 }
 0x221   : > { %v3139_v14 = vadd.f32 %v3138_v58, %v3137_v6  ;;  %v3208_v45 = vrot.slane %v3207_v33, 4 }
 0x223   : > { %v3140_v17 = vrot.slane %v3139_v14, 2  ;;  %v3209_v28 = vadd.f32 %v3208_v45, %v3207_v33 }
 0x225   : > { %v3141_v29 = vadd.f32 %v3140_v17, %v3139_v14  ;;  %v3210_v15 = vrot.slane %v3209_v28, 2 }
 0x227   : > { %v3142_v42 = vrot.slane %v3141_v29, 1  ;;  %v3211_v27 = vadd.f32 %v3210_v15, %v3209_v28 }
 0x229   : > { %v3212_v10 = vrot.slane %v3211_v27, 1  ;;  %v3143_v60 = vadd.f32 %v3142_v42, %v3141_v29 }
 0x22b   : > { %v3213_v32 = vadd.f32 %v3212_v10, %v3211_v27 }
 0x22d   : > { %v3376_v1 = vsel %vm538_vm3, %v3143_v60, %v3213_v32 }
 0x22e   : > { %3377 = vst [vmem:[%s210_s7] sm:$0x3] %v3376_v1 }
 0x22f PF: > { %s14_s14 = sadd.s32 1, %s4960_s14   ;;  %s5844_s12 = smov %s4956_s13 }
 0x230   : > { %p11_p5 = scmp.ge.s32.totalorder %s14_s14, 4   ;;  %s5845_s13 = smov %s5847_s15 }
 0x232   :  { %13 = sbr.rel (!%p11_p5) target bundleno = 2 (0x2), region = 81 }

</bundles_post_ra>
